<compile_context>
chip_gen: v7x
topology: tpu7x:2x2x1
jax: 0.10.0
libtpu: 0.0.40
codegen_flags: <defaults>
</compile_context>

<pallas_src>
import math

import jax
import jax.numpy as jnp
import numpy as np
from jax.experimental import pallas as pl
from jax.experimental.pallas import tpu as pltpu

# ----------------------- hyper-parameters (small, deterministic) -----------------
src_vocab_size = 16
d_model = 128
d_k = 32
d_v = 32
n_heads = 4
d_ff = 256
n_layers = 2
MAX_LEN = 64
LN_EPS = 1e-5          # torch nn.LayerNorm default

# None => whole batch in one grid step (recommended on single-TC v5e/v6e).
# On v7x set to 1 to shard the batch across the two TensorCores (benchmark it:
# per-step overhead + duplicated weight DMA may outweigh the split at S=8).
BATCH_TILE = None

# rows of the packed per-layer (6, d_model) bias / LayerNorm parameter block
_R_BO, _R_LN1G, _R_LN1B, _R_FFB2, _R_LN2G, _R_LN2B = range(6)


# ----------------------------- fused Pallas kernel --------------------------------
def encoder_stack_kernel(x_ref, pad_ref, wqkv_ref, wo_ref, w1_ref, w2_ref,
                         vec_ref, bqkv_ref, b1_ref, out_ref, attn_ref):
    """Full encoder stack for one batch tile (all layers, MHA+LN+FFN+LN fused)."""
    Bt, S, D = x_ref.shape
    T = Bt * S
    HK = n_heads * d_k
    HV = n_heads * d_v
    x = x_ref[...].reshape(T, D)                   # (T, D) f32 token matrix
    key_pad = pad_ref[...] != 0                    # (Bt, 1, S) True where key is PAD
    scale = 1.0 / np.sqrt(d_k)

    attn_tiles = []                                # lane-major attn tiles, stored once at the end
    for li in range(n_layers):                     # static unroll over layers
        vec = vec_ref[li]                          # (6, D) packed biases / LN params
        bo = vec[_R_BO:_R_BO + 1]
        g1, be1 = vec[_R_LN1G:_R_LN1G + 1], vec[_R_LN1B:_R_LN1B + 1]
        b2 = vec[_R_FFB2:_R_FFB2 + 1]
        g2, be2 = vec[_R_LN2G:_R_LN2G + 1], vec[_R_LN2B:_R_LN2B + 1]
        bqkv = bqkv_ref[li]                        # (1, 2*HK+HV)
        b1 = b1_ref[li]                            # (1, d_ff)

        # ---- fused QKV projection: one (T,D)@(D,3*HK) MXU op + one bias add ----
        xb = x.astype(jnp.bfloat16)
        qkv = jnp.dot(xb, wqkv_ref[li], preferred_element_type=jnp.float32) + bqkv
        q = qkv[:, 0:HK] * scale                   # fold 1/sqrt(d_k) into Q once per layer
        k = qkv[:, HK:2 * HK]
        v = qkv[:, 2 * HK:2 * HK + HV]

        out_blocks = []
        for bi in range(Bt):                       # static unroll over batch tile
            qb = q[bi * S:(bi + 1) * S]            # (S, HK)
            kb = k[bi * S:(bi + 1) * S]
            vb = v[bi * S:(bi + 1) * S]
            key_row = key_pad[bi]                  # (1, S)

            # per-head scores stacked along sublanes -> (H*S, S); mask / softmax once for all heads
            s_all = jnp.concatenate(
                [jnp.dot(qb[:, h * d_k:(h + 1) * d_k],
                         kb[:, h * d_k:(h + 1) * d_k].T,
                         preferred_element_type=jnp.float32)
                 for h in range(n_heads)], axis=0)                       # (H*S, S)
            s_all = jnp.where(key_row, -1e9, s_all)                      # masked_fill_(mask, -1e9)
            s_all = s_all - jnp.max(s_all, axis=-1, keepdims=True)
            p_all = jnp.exp(s_all)
            p_all = p_all * pl.reciprocal(jnp.sum(p_all, axis=-1, keepdims=True),
                                          approx=True)

            # per-head context, concatenated along lanes -> one full-width W_O matmul
            p_heads = [p_all[h * S:(h + 1) * S] for h in range(n_heads)]  # (S, S) each
            ctx_all = jnp.concatenate(
                [jnp.dot(p_heads[h], vb[:, h * d_v:(h + 1) * d_v],
                         preferred_element_type=jnp.float32)
                 for h in range(n_heads)], axis=-1)                       # (S, H*d_v)
            out_blocks.append(jnp.dot(ctx_all.astype(jnp.bfloat16), wo_ref[li],
                                      preferred_element_type=jnp.float32))

            # lane-major attention tile (S, H*S) for the single lane-dense output store
            attn_tiles.append(jnp.concatenate(p_heads, axis=-1))

        attn_out = out_blocks[0] if Bt == 1 else jnp.concatenate(out_blocks, axis=0)

        # ---- residual + LayerNorm 1 (f32 elementwise) ----
        y = attn_out + (x + bo)
        mean = jnp.mean(y, axis=-1, keepdims=True)
        var = jnp.mean((y - mean) ** 2, axis=-1, keepdims=True)
        x = (y - mean) * jax.lax.rsqrt(var + LN_EPS) * g1 + be1

        # ---- position-wise FFN (Conv1d k=1 == Linear) + residual + LayerNorm 2 ----
        hfc = jnp.dot(x.astype(jnp.bfloat16), w1_ref[li],
                      preferred_element_type=jnp.float32) + b1
        hfc = jnp.maximum(hfc, 0.0)                # ReLU
        y2 = jnp.dot(hfc.astype(jnp.bfloat16), w2_ref[li],
                     preferred_element_type=jnp.float32) + b2
        y2 = y2 + x
        mean = jnp.mean(y2, axis=-1, keepdims=True)
        var = jnp.mean((y2 - mean) ** 2, axis=-1, keepdims=True)
        x = (y2 - mean) * jax.lax.rsqrt(var + LN_EPS) * g2 + be2

    out_ref[...] = x.reshape(Bt, S, D)
    # single lane-dense store of all attention maps: (S, L*Bt*H*S) == (8, 128) at default config
    attn_ref[0] = jnp.concatenate(attn_tiles, axis=-1)


# ------------------------------- wrapper -------------------------------------------
def _const_spec(shape):
    n = len(shape)
    return pl.BlockSpec(shape, lambda b, n=n: (0,) * n)


def encoder_pallas(x, pad, params):
    B, S, D = x.shape
    Bt = B if BATCH_TILE is None else BATCH_TILE
    assert B % Bt == 0
    G = B // Bt
    L = n_layers
    HK, HV = n_heads * d_k, n_heads * d_v
    attn_w = L * Bt * n_heads * S            # lane width of the packed attention output

    out, attn_raw = pl.pallas_call(
        encoder_stack_kernel,
        grid=(G,),
        in_specs=[
            pl.BlockSpec((Bt, S, D), lambda b: (b, 0, 0)),      # x
            pl.BlockSpec((Bt, 1, S), lambda b: (b, 0, 0)),      # key pad vector
            _const_spec((L, D, 2 * HK + HV)),                   # fused W_QKV (bf16)
            _const_spec((L, HV, D)),                            # W_O (bf16, unsplit)
            _const_spec((L, D, d_ff)),                          # FFN W1 (bf16)
            _const_spec((L, d_ff, D)),                          # FFN W2 (bf16)
            _const_spec((L, 6, D)),                             # packed biases / LN params (f32)
            _const_spec((L, 1, 2 * HK + HV)),                   # fused QKV bias (f32)
            _const_spec((L, 1, d_ff)),                          # FFN hidden bias (f32)
        ],
        out_specs=[
            pl.BlockSpec((Bt, S, D), lambda b: (b, 0, 0)),
            pl.BlockSpec((1, S, attn_w), lambda b: (b, 0, 0)),  # lane-dense packed attn maps
        ],
        out_shape=[
            jax.ShapeDtypeStruct((B, S, D), jnp.float32),
            jax.ShapeDtypeStruct((G, S, attn_w), jnp.float32),
        ],
        compiler_params=pltpu.CompilerParams(
            dimension_semantics=(("parallel",) if G > 1 else ("arbitrary",)),
            vmem_limit_bytes=32 * 1024 * 1024,
        ),
    )(x, pad, params["wqkv"], params["wo"], params["w1"], params["w2"],
      params["vecs"], params["bqkv"], params["b1"])

    # Unpack attention maps (layout glue in plain JAX, outside the kernel):
    # (G, S, L*Bt*H*S) -> (G, Sq, L, Bt, H, Sk) -> (L, B, H, Sq, Sk)
    attn = attn_raw.reshape(G, S, L, Bt, n_heads, S)
    attn = attn.transpose(2, 0, 3, 4, 1, 5).reshape(L, B, n_heads, S, S)
    return out, attn


def make_pe_table(max_len, dm):
    position = jnp.arange(max_len, dtype=jnp.float32)[:, None]
    div_term = jnp.exp(jnp.arange(0, dm, 2, dtype=jnp.float32) * (-math.log(10000.0) / dm))
    pe = jnp.zeros((max_len, dm), jnp.float32)
    pe = pe.at[:, 0::2].set(jnp.sin(position * div_term))
    pe = pe.at[:, 1::2].set(jnp.cos(position * div_term))
    return pe


def init_params(key):
    keys = jax.random.split(key, 1 + 10 * n_layers)
    emb = jax.random.normal(keys[0], (src_vocab_size, d_model), jnp.float32) * 0.02

    wqkv, wo, w1, w2, vecs, bqkv, b1s = [], [], [], [], [], [], []
    ki = 1
    one = jnp.ones((d_model,), jnp.float32)
    zero = jnp.zeros((d_model,), jnp.float32)
    for _ in range(n_layers):
        wq = jax.random.normal(keys[ki + 0], (d_model, n_heads * d_k), jnp.float32) * 0.02
        wk = jax.random.normal(keys[ki + 1], (d_model, n_heads * d_k), jnp.float32) * 0.02
        wv = jax.random.normal(keys[ki + 2], (d_model, n_heads * d_v), jnp.float32) * 0.02
        wqkv.append(jnp.concatenate([wq, wk, wv], axis=-1))            # (D, 2*HK+HV)
        wo.append(jax.random.normal(keys[ki + 3], (n_heads * d_v, d_model), jnp.float32) * 0.02)
        w1.append(jax.random.normal(keys[ki + 4], (d_model, d_ff), jnp.float32) * 0.02)
        w2.append(jax.random.normal(keys[ki + 5], (d_ff, d_model), jnp.float32) * 0.02)
        bo = jax.random.normal(keys[ki + 6], (d_model,), jnp.float32) * 0.02
        b2 = jax.random.normal(keys[ki + 7], (d_model,), jnp.float32) * 0.02
        # rows: bo, ln1_g, ln1_b, ffn_b2, ln2_g, ln2_b
        vecs.append(jnp.stack([bo, one, zero, b2, one, zero]))
        bqkv.append(jax.random.normal(keys[ki + 8], (1, 2 * n_heads * d_k + n_heads * d_v),
                                      jnp.float32) * 0.02)
        b1s.append(jax.random.normal(keys[ki + 9], (1, d_ff), jnp.float32) * 0.02)
        ki += 10

    return {
        "emb": emb,
        "pe": make_pe_table(MAX_LEN, d_model),
        "wqkv": jnp.stack(wqkv).astype(jnp.bfloat16),   # (L, D, 2*HK+HV)
        "wo": jnp.stack(wo).astype(jnp.bfloat16),       # (L, HV, D)
        "w1": jnp.stack(w1).astype(jnp.bfloat16),       # (L, D, d_ff)
        "w2": jnp.stack(w2).astype(jnp.bfloat16),       # (L, d_ff, D)
        "vecs": jnp.stack(vecs),                        # (L, 6, D) f32
        "bqkv": jnp.stack(bqkv),                        # (L, 1, 2*HK+HV) f32
        "b1": jnp.stack(b1s),                           # (L, 1, d_ff) f32
    }


@jax.jit
def encoder_forward(enc_inputs, params):
    """enc_inputs: int32 [batch, seq] token ids (0 == PAD)."""
    B, S = enc_inputs.shape
    # src embedding + positional encoding (glue, plain JAX)
    x = params["emb"][enc_inputs] + params["pe"][:S][None, :, :]      # (B, S, D)
    # TODO(synk): nn.Dropout(p=0.1) is treated as identity (eval-mode semantics).
    pad = (enc_inputs == 0).astype(jnp.int32)[:, None, :]             # (B, 1, S)
    out, attn_stack = encoder_pallas(x, pad, params)
    attns = [attn_stack[l] for l in range(n_layers)]
    return out, attns


if __name__ == "__main__":
    key = jax.random.PRNGKey(0)
    pkey, dkey = jax.random.split(key)
    params = init_params(pkey)

    batch, seq = 2, 8
    enc_inputs = jax.random.randint(dkey, (batch, seq), 0, src_vocab_size, dtype=jnp.int32)
    # force a couple of PAD tokens so the attention mask path is exercised
    enc_inputs = enc_inputs.at[0, -2:].set(0)
    enc_inputs = enc_inputs.at[1, -1:].set(0)

    enc_outputs, enc_self_attns = encoder_forward(enc_inputs, params)
    enc_outputs = jax.block_until_ready(enc_outputs)
    for a in enc_self_attns:
        jax.block_until_ready(a)

    assert enc_outputs.shape == (batch, seq, d_model)
    assert len(enc_self_attns) == n_layers
    assert enc_self_attns[0].shape == (batch, n_heads, seq, seq)
    assert bool(jnp.all(jnp.isfinite(enc_outputs)))
    for a in enc_self_attns:
        assert bool(jnp.all(jnp.isfinite(a)))
        # attention rows over non-pad keys should be ~normalized (approx reciprocal)
        assert bool(jnp.all(jnp.abs(jnp.sum(a, axis=-1) - 1.0) < 1e-2))
    print("KERNEL_OK")
</pallas_src>

<mosaic_0001>
module attributes {stable_mosaic.version = 11 : i64} {
  func.func @encoder_stack_kernel(%arg0: i32, %arg1: memref<2x8x128xf32, #tpu.memory_space<vmem>>, %arg2: memref<2x1x8xi32, #tpu.memory_space<vmem>>, %arg3: memref<2x128x384xbf16, #tpu.memory_space<vmem>>, %arg4: memref<2x128x128xbf16, #tpu.memory_space<vmem>>, %arg5: memref<2x128x256xbf16, #tpu.memory_space<vmem>>, %arg6: memref<2x256x128xbf16, #tpu.memory_space<vmem>>, %arg7: memref<2x6x128xf32, #tpu.memory_space<vmem>>, %arg8: memref<2x1x384xf32, #tpu.memory_space<vmem>>, %arg9: memref<2x1x256xf32, #tpu.memory_space<vmem>>, %arg10: memref<2x8x128xf32, #tpu.memory_space<vmem>>, %arg11: memref<1x8x128xf32, #tpu.memory_space<vmem>>) attributes {dimension_semantics = [#tpu.dimension_semantics<arbitrary>], iteration_bounds = array<i64: 1>, scalar_prefetch = 0 : i64, scratch_operands = 0 : i64, tpu.core_type = #tpu.core_type<tc>, window_params = [{transform_indices = @transform_0, window_bounds = array<i64: 2, 8, 128>}, {transform_indices = @transform_1, window_bounds = array<i64: 2, 1, 8>}, {pipeline_mode = #tpu.pipeline_mode<synchronous>, transform_indices = @transform_2, window_bounds = array<i64: 2, 128, 384>}, {pipeline_mode = #tpu.pipeline_mode<synchronous>, transform_indices = @transform_3, window_bounds = array<i64: 2, 128, 128>}, {pipeline_mode = #tpu.pipeline_mode<synchronous>, transform_indices = @transform_4, window_bounds = array<i64: 2, 128, 256>}, {pipeline_mode = #tpu.pipeline_mode<synchronous>, transform_indices = @transform_5, window_bounds = array<i64: 2, 256, 128>}, {pipeline_mode = #tpu.pipeline_mode<synchronous>, transform_indices = @transform_6, window_bounds = array<i64: 2, 6, 128>}, {pipeline_mode = #tpu.pipeline_mode<synchronous>, transform_indices = @transform_7, window_bounds = array<i64: 2, 1, 384>}, {pipeline_mode = #tpu.pipeline_mode<synchronous>, transform_indices = @transform_8, window_bounds = array<i64: 2, 1, 256>}, {transform_indices = @transform_9, window_bounds = array<i64: 2, 8, 128>}, {transform_indices = @transform_10, window_bounds = array<i64: 1, 8, 128>}]} {
    %c0 = arith.constant 0 : index
    %c0_0 = arith.constant 0 : index
    %c0_1 = arith.constant 0 : index
    %0 = vector.load %arg1[%c0, %c0_0, %c0_1] : memref<2x8x128xf32, #tpu.memory_space<vmem>>, vector<2x8x128xf32>
    %1 = vector.shape_cast %0 : vector<2x8x128xf32> to vector<16x128xf32>
    %c0_2 = arith.constant 0 : index
    %c0_3 = arith.constant 0 : index
    %c0_4 = arith.constant 0 : index
    %2 = vector.load %arg2[%c0_2, %c0_3, %c0_4] : memref<2x1x8xi32, #tpu.memory_space<vmem>>, vector<2x1x8xi32>
    %c0_i32 = arith.constant 0 : i32
    %3 = vector.broadcast %c0_i32 : i32 to vector<2x1x8xi32>
    %4 = arith.cmpi ne, %2, %3 : vector<2x1x8xi32>
    %c0_5 = arith.constant 0 : index
    %c0_6 = arith.constant 0 : index
    %c0_7 = arith.constant 0 : index
    %5 = vector.load %arg7[%c0_5, %c0_6, %c0_7] : memref<2x6x128xf32, #tpu.memory_space<vmem>>, vector<1x6x128xf32>
    %6 = vector.shape_cast %5 : vector<1x6x128xf32> to vector<6x128xf32>
    %7 = vector.extract_strided_slice %6 {offsets = [0, 0], sizes = [1, 128], strides = [1, 1]} : vector<6x128xf32> to vector<1x128xf32>
    %8 = vector.extract_strided_slice %6 {offsets = [1, 0], sizes = [1, 128], strides = [1, 1]} : vector<6x128xf32> to vector<1x128xf32>
    %9 = vector.extract_strided_slice %6 {offsets = [2, 0], sizes = [1, 128], strides = [1, 1]} : vector<6x128xf32> to vector<1x128xf32>
    %10 = vector.extract_strided_slice %6 {offsets = [3, 0], sizes = [1, 128], strides = [1, 1]} : vector<6x128xf32> to vector<1x128xf32>
    %11 = vector.extract_strided_slice %6 {offsets = [4, 0], sizes = [1, 128], strides = [1, 1]} : vector<6x128xf32> to vector<1x128xf32>
    %12 = vector.extract_strided_slice %6 {offsets = [5, 0], sizes = [1, 128], strides = [1, 1]} : vector<6x128xf32> to vector<1x128xf32>
    %c0_8 = arith.constant 0 : index
    %c0_9 = arith.constant 0 : index
    %c0_10 = arith.constant 0 : index
    %13 = vector.load %arg8[%c0_8, %c0_9, %c0_10] : memref<2x1x384xf32, #tpu.memory_space<vmem>>, vector<1x1x384xf32>
    %14 = vector.shape_cast %13 : vector<1x1x384xf32> to vector<1x384xf32>
    %c0_11 = arith.constant 0 : index
    %c0_12 = arith.constant 0 : index
    %c0_13 = arith.constant 0 : index
    %15 = vector.load %arg9[%c0_11, %c0_12, %c0_13] : memref<2x1x256xf32, #tpu.memory_space<vmem>>, vector<1x1x256xf32>
    %16 = vector.shape_cast %15 : vector<1x1x256xf32> to vector<1x256xf32>
    %17 = arith.truncf %1 : vector<16x128xf32> to vector<16x128xbf16>
    %c0_14 = arith.constant 0 : index
    %c0_15 = arith.constant 0 : index
    %c0_16 = arith.constant 0 : index
    %18 = vector.load %arg3[%c0_14, %c0_15, %c0_16] : memref<2x128x384xbf16, #tpu.memory_space<vmem>>, vector<1x128x384xbf16>
    %19 = vector.shape_cast %18 : vector<1x128x384xbf16> to vector<128x384xbf16>
    %cst = arith.constant dense<0.000000e+00> : vector<16x384xf32>
    %20 = tpu.matmul %17, %19, %cst {dimension_numbers = #tpu.dot_dimension_numbers<[1], [0], [0], [1], [0, 0, 1, 1], [], []>} : vector<16x128xbf16>, vector<128x384xbf16>, vector<16x384xf32> -> vector<16x384xf32>
    %21 = vector.broadcast %14 : vector<1x384xf32> to vector<16x384xf32>
    %22 = arith.addf %20, %21 : vector<16x384xf32>
    %23 = vector.extract_strided_slice %22 {offsets = [0, 0], sizes = [16, 128], strides = [1, 1]} : vector<16x384xf32> to vector<16x128xf32>
    %cst_17 = arith.constant 0.176776692 : f32
    %24 = vector.broadcast %cst_17 : f32 to vector<16x128xf32>
    %25 = arith.mulf %23, %24 : vector<16x128xf32>
    %26 = vector.extract_strided_slice %22 {offsets = [0, 128], sizes = [16, 128], strides = [1, 1]} : vector<16x384xf32> to vector<16x128xf32>
    %27 = vector.extract_strided_slice %22 {offsets = [0, 256], sizes = [16, 128], strides = [1, 1]} : vector<16x384xf32> to vector<16x128xf32>
    %28 = vector.extract_strided_slice %25 {offsets = [0, 0], sizes = [8, 128], strides = [1, 1]} : vector<16x128xf32> to vector<8x128xf32>
    %29 = vector.extract_strided_slice %26 {offsets = [0, 0], sizes = [8, 128], strides = [1, 1]} : vector<16x128xf32> to vector<8x128xf32>
    %30 = vector.extract_strided_slice %27 {offsets = [0, 0], sizes = [8, 128], strides = [1, 1]} : vector<16x128xf32> to vector<8x128xf32>
    %31 = vector.extract_strided_slice %4 {offsets = [0, 0, 0], sizes = [1, 1, 8], strides = [1, 1, 1]} : vector<2x1x8xi1> to vector<1x1x8xi1>
    %32 = vector.shape_cast %31 : vector<1x1x8xi1> to vector<1x8xi1>
    %33 = vector.extract_strided_slice %28 {offsets = [0, 0], sizes = [8, 32], strides = [1, 1]} : vector<8x128xf32> to vector<8x32xf32>
    %34 = vector.extract_strided_slice %29 {offsets = [0, 0], sizes = [8, 32], strides = [1, 1]} : vector<8x128xf32> to vector<8x32xf32>
    %35 = tpu.transpose %34, [1, 0] : vector<8x32xf32> -> vector<32x8xf32>
    %cst_18 = arith.constant dense<0.000000e+00> : vector<8x8xf32>
    %36 = tpu.matmul %33, %35, %cst_18 {dimension_numbers = #tpu.dot_dimension_numbers<[1], [0], [0], [1], [0, 0, 1, 1], [], []>} : vector<8x32xf32>, vector<32x8xf32>, vector<8x8xf32> -> vector<8x8xf32>
    %37 = vector.extract_strided_slice %28 {offsets = [0, 32], sizes = [8, 32], strides = [1, 1]} : vector<8x128xf32> to vector<8x32xf32>
    %38 = vector.extract_strided_slice %29 {offsets = [0, 32], sizes = [8, 32], strides = [1, 1]} : vector<8x128xf32> to vector<8x32xf32>
    %39 = tpu.transpose %38, [1, 0] : vector<8x32xf32> -> vector<32x8xf32>
    %cst_19 = arith.constant dense<0.000000e+00> : vector<8x8xf32>
    %40 = tpu.matmul %37, %39, %cst_19 {dimension_numbers = #tpu.dot_dimension_numbers<[1], [0], [0], [1], [0, 0, 1, 1], [], []>} : vector<8x32xf32>, vector<32x8xf32>, vector<8x8xf32> -> vector<8x8xf32>
    %41 = vector.extract_strided_slice %28 {offsets = [0, 64], sizes = [8, 32], strides = [1, 1]} : vector<8x128xf32> to vector<8x32xf32>
    %42 = vector.extract_strided_slice %29 {offsets = [0, 64], sizes = [8, 32], strides = [1, 1]} : vector<8x128xf32> to vector<8x32xf32>
    %43 = tpu.transpose %42, [1, 0] : vector<8x32xf32> -> vector<32x8xf32>
    %cst_20 = arith.constant dense<0.000000e+00> : vector<8x8xf32>
    %44 = tpu.matmul %41, %43, %cst_20 {dimension_numbers = #tpu.dot_dimension_numbers<[1], [0], [0], [1], [0, 0, 1, 1], [], []>} : vector<8x32xf32>, vector<32x8xf32>, vector<8x8xf32> -> vector<8x8xf32>
    %45 = vector.extract_strided_slice %28 {offsets = [0, 96], sizes = [8, 32], strides = [1, 1]} : vector<8x128xf32> to vector<8x32xf32>
    %46 = vector.extract_strided_slice %29 {offsets = [0, 96], sizes = [8, 32], strides = [1, 1]} : vector<8x128xf32> to vector<8x32xf32>
    %47 = tpu.transpose %46, [1, 0] : vector<8x32xf32> -> vector<32x8xf32>
    %cst_21 = arith.constant dense<0.000000e+00> : vector<8x8xf32>
    %48 = tpu.matmul %45, %47, %cst_21 {dimension_numbers = #tpu.dot_dimension_numbers<[1], [0], [0], [1], [0, 0, 1, 1], [], []>} : vector<8x32xf32>, vector<32x8xf32>, vector<8x8xf32> -> vector<8x8xf32>
    %49 = tpu.concatenate %36, %40, %44, %48 in 0 : vector<8x8xf32>, vector<8x8xf32>, vector<8x8xf32>, vector<8x8xf32> -> vector<32x8xf32>
    %cst_22 = arith.constant -1.000000e+09 : f32
    %50 = vector.shape_cast %32 : vector<1x8xi1> to vector<1x8xi1>
    %51 = vector.broadcast %50 : vector<1x8xi1> to vector<32x8xi1>
    %52 = vector.broadcast %cst_22 : f32 to vector<32x8xf32>
    %53 = arith.select %51, %52, %49 : vector<32x8xi1>, vector<32x8xf32>
    %cst_23 = arith.constant dense<0xFF800000> : vector<32xf32>
    %54 = vector.multi_reduction <maximumf>, %53, %cst_23 [1] : vector<32x8xf32> to vector<32xf32>
    %55 = vector.shape_cast %54 : vector<32xf32> to vector<32x1xf32>
    %56 = vector.broadcast %55 : vector<32x1xf32> to vector<32x8xf32>
    %57 = arith.subf %53, %56 : vector<32x8xf32>
    %58 = math.exp %57 : vector<32x8xf32>
    %cst_24 = arith.constant dense<0.000000e+00> : vector<32xf32>
    %59 = vector.multi_reduction <add>, %58, %cst_24 [1] : vector<32x8xf32> to vector<32xf32>
    %60 = vector.shape_cast %59 : vector<32xf32> to vector<32x1xf32>
    %61 = tpu.reciprocal %60 {approx = true} : vector<32x1xf32> -> vector<32x1xf32>
    %62 = vector.broadcast %61 : vector<32x1xf32> to vector<32x8xf32>
    %63 = arith.mulf %58, %62 : vector<32x8xf32>
    %64 = vector.extract_strided_slice %63 {offsets = [0, 0], sizes = [8, 8], strides = [1, 1]} : vector<32x8xf32> to vector<8x8xf32>
    %65 = vector.extract_strided_slice %63 {offsets = [8, 0], sizes = [8, 8], strides = [1, 1]} : vector<32x8xf32> to vector<8x8xf32>
    %66 = vector.extract_strided_slice %63 {offsets = [16, 0], sizes = [8, 8], strides = [1, 1]} : vector<32x8xf32> to vector<8x8xf32>
    %67 = vector.extract_strided_slice %63 {offsets = [24, 0], sizes = [8, 8], strides = [1, 1]} : vector<32x8xf32> to vector<8x8xf32>
    %68 = vector.extract_strided_slice %30 {offsets = [0, 0], sizes = [8, 32], strides = [1, 1]} : vector<8x128xf32> to vector<8x32xf32>
    %cst_25 = arith.constant dense<0.000000e+00> : vector<8x32xf32>
    %69 = tpu.matmul %64, %68, %cst_25 {dimension_numbers = #tpu.dot_dimension_numbers<[1], [0], [0], [1], [0, 0, 1, 1], [], []>} : vector<8x8xf32>, vector<8x32xf32>, vector<8x32xf32> -> vector<8x32xf32>
    %70 = vector.extract_strided_slice %30 {offsets = [0, 32], sizes = [8, 32], strides = [1, 1]} : vector<8x128xf32> to vector<8x32xf32>
    %cst_26 = arith.constant dense<0.000000e+00> : vector<8x32xf32>
    %71 = tpu.matmul %65, %70, %cst_26 {dimension_numbers = #tpu.dot_dimension_numbers<[1], [0], [0], [1], [0, 0, 1, 1], [], []>} : vector<8x8xf32>, vector<8x32xf32>, vector<8x32xf32> -> vector<8x32xf32>
    %72 = vector.extract_strided_slice %30 {offsets = [0, 64], sizes = [8, 32], strides = [1, 1]} : vector<8x128xf32> to vector<8x32xf32>
    %cst_27 = arith.constant dense<0.000000e+00> : vector<8x32xf32>
    %73 = tpu.matmul %66, %72, %cst_27 {dimension_numbers = #tpu.dot_dimension_numbers<[1], [0], [0], [1], [0, 0, 1, 1], [], []>} : vector<8x8xf32>, vector<8x32xf32>, vector<8x32xf32> -> vector<8x32xf32>
    %74 = vector.extract_strided_slice %30 {offsets = [0, 96], sizes = [8, 32], strides = [1, 1]} : vector<8x128xf32> to vector<8x32xf32>
    %cst_28 = arith.constant dense<0.000000e+00> : vector<8x32xf32>
    %75 = tpu.matmul %67, %74, %cst_28 {dimension_numbers = #tpu.dot_dimension_numbers<[1], [0], [0], [1], [0, 0, 1, 1], [], []>} : vector<8x8xf32>, vector<8x32xf32>, vector<8x32xf32> -> vector<8x32xf32>
    %76 = tpu.concatenate %69, %71, %73, %75 in 1 : vector<8x32xf32>, vector<8x32xf32>, vector<8x32xf32>, vector<8x32xf32> -> vector<8x128xf32>
    %77 = arith.truncf %76 : vector<8x128xf32> to vector<8x128xbf16>
    %c0_29 = arith.constant 0 : index
    %c0_30 = arith.constant 0 : index
    %c0_31 = arith.constant 0 : index
    %78 = vector.load %arg4[%c0_29, %c0_30, %c0_31] : memref<2x128x128xbf16, #tpu.memory_space<vmem>>, vector<1x128x128xbf16>
    %79 = vector.shape_cast %78 : vector<1x128x128xbf16> to vector<128x128xbf16>
    %cst_32 = arith.constant dense<0.000000e+00> : vector<8x128xf32>
    %80 = tpu.matmul %77, %79, %cst_32 {dimension_numbers = #tpu.dot_dimension_numbers<[1], [0], [0], [1], [0, 0, 1, 1], [], []>} : vector<8x128xbf16>, vector<128x128xbf16>, vector<8x128xf32> -> vector<8x128xf32>
    %81 = tpu.concatenate %64, %65, %66, %67 in 1 : vector<8x8xf32>, vector<8x8xf32>, vector<8x8xf32>, vector<8x8xf32> -> vector<8x32xf32>
    %82 = vector.extract_strided_slice %25 {offsets = [8, 0], sizes = [8, 128], strides = [1, 1]} : vector<16x128xf32> to vector<8x128xf32>
    %83 = vector.extract_strided_slice %26 {offsets = [8, 0], sizes = [8, 128], strides = [1, 1]} : vector<16x128xf32> to vector<8x128xf32>
    %84 = vector.extract_strided_slice %27 {offsets = [8, 0], sizes = [8, 128], strides = [1, 1]} : vector<16x128xf32> to vector<8x128xf32>
    %85 = vector.extract_strided_slice %4 {offsets = [1, 0, 0], sizes = [1, 1, 8], strides = [1, 1, 1]} : vector<2x1x8xi1> to vector<1x1x8xi1>
    %86 = vector.shape_cast %85 : vector<1x1x8xi1> to vector<1x8xi1>
    %87 = vector.extract_strided_slice %82 {offsets = [0, 0], sizes = [8, 32], strides = [1, 1]} : vector<8x128xf32> to vector<8x32xf32>
    %88 = vector.extract_strided_slice %83 {offsets = [0, 0], sizes = [8, 32], strides = [1, 1]} : vector<8x128xf32> to vector<8x32xf32>
    %89 = tpu.transpose %88, [1, 0] : vector<8x32xf32> -> vector<32x8xf32>
    %cst_33 = arith.constant dense<0.000000e+00> : vector<8x8xf32>
    %90 = tpu.matmul %87, %89, %cst_33 {dimension_numbers = #tpu.dot_dimension_numbers<[1], [0], [0], [1], [0, 0, 1, 1], [], []>} : vector<8x32xf32>, vector<32x8xf32>, vector<8x8xf32> -> vector<8x8xf32>
    %91 = vector.extract_strided_slice %82 {offsets = [0, 32], sizes = [8, 32], strides = [1, 1]} : vector<8x128xf32> to vector<8x32xf32>
    %92 = vector.extract_strided_slice %83 {offsets = [0, 32], sizes = [8, 32], strides = [1, 1]} : vector<8x128xf32> to vector<8x32xf32>
    %93 = tpu.transpose %92, [1, 0] : vector<8x32xf32> -> vector<32x8xf32>
    %cst_34 = arith.constant dense<0.000000e+00> : vector<8x8xf32>
    %94 = tpu.matmul %91, %93, %cst_34 {dimension_numbers = #tpu.dot_dimension_numbers<[1], [0], [0], [1], [0, 0, 1, 1], [], []>} : vector<8x32xf32>, vector<32x8xf32>, vector<8x8xf32> -> vector<8x8xf32>
    %95 = vector.extract_strided_slice %82 {offsets = [0, 64], sizes = [8, 32], strides = [1, 1]} : vector<8x128xf32> to vector<8x32xf32>
    %96 = vector.extract_strided_slice %83 {offsets = [0, 64], sizes = [8, 32], strides = [1, 1]} : vector<8x128xf32> to vector<8x32xf32>
    %97 = tpu.transpose %96, [1, 0] : vector<8x32xf32> -> vector<32x8xf32>
    %cst_35 = arith.constant dense<0.000000e+00> : vector<8x8xf32>
    %98 = tpu.matmul %95, %97, %cst_35 {dimension_numbers = #tpu.dot_dimension_numbers<[1], [0], [0], [1], [0, 0, 1, 1], [], []>} : vector<8x32xf32>, vector<32x8xf32>, vector<8x8xf32> -> vector<8x8xf32>
    %99 = vector.extract_strided_slice %82 {offsets = [0, 96], sizes = [8, 32], strides = [1, 1]} : vector<8x128xf32> to vector<8x32xf32>
    %100 = vector.extract_strided_slice %83 {offsets = [0, 96], sizes = [8, 32], strides = [1, 1]} : vector<8x128xf32> to vector<8x32xf32>
    %101 = tpu.transpose %100, [1, 0] : vector<8x32xf32> -> vector<32x8xf32>
    %cst_36 = arith.constant dense<0.000000e+00> : vector<8x8xf32>
    %102 = tpu.matmul %99, %101, %cst_36 {dimension_numbers = #tpu.dot_dimension_numbers<[1], [0], [0], [1], [0, 0, 1, 1], [], []>} : vector<8x32xf32>, vector<32x8xf32>, vector<8x8xf32> -> vector<8x8xf32>
    %103 = tpu.concatenate %90, %94, %98, %102 in 0 : vector<8x8xf32>, vector<8x8xf32>, vector<8x8xf32>, vector<8x8xf32> -> vector<32x8xf32>
    %cst_37 = arith.constant -1.000000e+09 : f32
    %104 = vector.shape_cast %86 : vector<1x8xi1> to vector<1x8xi1>
    %105 = vector.broadcast %104 : vector<1x8xi1> to vector<32x8xi1>
    %106 = vector.broadcast %cst_37 : f32 to vector<32x8xf32>
    %107 = arith.select %105, %106, %103 : vector<32x8xi1>, vector<32x8xf32>
    %cst_38 = arith.constant dense<0xFF800000> : vector<32xf32>
    %108 = vector.multi_reduction <maximumf>, %107, %cst_38 [1] : vector<32x8xf32> to vector<32xf32>
    %109 = vector.shape_cast %108 : vector<32xf32> to vector<32x1xf32>
    %110 = vector.broadcast %109 : vector<32x1xf32> to vector<32x8xf32>
    %111 = arith.subf %107, %110 : vector<32x8xf32>
    %112 = math.exp %111 : vector<32x8xf32>
    %cst_39 = arith.constant dense<0.000000e+00> : vector<32xf32>
    %113 = vector.multi_reduction <add>, %112, %cst_39 [1] : vector<32x8xf32> to vector<32xf32>
    %114 = vector.shape_cast %113 : vector<32xf32> to vector<32x1xf32>
    %115 = tpu.reciprocal %114 {approx = true} : vector<32x1xf32> -> vector<32x1xf32>
    %116 = vector.broadcast %115 : vector<32x1xf32> to vector<32x8xf32>
    %117 = arith.mulf %112, %116 : vector<32x8xf32>
    %118 = vector.extract_strided_slice %117 {offsets = [0, 0], sizes = [8, 8], strides = [1, 1]} : vector<32x8xf32> to vector<8x8xf32>
    %119 = vector.extract_strided_slice %117 {offsets = [8, 0], sizes = [8, 8], strides = [1, 1]} : vector<32x8xf32> to vector<8x8xf32>
    %120 = vector.extract_strided_slice %117 {offsets = [16, 0], sizes = [8, 8], strides = [1, 1]} : vector<32x8xf32> to vector<8x8xf32>
    %121 = vector.extract_strided_slice %117 {offsets = [24, 0], sizes = [8, 8], strides = [1, 1]} : vector<32x8xf32> to vector<8x8xf32>
    %122 = vector.extract_strided_slice %84 {offsets = [0, 0], sizes = [8, 32], strides = [1, 1]} : vector<8x128xf32> to vector<8x32xf32>
    %cst_40 = arith.constant dense<0.000000e+00> : vector<8x32xf32>
    %123 = tpu.matmul %118, %122, %cst_40 {dimension_numbers = #tpu.dot_dimension_numbers<[1], [0], [0], [1], [0, 0, 1, 1], [], []>} : vector<8x8xf32>, vector<8x32xf32>, vector<8x32xf32> -> vector<8x32xf32>
    %124 = vector.extract_strided_slice %84 {offsets = [0, 32], sizes = [8, 32], strides = [1, 1]} : vector<8x128xf32> to vector<8x32xf32>
    %cst_41 = arith.constant dense<0.000000e+00> : vector<8x32xf32>
    %125 = tpu.matmul %119, %124, %cst_41 {dimension_numbers = #tpu.dot_dimension_numbers<[1], [0], [0], [1], [0, 0, 1, 1], [], []>} : vector<8x8xf32>, vector<8x32xf32>, vector<8x32xf32> -> vector<8x32xf32>
    %126 = vector.extract_strided_slice %84 {offsets = [0, 64], sizes = [8, 32], strides = [1, 1]} : vector<8x128xf32> to vector<8x32xf32>
    %cst_42 = arith.constant dense<0.000000e+00> : vector<8x32xf32>
    %127 = tpu.matmul %120, %126, %cst_42 {dimension_numbers = #tpu.dot_dimension_numbers<[1], [0], [0], [1], [0, 0, 1, 1], [], []>} : vector<8x8xf32>, vector<8x32xf32>, vector<8x32xf32> -> vector<8x32xf32>
    %128 = vector.extract_strided_slice %84 {offsets = [0, 96], sizes = [8, 32], strides = [1, 1]} : vector<8x128xf32> to vector<8x32xf32>
    %cst_43 = arith.constant dense<0.000000e+00> : vector<8x32xf32>
    %129 = tpu.matmul %121, %128, %cst_43 {dimension_numbers = #tpu.dot_dimension_numbers<[1], [0], [0], [1], [0, 0, 1, 1], [], []>} : vector<8x8xf32>, vector<8x32xf32>, vector<8x32xf32> -> vector<8x32xf32>
    %130 = tpu.concatenate %123, %125, %127, %129 in 1 : vector<8x32xf32>, vector<8x32xf32>, vector<8x32xf32>, vector<8x32xf32> -> vector<8x128xf32>
    %131 = arith.truncf %130 : vector<8x128xf32> to vector<8x128xbf16>
    %c0_44 = arith.constant 0 : index
    %c0_45 = arith.constant 0 : index
    %c0_46 = arith.constant 0 : index
    %132 = vector.load %arg4[%c0_44, %c0_45, %c0_46] : memref<2x128x128xbf16, #tpu.memory_space<vmem>>, vector<1x128x128xbf16>
    %133 = vector.shape_cast %132 : vector<1x128x128xbf16> to vector<128x128xbf16>
    %cst_47 = arith.constant dense<0.000000e+00> : vector<8x128xf32>
    %134 = tpu.matmul %131, %133, %cst_47 {dimension_numbers = #tpu.dot_dimension_numbers<[1], [0], [0], [1], [0, 0, 1, 1], [], []>} : vector<8x128xbf16>, vector<128x128xbf16>, vector<8x128xf32> -> vector<8x128xf32>
    %135 = tpu.concatenate %118, %119, %120, %121 in 1 : vector<8x8xf32>, vector<8x8xf32>, vector<8x8xf32>, vector<8x8xf32> -> vector<8x32xf32>
    %136 = tpu.concatenate %80, %134 in 0 : vector<8x128xf32>, vector<8x128xf32> -> vector<16x128xf32>
    %137 = vector.broadcast %7 : vector<1x128xf32> to vector<16x128xf32>
    %138 = arith.addf %1, %137 : vector<16x128xf32>
    %139 = arith.addf %136, %138 : vector<16x128xf32>
    %cst_48 = arith.constant dense<0.000000e+00> : vector<16xf32>
    %140 = vector.multi_reduction <add>, %139, %cst_48 [1] : vector<16x128xf32> to vector<16xf32>
    %141 = vector.shape_cast %140 : vector<16xf32> to vector<16x1xf32>
    %cst_49 = arith.constant 1.280000e+02 : f32
    %142 = vector.broadcast %cst_49 : f32 to vector<16x1xf32>
    %143 = arith.divf %141, %142 : vector<16x1xf32>
    %144 = vector.broadcast %143 : vector<16x1xf32> to vector<16x128xf32>
    %145 = arith.subf %139, %144 : vector<16x128xf32>
    %146 = arith.mulf %145, %145 : vector<16x128xf32>
    %cst_50 = arith.constant dense<0.000000e+00> : vector<16xf32>
    %147 = vector.multi_reduction <add>, %146, %cst_50 [1] : vector<16x128xf32> to vector<16xf32>
    %148 = vector.shape_cast %147 : vector<16xf32> to vector<16x1xf32>
    %cst_51 = arith.constant 1.280000e+02 : f32
    %149 = vector.broadcast %cst_51 : f32 to vector<16x1xf32>
    %150 = arith.divf %148, %149 : vector<16x1xf32>
    %151 = vector.broadcast %143 : vector<16x1xf32> to vector<16x128xf32>
    %152 = arith.subf %139, %151 : vector<16x128xf32>
    %cst_52 = arith.constant 9.99999974E-6 : f32
    %153 = vector.broadcast %cst_52 : f32 to vector<16x1xf32>
    %154 = arith.addf %150, %153 : vector<16x1xf32>
    %155 = math.rsqrt %154 : vector<16x1xf32>
    %156 = vector.broadcast %155 : vector<16x1xf32> to vector<16x128xf32>
    %157 = arith.mulf %152, %156 : vector<16x128xf32>
    %158 = vector.broadcast %8 : vector<1x128xf32> to vector<16x128xf32>
    %159 = arith.mulf %157, %158 : vector<16x128xf32>
    %160 = vector.broadcast %9 : vector<1x128xf32> to vector<16x128xf32>
    %161 = arith.addf %159, %160 : vector<16x128xf32>
    %162 = arith.truncf %161 : vector<16x128xf32> to vector<16x128xbf16>
    %c0_53 = arith.constant 0 : index
    %c0_54 = arith.constant 0 : index
    %c0_55 = arith.constant 0 : index
    %163 = vector.load %arg5[%c0_53, %c0_54, %c0_55] : memref<2x128x256xbf16, #tpu.memory_space<vmem>>, vector<1x128x256xbf16>
    %164 = vector.shape_cast %163 : vector<1x128x256xbf16> to vector<128x256xbf16>
    %cst_56 = arith.constant dense<0.000000e+00> : vector<16x256xf32>
    %165 = tpu.matmul %162, %164, %cst_56 {dimension_numbers = #tpu.dot_dimension_numbers<[1], [0], [0], [1], [0, 0, 1, 1], [], []>} : vector<16x128xbf16>, vector<128x256xbf16>, vector<16x256xf32> -> vector<16x256xf32>
    %166 = vector.broadcast %16 : vector<1x256xf32> to vector<16x256xf32>
    %167 = arith.addf %165, %166 : vector<16x256xf32>
    %cst_57 = arith.constant 0.000000e+00 : f32
    %168 = vector.broadcast %cst_57 : f32 to vector<16x256xf32>
    %169 = arith.maximumf %167, %168 : vector<16x256xf32>
    %170 = arith.truncf %169 : vector<16x256xf32> to vector<16x256xbf16>
    %c0_58 = arith.constant 0 : index
    %c0_59 = arith.constant 0 : index
    %c0_60 = arith.constant 0 : index
    %171 = vector.load %arg6[%c0_58, %c0_59, %c0_60] : memref<2x256x128xbf16, #tpu.memory_space<vmem>>, vector<1x256x128xbf16>
    %172 = vector.shape_cast %171 : vector<1x256x128xbf16> to vector<256x128xbf16>
    %cst_61 = arith.constant dense<0.000000e+00> : vector<16x128xf32>
    %173 = tpu.matmul %170, %172, %cst_61 {dimension_numbers = #tpu.dot_dimension_numbers<[1], [0], [0], [1], [0, 0, 1, 1], [], []>} : vector<16x256xbf16>, vector<256x128xbf16>, vector<16x128xf32> -> vector<16x128xf32>
    %174 = vector.broadcast %10 : vector<1x128xf32> to vector<16x128xf32>
    %175 = arith.addf %173, %174 : vector<16x128xf32>
    %176 = arith.addf %175, %161 : vector<16x128xf32>
    %cst_62 = arith.constant dense<0.000000e+00> : vector<16xf32>
    %177 = vector.multi_reduction <add>, %176, %cst_62 [1] : vector<16x128xf32> to vector<16xf32>
    %178 = vector.shape_cast %177 : vector<16xf32> to vector<16x1xf32>
    %cst_63 = arith.constant 1.280000e+02 : f32
    %179 = vector.broadcast %cst_63 : f32 to vector<16x1xf32>
    %180 = arith.divf %178, %179 : vector<16x1xf32>
    %181 = vector.broadcast %180 : vector<16x1xf32> to vector<16x128xf32>
    %182 = arith.subf %176, %181 : vector<16x128xf32>
    %183 = arith.mulf %182, %182 : vector<16x128xf32>
    %cst_64 = arith.constant dense<0.000000e+00> : vector<16xf32>
    %184 = vector.multi_reduction <add>, %183, %cst_64 [1] : vector<16x128xf32> to vector<16xf32>
    %185 = vector.shape_cast %184 : vector<16xf32> to vector<16x1xf32>
    %cst_65 = arith.constant 1.280000e+02 : f32
    %186 = vector.broadcast %cst_65 : f32 to vector<16x1xf32>
    %187 = arith.divf %185, %186 : vector<16x1xf32>
    %188 = vector.broadcast %180 : vector<16x1xf32> to vector<16x128xf32>
    %189 = arith.subf %176, %188 : vector<16x128xf32>
    %cst_66 = arith.constant 9.99999974E-6 : f32
    %190 = vector.broadcast %cst_66 : f32 to vector<16x1xf32>
    %191 = arith.addf %187, %190 : vector<16x1xf32>
    %192 = math.rsqrt %191 : vector<16x1xf32>
    %193 = vector.broadcast %192 : vector<16x1xf32> to vector<16x128xf32>
    %194 = arith.mulf %189, %193 : vector<16x128xf32>
    %195 = vector.broadcast %11 : vector<1x128xf32> to vector<16x128xf32>
    %196 = arith.mulf %194, %195 : vector<16x128xf32>
    %197 = vector.broadcast %12 : vector<1x128xf32> to vector<16x128xf32>
    %198 = arith.addf %196, %197 : vector<16x128xf32>
    %c1 = arith.constant 1 : index
    %c0_67 = arith.constant 0 : index
    %c0_68 = arith.constant 0 : index
    %199 = vector.load %arg7[%c1, %c0_67, %c0_68] : memref<2x6x128xf32, #tpu.memory_space<vmem>>, vector<1x6x128xf32>
    %200 = vector.shape_cast %199 : vector<1x6x128xf32> to vector<6x128xf32>
    %201 = vector.extract_strided_slice %200 {offsets = [0, 0], sizes = [1, 128], strides = [1, 1]} : vector<6x128xf32> to vector<1x128xf32>
    %202 = vector.extract_strided_slice %200 {offsets = [1, 0], sizes = [1, 128], strides = [1, 1]} : vector<6x128xf32> to vector<1x128xf32>
    %203 = vector.extract_strided_slice %200 {offsets = [2, 0], sizes = [1, 128], strides = [1, 1]} : vector<6x128xf32> to vector<1x128xf32>
    %204 = vector.extract_strided_slice %200 {offsets = [3, 0], sizes = [1, 128], strides = [1, 1]} : vector<6x128xf32> to vector<1x128xf32>
    %205 = vector.extract_strided_slice %200 {offsets = [4, 0], sizes = [1, 128], strides = [1, 1]} : vector<6x128xf32> to vector<1x128xf32>
    %206 = vector.extract_strided_slice %200 {offsets = [5, 0], sizes = [1, 128], strides = [1, 1]} : vector<6x128xf32> to vector<1x128xf32>
    %c1_69 = arith.constant 1 : index
    %c0_70 = arith.constant 0 : index
    %c0_71 = arith.constant 0 : index
    %207 = vector.load %arg8[%c1_69, %c0_70, %c0_71] : memref<2x1x384xf32, #tpu.memory_space<vmem>>, vector<1x1x384xf32>
    %208 = vector.shape_cast %207 : vector<1x1x384xf32> to vector<1x384xf32>
    %c1_72 = arith.constant 1 : index
    %c0_73 = arith.constant 0 : index
    %c0_74 = arith.constant 0 : index
    %209 = vector.load %arg9[%c1_72, %c0_73, %c0_74] : memref<2x1x256xf32, #tpu.memory_space<vmem>>, vector<1x1x256xf32>
    %210 = vector.shape_cast %209 : vector<1x1x256xf32> to vector<1x256xf32>
    %211 = arith.truncf %198 : vector<16x128xf32> to vector<16x128xbf16>
    %c1_75 = arith.constant 1 : index
    %c0_76 = arith.constant 0 : index
    %c0_77 = arith.constant 0 : index
    %212 = vector.load %arg3[%c1_75, %c0_76, %c0_77] : memref<2x128x384xbf16, #tpu.memory_space<vmem>>, vector<1x128x384xbf16>
    %213 = vector.shape_cast %212 : vector<1x128x384xbf16> to vector<128x384xbf16>
    %cst_78 = arith.constant dense<0.000000e+00> : vector<16x384xf32>
    %214 = tpu.matmul %211, %213, %cst_78 {dimension_numbers = #tpu.dot_dimension_numbers<[1], [0], [0], [1], [0, 0, 1, 1], [], []>} : vector<16x128xbf16>, vector<128x384xbf16>, vector<16x384xf32> -> vector<16x384xf32>
    %215 = vector.broadcast %208 : vector<1x384xf32> to vector<16x384xf32>
    %216 = arith.addf %214, %215 : vector<16x384xf32>
    %217 = vector.extract_strided_slice %216 {offsets = [0, 0], sizes = [16, 128], strides = [1, 1]} : vector<16x384xf32> to vector<16x128xf32>
    %cst_79 = arith.constant 0.176776692 : f32
    %218 = vector.broadcast %cst_79 : f32 to vector<16x128xf32>
    %219 = arith.mulf %217, %218 : vector<16x128xf32>
    %220 = vector.extract_strided_slice %216 {offsets = [0, 128], sizes = [16, 128], strides = [1, 1]} : vector<16x384xf32> to vector<16x128xf32>
    %221 = vector.extract_strided_slice %216 {offsets = [0, 256], sizes = [16, 128], strides = [1, 1]} : vector<16x384xf32> to vector<16x128xf32>
    %222 = vector.extract_strided_slice %219 {offsets = [0, 0], sizes = [8, 128], strides = [1, 1]} : vector<16x128xf32> to vector<8x128xf32>
    %223 = vector.extract_strided_slice %220 {offsets = [0, 0], sizes = [8, 128], strides = [1, 1]} : vector<16x128xf32> to vector<8x128xf32>
    %224 = vector.extract_strided_slice %221 {offsets = [0, 0], sizes = [8, 128], strides = [1, 1]} : vector<16x128xf32> to vector<8x128xf32>
    %225 = vector.extract_strided_slice %4 {offsets = [0, 0, 0], sizes = [1, 1, 8], strides = [1, 1, 1]} : vector<2x1x8xi1> to vector<1x1x8xi1>
    %226 = vector.shape_cast %225 : vector<1x1x8xi1> to vector<1x8xi1>
    %227 = vector.extract_strided_slice %222 {offsets = [0, 0], sizes = [8, 32], strides = [1, 1]} : vector<8x128xf32> to vector<8x32xf32>
    %228 = vector.extract_strided_slice %223 {offsets = [0, 0], sizes = [8, 32], strides = [1, 1]} : vector<8x128xf32> to vector<8x32xf32>
    %229 = tpu.transpose %228, [1, 0] : vector<8x32xf32> -> vector<32x8xf32>
    %cst_80 = arith.constant dense<0.000000e+00> : vector<8x8xf32>
    %230 = tpu.matmul %227, %229, %cst_80 {dimension_numbers = #tpu.dot_dimension_numbers<[1], [0], [0], [1], [0, 0, 1, 1], [], []>} : vector<8x32xf32>, vector<32x8xf32>, vector<8x8xf32> -> vector<8x8xf32>
    %231 = vector.extract_strided_slice %222 {offsets = [0, 32], sizes = [8, 32], strides = [1, 1]} : vector<8x128xf32> to vector<8x32xf32>
    %232 = vector.extract_strided_slice %223 {offsets = [0, 32], sizes = [8, 32], strides = [1, 1]} : vector<8x128xf32> to vector<8x32xf32>
    %233 = tpu.transpose %232, [1, 0] : vector<8x32xf32> -> vector<32x8xf32>
    %cst_81 = arith.constant dense<0.000000e+00> : vector<8x8xf32>
    %234 = tpu.matmul %231, %233, %cst_81 {dimension_numbers = #tpu.dot_dimension_numbers<[1], [0], [0], [1], [0, 0, 1, 1], [], []>} : vector<8x32xf32>, vector<32x8xf32>, vector<8x8xf32> -> vector<8x8xf32>
    %235 = vector.extract_strided_slice %222 {offsets = [0, 64], sizes = [8, 32], strides = [1, 1]} : vector<8x128xf32> to vector<8x32xf32>
    %236 = vector.extract_strided_slice %223 {offsets = [0, 64], sizes = [8, 32], strides = [1, 1]} : vector<8x128xf32> to vector<8x32xf32>
    %237 = tpu.transpose %236, [1, 0] : vector<8x32xf32> -> vector<32x8xf32>
    %cst_82 = arith.constant dense<0.000000e+00> : vector<8x8xf32>
    %238 = tpu.matmul %235, %237, %cst_82 {dimension_numbers = #tpu.dot_dimension_numbers<[1], [0], [0], [1], [0, 0, 1, 1], [], []>} : vector<8x32xf32>, vector<32x8xf32>, vector<8x8xf32> -> vector<8x8xf32>
    %239 = vector.extract_strided_slice %222 {offsets = [0, 96], sizes = [8, 32], strides = [1, 1]} : vector<8x128xf32> to vector<8x32xf32>
    %240 = vector.extract_strided_slice %223 {offsets = [0, 96], sizes = [8, 32], strides = [1, 1]} : vector<8x128xf32> to vector<8x32xf32>
    %241 = tpu.transpose %240, [1, 0] : vector<8x32xf32> -> vector<32x8xf32>
    %cst_83 = arith.constant dense<0.000000e+00> : vector<8x8xf32>
    %242 = tpu.matmul %239, %241, %cst_83 {dimension_numbers = #tpu.dot_dimension_numbers<[1], [0], [0], [1], [0, 0, 1, 1], [], []>} : vector<8x32xf32>, vector<32x8xf32>, vector<8x8xf32> -> vector<8x8xf32>
    %243 = tpu.concatenate %230, %234, %238, %242 in 0 : vector<8x8xf32>, vector<8x8xf32>, vector<8x8xf32>, vector<8x8xf32> -> vector<32x8xf32>
    %cst_84 = arith.constant -1.000000e+09 : f32
    %244 = vector.shape_cast %226 : vector<1x8xi1> to vector<1x8xi1>
    %245 = vector.broadcast %244 : vector<1x8xi1> to vector<32x8xi1>
    %246 = vector.broadcast %cst_84 : f32 to vector<32x8xf32>
    %247 = arith.select %245, %246, %243 : vector<32x8xi1>, vector<32x8xf32>
    %cst_85 = arith.constant dense<0xFF800000> : vector<32xf32>
    %248 = vector.multi_reduction <maximumf>, %247, %cst_85 [1] : vector<32x8xf32> to vector<32xf32>
    %249 = vector.shape_cast %248 : vector<32xf32> to vector<32x1xf32>
    %250 = vector.broadcast %249 : vector<32x1xf32> to vector<32x8xf32>
    %251 = arith.subf %247, %250 : vector<32x8xf32>
    %252 = math.exp %251 : vector<32x8xf32>
    %cst_86 = arith.constant dense<0.000000e+00> : vector<32xf32>
    %253 = vector.multi_reduction <add>, %252, %cst_86 [1] : vector<32x8xf32> to vector<32xf32>
    %254 = vector.shape_cast %253 : vector<32xf32> to vector<32x1xf32>
    %255 = tpu.reciprocal %254 {approx = true} : vector<32x1xf32> -> vector<32x1xf32>
    %256 = vector.broadcast %255 : vector<32x1xf32> to vector<32x8xf32>
    %257 = arith.mulf %252, %256 : vector<32x8xf32>
    %258 = vector.extract_strided_slice %257 {offsets = [0, 0], sizes = [8, 8], strides = [1, 1]} : vector<32x8xf32> to vector<8x8xf32>
    %259 = vector.extract_strided_slice %257 {offsets = [8, 0], sizes = [8, 8], strides = [1, 1]} : vector<32x8xf32> to vector<8x8xf32>
    %260 = vector.extract_strided_slice %257 {offsets = [16, 0], sizes = [8, 8], strides = [1, 1]} : vector<32x8xf32> to vector<8x8xf32>
    %261 = vector.extract_strided_slice %257 {offsets = [24, 0], sizes = [8, 8], strides = [1, 1]} : vector<32x8xf32> to vector<8x8xf32>
    %262 = vector.extract_strided_slice %224 {offsets = [0, 0], sizes = [8, 32], strides = [1, 1]} : vector<8x128xf32> to vector<8x32xf32>
    %cst_87 = arith.constant dense<0.000000e+00> : vector<8x32xf32>
    %263 = tpu.matmul %258, %262, %cst_87 {dimension_numbers = #tpu.dot_dimension_numbers<[1], [0], [0], [1], [0, 0, 1, 1], [], []>} : vector<8x8xf32>, vector<8x32xf32>, vector<8x32xf32> -> vector<8x32xf32>
    %264 = vector.extract_strided_slice %224 {offsets = [0, 32], sizes = [8, 32], strides = [1, 1]} : vector<8x128xf32> to vector<8x32xf32>
    %cst_88 = arith.constant dense<0.000000e+00> : vector<8x32xf32>
    %265 = tpu.matmul %259, %264, %cst_88 {dimension_numbers = #tpu.dot_dimension_numbers<[1], [0], [0], [1], [0, 0, 1, 1], [], []>} : vector<8x8xf32>, vector<8x32xf32>, vector<8x32xf32> -> vector<8x32xf32>
    %266 = vector.extract_strided_slice %224 {offsets = [0, 64], sizes = [8, 32], strides = [1, 1]} : vector<8x128xf32> to vector<8x32xf32>
    %cst_89 = arith.constant dense<0.000000e+00> : vector<8x32xf32>
    %267 = tpu.matmul %260, %266, %cst_89 {dimension_numbers = #tpu.dot_dimension_numbers<[1], [0], [0], [1], [0, 0, 1, 1], [], []>} : vector<8x8xf32>, vector<8x32xf32>, vector<8x32xf32> -> vector<8x32xf32>
    %268 = vector.extract_strided_slice %224 {offsets = [0, 96], sizes = [8, 32], strides = [1, 1]} : vector<8x128xf32> to vector<8x32xf32>
    %cst_90 = arith.constant dense<0.000000e+00> : vector<8x32xf32>
    %269 = tpu.matmul %261, %268, %cst_90 {dimension_numbers = #tpu.dot_dimension_numbers<[1], [0], [0], [1], [0, 0, 1, 1], [], []>} : vector<8x8xf32>, vector<8x32xf32>, vector<8x32xf32> -> vector<8x32xf32>
    %270 = tpu.concatenate %263, %265, %267, %269 in 1 : vector<8x32xf32>, vector<8x32xf32>, vector<8x32xf32>, vector<8x32xf32> -> vector<8x128xf32>
    %271 = arith.truncf %270 : vector<8x128xf32> to vector<8x128xbf16>
    %c1_91 = arith.constant 1 : index
    %c0_92 = arith.constant 0 : index
    %c0_93 = arith.constant 0 : index
    %272 = vector.load %arg4[%c1_91, %c0_92, %c0_93] : memref<2x128x128xbf16, #tpu.memory_space<vmem>>, vector<1x128x128xbf16>
    %273 = vector.shape_cast %272 : vector<1x128x128xbf16> to vector<128x128xbf16>
    %cst_94 = arith.constant dense<0.000000e+00> : vector<8x128xf32>
    %274 = tpu.matmul %271, %273, %cst_94 {dimension_numbers = #tpu.dot_dimension_numbers<[1], [0], [0], [1], [0, 0, 1, 1], [], []>} : vector<8x128xbf16>, vector<128x128xbf16>, vector<8x128xf32> -> vector<8x128xf32>
    %275 = tpu.concatenate %258, %259, %260, %261 in 1 : vector<8x8xf32>, vector<8x8xf32>, vector<8x8xf32>, vector<8x8xf32> -> vector<8x32xf32>
    %276 = vector.extract_strided_slice %219 {offsets = [8, 0], sizes = [8, 128], strides = [1, 1]} : vector<16x128xf32> to vector<8x128xf32>
    %277 = vector.extract_strided_slice %220 {offsets = [8, 0], sizes = [8, 128], strides = [1, 1]} : vector<16x128xf32> to vector<8x128xf32>
    %278 = vector.extract_strided_slice %221 {offsets = [8, 0], sizes = [8, 128], strides = [1, 1]} : vector<16x128xf32> to vector<8x128xf32>
    %279 = vector.extract_strided_slice %4 {offsets = [1, 0, 0], sizes = [1, 1, 8], strides = [1, 1, 1]} : vector<2x1x8xi1> to vector<1x1x8xi1>
    %280 = vector.shape_cast %279 : vector<1x1x8xi1> to vector<1x8xi1>
    %281 = vector.extract_strided_slice %276 {offsets = [0, 0], sizes = [8, 32], strides = [1, 1]} : vector<8x128xf32> to vector<8x32xf32>
    %282 = vector.extract_strided_slice %277 {offsets = [0, 0], sizes = [8, 32], strides = [1, 1]} : vector<8x128xf32> to vector<8x32xf32>
    %283 = tpu.transpose %282, [1, 0] : vector<8x32xf32> -> vector<32x8xf32>
    %cst_95 = arith.constant dense<0.000000e+00> : vector<8x8xf32>
    %284 = tpu.matmul %281, %283, %cst_95 {dimension_numbers = #tpu.dot_dimension_numbers<[1], [0], [0], [1], [0, 0, 1, 1], [], []>} : vector<8x32xf32>, vector<32x8xf32>, vector<8x8xf32> -> vector<8x8xf32>
    %285 = vector.extract_strided_slice %276 {offsets = [0, 32], sizes = [8, 32], strides = [1, 1]} : vector<8x128xf32> to vector<8x32xf32>
    %286 = vector.extract_strided_slice %277 {offsets = [0, 32], sizes = [8, 32], strides = [1, 1]} : vector<8x128xf32> to vector<8x32xf32>
    %287 = tpu.transpose %286, [1, 0] : vector<8x32xf32> -> vector<32x8xf32>
    %cst_96 = arith.constant dense<0.000000e+00> : vector<8x8xf32>
    %288 = tpu.matmul %285, %287, %cst_96 {dimension_numbers = #tpu.dot_dimension_numbers<[1], [0], [0], [1], [0, 0, 1, 1], [], []>} : vector<8x32xf32>, vector<32x8xf32>, vector<8x8xf32> -> vector<8x8xf32>
    %289 = vector.extract_strided_slice %276 {offsets = [0, 64], sizes = [8, 32], strides = [1, 1]} : vector<8x128xf32> to vector<8x32xf32>
    %290 = vector.extract_strided_slice %277 {offsets = [0, 64], sizes = [8, 32], strides = [1, 1]} : vector<8x128xf32> to vector<8x32xf32>
    %291 = tpu.transpose %290, [1, 0] : vector<8x32xf32> -> vector<32x8xf32>
    %cst_97 = arith.constant dense<0.000000e+00> : vector<8x8xf32>
    %292 = tpu.matmul %289, %291, %cst_97 {dimension_numbers = #tpu.dot_dimension_numbers<[1], [0], [0], [1], [0, 0, 1, 1], [], []>} : vector<8x32xf32>, vector<32x8xf32>, vector<8x8xf32> -> vector<8x8xf32>
    %293 = vector.extract_strided_slice %276 {offsets = [0, 96], sizes = [8, 32], strides = [1, 1]} : vector<8x128xf32> to vector<8x32xf32>
    %294 = vector.extract_strided_slice %277 {offsets = [0, 96], sizes = [8, 32], strides = [1, 1]} : vector<8x128xf32> to vector<8x32xf32>
    %295 = tpu.transpose %294, [1, 0] : vector<8x32xf32> -> vector<32x8xf32>
    %cst_98 = arith.constant dense<0.000000e+00> : vector<8x8xf32>
    %296 = tpu.matmul %293, %295, %cst_98 {dimension_numbers = #tpu.dot_dimension_numbers<[1], [0], [0], [1], [0, 0, 1, 1], [], []>} : vector<8x32xf32>, vector<32x8xf32>, vector<8x8xf32> -> vector<8x8xf32>
    %297 = tpu.concatenate %284, %288, %292, %296 in 0 : vector<8x8xf32>, vector<8x8xf32>, vector<8x8xf32>, vector<8x8xf32> -> vector<32x8xf32>
    %cst_99 = arith.constant -1.000000e+09 : f32
    %298 = vector.shape_cast %280 : vector<1x8xi1> to vector<1x8xi1>
    %299 = vector.broadcast %298 : vector<1x8xi1> to vector<32x8xi1>
    %300 = vector.broadcast %cst_99 : f32 to vector<32x8xf32>
    %301 = arith.select %299, %300, %297 : vector<32x8xi1>, vector<32x8xf32>
    %cst_100 = arith.constant dense<0xFF800000> : vector<32xf32>
    %302 = vector.multi_reduction <maximumf>, %301, %cst_100 [1] : vector<32x8xf32> to vector<32xf32>
    %303 = vector.shape_cast %302 : vector<32xf32> to vector<32x1xf32>
    %304 = vector.broadcast %303 : vector<32x1xf32> to vector<32x8xf32>
    %305 = arith.subf %301, %304 : vector<32x8xf32>
    %306 = math.exp %305 : vector<32x8xf32>
    %cst_101 = arith.constant dense<0.000000e+00> : vector<32xf32>
    %307 = vector.multi_reduction <add>, %306, %cst_101 [1] : vector<32x8xf32> to vector<32xf32>
    %308 = vector.shape_cast %307 : vector<32xf32> to vector<32x1xf32>
    %309 = tpu.reciprocal %308 {approx = true} : vector<32x1xf32> -> vector<32x1xf32>
    %310 = vector.broadcast %309 : vector<32x1xf32> to vector<32x8xf32>
    %311 = arith.mulf %306, %310 : vector<32x8xf32>
    %312 = vector.extract_strided_slice %311 {offsets = [0, 0], sizes = [8, 8], strides = [1, 1]} : vector<32x8xf32> to vector<8x8xf32>
    %313 = vector.extract_strided_slice %311 {offsets = [8, 0], sizes = [8, 8], strides = [1, 1]} : vector<32x8xf32> to vector<8x8xf32>
    %314 = vector.extract_strided_slice %311 {offsets = [16, 0], sizes = [8, 8], strides = [1, 1]} : vector<32x8xf32> to vector<8x8xf32>
    %315 = vector.extract_strided_slice %311 {offsets = [24, 0], sizes = [8, 8], strides = [1, 1]} : vector<32x8xf32> to vector<8x8xf32>
    %316 = vector.extract_strided_slice %278 {offsets = [0, 0], sizes = [8, 32], strides = [1, 1]} : vector<8x128xf32> to vector<8x32xf32>
    %cst_102 = arith.constant dense<0.000000e+00> : vector<8x32xf32>
    %317 = tpu.matmul %312, %316, %cst_102 {dimension_numbers = #tpu.dot_dimension_numbers<[1], [0], [0], [1], [0, 0, 1, 1], [], []>} : vector<8x8xf32>, vector<8x32xf32>, vector<8x32xf32> -> vector<8x32xf32>
    %318 = vector.extract_strided_slice %278 {offsets = [0, 32], sizes = [8, 32], strides = [1, 1]} : vector<8x128xf32> to vector<8x32xf32>
    %cst_103 = arith.constant dense<0.000000e+00> : vector<8x32xf32>
    %319 = tpu.matmul %313, %318, %cst_103 {dimension_numbers = #tpu.dot_dimension_numbers<[1], [0], [0], [1], [0, 0, 1, 1], [], []>} : vector<8x8xf32>, vector<8x32xf32>, vector<8x32xf32> -> vector<8x32xf32>
    %320 = vector.extract_strided_slice %278 {offsets = [0, 64], sizes = [8, 32], strides = [1, 1]} : vector<8x128xf32> to vector<8x32xf32>
    %cst_104 = arith.constant dense<0.000000e+00> : vector<8x32xf32>
    %321 = tpu.matmul %314, %320, %cst_104 {dimension_numbers = #tpu.dot_dimension_numbers<[1], [0], [0], [1], [0, 0, 1, 1], [], []>} : vector<8x8xf32>, vector<8x32xf32>, vector<8x32xf32> -> vector<8x32xf32>
    %322 = vector.extract_strided_slice %278 {offsets = [0, 96], sizes = [8, 32], strides = [1, 1]} : vector<8x128xf32> to vector<8x32xf32>
    %cst_105 = arith.constant dense<0.000000e+00> : vector<8x32xf32>
    %323 = tpu.matmul %315, %322, %cst_105 {dimension_numbers = #tpu.dot_dimension_numbers<[1], [0], [0], [1], [0, 0, 1, 1], [], []>} : vector<8x8xf32>, vector<8x32xf32>, vector<8x32xf32> -> vector<8x32xf32>
    %324 = tpu.concatenate %317, %319, %321, %323 in 1 : vector<8x32xf32>, vector<8x32xf32>, vector<8x32xf32>, vector<8x32xf32> -> vector<8x128xf32>
    %325 = arith.truncf %324 : vector<8x128xf32> to vector<8x128xbf16>
    %c1_106 = arith.constant 1 : index
    %c0_107 = arith.constant 0 : index
    %c0_108 = arith.constant 0 : index
    %326 = vector.load %arg4[%c1_106, %c0_107, %c0_108] : memref<2x128x128xbf16, #tpu.memory_space<vmem>>, vector<1x128x128xbf16>
    %327 = vector.shape_cast %326 : vector<1x128x128xbf16> to vector<128x128xbf16>
    %cst_109 = arith.constant dense<0.000000e+00> : vector<8x128xf32>
    %328 = tpu.matmul %325, %327, %cst_109 {dimension_numbers = #tpu.dot_dimension_numbers<[1], [0], [0], [1], [0, 0, 1, 1], [], []>} : vector<8x128xbf16>, vector<128x128xbf16>, vector<8x128xf32> -> vector<8x128xf32>
    %329 = tpu.concatenate %312, %313, %314, %315 in 1 : vector<8x8xf32>, vector<8x8xf32>, vector<8x8xf32>, vector<8x8xf32> -> vector<8x32xf32>
    %330 = tpu.concatenate %274, %328 in 0 : vector<8x128xf32>, vector<8x128xf32> -> vector<16x128xf32>
    %331 = vector.broadcast %201 : vector<1x128xf32> to vector<16x128xf32>
    %332 = arith.addf %198, %331 : vector<16x128xf32>
    %333 = arith.addf %330, %332 : vector<16x128xf32>
    %cst_110 = arith.constant dense<0.000000e+00> : vector<16xf32>
    %334 = vector.multi_reduction <add>, %333, %cst_110 [1] : vector<16x128xf32> to vector<16xf32>
    %335 = vector.shape_cast %334 : vector<16xf32> to vector<16x1xf32>
    %cst_111 = arith.constant 1.280000e+02 : f32
    %336 = vector.broadcast %cst_111 : f32 to vector<16x1xf32>
    %337 = arith.divf %335, %336 : vector<16x1xf32>
    %338 = vector.broadcast %337 : vector<16x1xf32> to vector<16x128xf32>
    %339 = arith.subf %333, %338 : vector<16x128xf32>
    %340 = arith.mulf %339, %339 : vector<16x128xf32>
    %cst_112 = arith.constant dense<0.000000e+00> : vector<16xf32>
    %341 = vector.multi_reduction <add>, %340, %cst_112 [1] : vector<16x128xf32> to vector<16xf32>
    %342 = vector.shape_cast %341 : vector<16xf32> to vector<16x1xf32>
    %cst_113 = arith.constant 1.280000e+02 : f32
    %343 = vector.broadcast %cst_113 : f32 to vector<16x1xf32>
    %344 = arith.divf %342, %343 : vector<16x1xf32>
    %345 = vector.broadcast %337 : vector<16x1xf32> to vector<16x128xf32>
    %346 = arith.subf %333, %345 : vector<16x128xf32>
    %cst_114 = arith.constant 9.99999974E-6 : f32
    %347 = vector.broadcast %cst_114 : f32 to vector<16x1xf32>
    %348 = arith.addf %344, %347 : vector<16x1xf32>
    %349 = math.rsqrt %348 : vector<16x1xf32>
    %350 = vector.broadcast %349 : vector<16x1xf32> to vector<16x128xf32>
    %351 = arith.mulf %346, %350 : vector<16x128xf32>
    %352 = vector.broadcast %202 : vector<1x128xf32> to vector<16x128xf32>
    %353 = arith.mulf %351, %352 : vector<16x128xf32>
    %354 = vector.broadcast %203 : vector<1x128xf32> to vector<16x128xf32>
    %355 = arith.addf %353, %354 : vector<16x128xf32>
    %356 = arith.truncf %355 : vector<16x128xf32> to vector<16x128xbf16>
    %c1_115 = arith.constant 1 : index
    %c0_116 = arith.constant 0 : index
    %c0_117 = arith.constant 0 : index
    %357 = vector.load %arg5[%c1_115, %c0_116, %c0_117] : memref<2x128x256xbf16, #tpu.memory_space<vmem>>, vector<1x128x256xbf16>
    %358 = vector.shape_cast %357 : vector<1x128x256xbf16> to vector<128x256xbf16>
    %cst_118 = arith.constant dense<0.000000e+00> : vector<16x256xf32>
    %359 = tpu.matmul %356, %358, %cst_118 {dimension_numbers = #tpu.dot_dimension_numbers<[1], [0], [0], [1], [0, 0, 1, 1], [], []>} : vector<16x128xbf16>, vector<128x256xbf16>, vector<16x256xf32> -> vector<16x256xf32>
    %360 = vector.broadcast %210 : vector<1x256xf32> to vector<16x256xf32>
    %361 = arith.addf %359, %360 : vector<16x256xf32>
    %cst_119 = arith.constant 0.000000e+00 : f32
    %362 = vector.broadcast %cst_119 : f32 to vector<16x256xf32>
    %363 = arith.maximumf %361, %362 : vector<16x256xf32>
    %364 = arith.truncf %363 : vector<16x256xf32> to vector<16x256xbf16>
    %c1_120 = arith.constant 1 : index
    %c0_121 = arith.constant 0 : index
    %c0_122 = arith.constant 0 : index
    %365 = vector.load %arg6[%c1_120, %c0_121, %c0_122] : memref<2x256x128xbf16, #tpu.memory_space<vmem>>, vector<1x256x128xbf16>
    %366 = vector.shape_cast %365 : vector<1x256x128xbf16> to vector<256x128xbf16>
    %cst_123 = arith.constant dense<0.000000e+00> : vector<16x128xf32>
    %367 = tpu.matmul %364, %366, %cst_123 {dimension_numbers = #tpu.dot_dimension_numbers<[1], [0], [0], [1], [0, 0, 1, 1], [], []>} : vector<16x256xbf16>, vector<256x128xbf16>, vector<16x128xf32> -> vector<16x128xf32>
    %368 = vector.broadcast %204 : vector<1x128xf32> to vector<16x128xf32>
    %369 = arith.addf %367, %368 : vector<16x128xf32>
    %370 = arith.addf %369, %355 : vector<16x128xf32>
    %cst_124 = arith.constant dense<0.000000e+00> : vector<16xf32>
    %371 = vector.multi_reduction <add>, %370, %cst_124 [1] : vector<16x128xf32> to vector<16xf32>
    %372 = vector.shape_cast %371 : vector<16xf32> to vector<16x1xf32>
    %cst_125 = arith.constant 1.280000e+02 : f32
    %373 = vector.broadcast %cst_125 : f32 to vector<16x1xf32>
    %374 = arith.divf %372, %373 : vector<16x1xf32>
    %375 = vector.broadcast %374 : vector<16x1xf32> to vector<16x128xf32>
    %376 = arith.subf %370, %375 : vector<16x128xf32>
    %377 = arith.mulf %376, %376 : vector<16x128xf32>
    %cst_126 = arith.constant dense<0.000000e+00> : vector<16xf32>
    %378 = vector.multi_reduction <add>, %377, %cst_126 [1] : vector<16x128xf32> to vector<16xf32>
    %379 = vector.shape_cast %378 : vector<16xf32> to vector<16x1xf32>
    %cst_127 = arith.constant 1.280000e+02 : f32
    %380 = vector.broadcast %cst_127 : f32 to vector<16x1xf32>
    %381 = arith.divf %379, %380 : vector<16x1xf32>
    %382 = vector.broadcast %374 : vector<16x1xf32> to vector<16x128xf32>
    %383 = arith.subf %370, %382 : vector<16x128xf32>
    %cst_128 = arith.constant 9.99999974E-6 : f32
    %384 = vector.broadcast %cst_128 : f32 to vector<16x1xf32>
    %385 = arith.addf %381, %384 : vector<16x1xf32>
    %386 = math.rsqrt %385 : vector<16x1xf32>
    %387 = vector.broadcast %386 : vector<16x1xf32> to vector<16x128xf32>
    %388 = arith.mulf %383, %387 : vector<16x128xf32>
    %389 = vector.broadcast %205 : vector<1x128xf32> to vector<16x128xf32>
    %390 = arith.mulf %388, %389 : vector<16x128xf32>
    %391 = vector.broadcast %206 : vector<1x128xf32> to vector<16x128xf32>
    %392 = arith.addf %390, %391 : vector<16x128xf32>
    %393 = vector.shape_cast %392 : vector<16x128xf32> to vector<2x8x128xf32>
    %c0_129 = arith.constant 0 : index
    %c0_130 = arith.constant 0 : index
    %c0_131 = arith.constant 0 : index
    %394 = vector.load %arg10[%c0_129, %c0_130, %c0_131] : memref<2x8x128xf32, #tpu.memory_space<vmem>>, vector<2x8x128xf32>
    tpu.vector_store %arg10[%c0_129, %c0_130, %c0_131], %393 {strides = array<i32>} : memref<2x8x128xf32, #tpu.memory_space<vmem>>, vector<2x8x128xf32>,
    %395 = tpu.concatenate %81, %135, %275, %329 in 1 : vector<8x32xf32>, vector<8x32xf32>, vector<8x32xf32>, vector<8x32xf32> -> vector<8x128xf32>
    %c0_132 = arith.constant 0 : index
    %c0_133 = arith.constant 0 : index
    %c0_134 = arith.constant 0 : index
    %396 = vector.load %arg11[%c0_132, %c0_133, %c0_134] : memref<1x8x128xf32, #tpu.memory_space<vmem>>, vector<1x8x128xf32>
    %397 = vector.shape_cast %396 : vector<1x8x128xf32> to vector<8x128xf32>
    %398 = vector.shape_cast %395 : vector<8x128xf32> to vector<1x8x128xf32>
    tpu.vector_store %arg11[%c0_132, %c0_133, %c0_134], %398 {strides = array<i32>} : memref<1x8x128xf32, #tpu.memory_space<vmem>>, vector<1x8x128xf32>,
    return
  }
  func.func @transform_0(%arg0: i32) -> (i32, i32, i32) {
    %c0_i32 = arith.constant 0 : i32
    %c0_i32_0 = arith.constant 0 : i32
    %c0_i32_1 = arith.constant 0 : i32
    return %arg0, %c0_i32, %c0_i32_0 : i32, i32, i32
  }
  func.func @transform_1(%arg0: i32) -> (i32, i32, i32) {
    %c0_i32 = arith.constant 0 : i32
    %c0_i32_0 = arith.constant 0 : i32
    %c0_i32_1 = arith.constant 0 : i32
    return %arg0, %c0_i32, %c0_i32_0 : i32, i32, i32
  }
  func.func @transform_2(%arg0: i32) -> (i32, i32, i32) {
    %c0_i32 = arith.constant 0 : i32
    %c0_i32_0 = arith.constant 0 : i32
    %c0_i32_1 = arith.constant 0 : i32
    %c0_i32_2 = arith.constant 0 : i32
    return %c0_i32, %c0_i32_0, %c0_i32_1 : i32, i32, i32
  }
  func.func @transform_3(%arg0: i32) -> (i32, i32, i32) {
    %c0_i32 = arith.constant 0 : i32
    %c0_i32_0 = arith.constant 0 : i32
    %c0_i32_1 = arith.constant 0 : i32
    %c0_i32_2 = arith.constant 0 : i32
    return %c0_i32, %c0_i32_0, %c0_i32_1 : i32, i32, i32
  }
  func.func @transform_4(%arg0: i32) -> (i32, i32, i32) {
    %c0_i32 = arith.constant 0 : i32
    %c0_i32_0 = arith.constant 0 : i32
    %c0_i32_1 = arith.constant 0 : i32
    %c0_i32_2 = arith.constant 0 : i32
    return %c0_i32, %c0_i32_0, %c0_i32_1 : i32, i32, i32
  }
  func.func @transform_5(%arg0: i32) -> (i32, i32, i32) {
    %c0_i32 = arith.constant 0 : i32
    %c0_i32_0 = arith.constant 0 : i32
    %c0_i32_1 = arith.constant 0 : i32
    %c0_i32_2 = arith.constant 0 : i32
    return %c0_i32, %c0_i32_0, %c0_i32_1 : i32, i32, i32
  }
  func.func @transform_6(%arg0: i32) -> (i32, i32, i32) {
    %c0_i32 = arith.constant 0 : i32
    %c0_i32_0 = arith.constant 0 : i32
    %c0_i32_1 = arith.constant 0 : i32
    %c0_i32_2 = arith.constant 0 : i32
    return %c0_i32, %c0_i32_0, %c0_i32_1 : i32, i32, i32
  }
  func.func @transform_7(%arg0: i32) -> (i32, i32, i32) {
    %c0_i32 = arith.constant 0 : i32
    %c0_i32_0 = arith.constant 0 : i32
    %c0_i32_1 = arith.constant 0 : i32
    %c0_i32_2 = arith.constant 0 : i32
    return %c0_i32, %c0_i32_0, %c0_i32_1 : i32, i32, i32
  }
  func.func @transform_8(%arg0: i32) -> (i32, i32, i32) {
    %c0_i32 = arith.constant 0 : i32
    %c0_i32_0 = arith.constant 0 : i32
    %c0_i32_1 = arith.constant 0 : i32
    %c0_i32_2 = arith.constant 0 : i32
    return %c0_i32, %c0_i32_0, %c0_i32_1 : i32, i32, i32
  }
  func.func @transform_9(%arg0: i32) -> (i32, i32, i32) {
    %c0_i32 = arith.constant 0 : i32
    %c0_i32_0 = arith.constant 0 : i32
    %c0_i32_1 = arith.constant 0 : i32
    return %arg0, %c0_i32, %c0_i32_0 : i32, i32, i32
  }
  func.func @transform_10(%arg0: i32) -> (i32, i32, i32) {
    %c0_i32 = arith.constant 0 : i32
    %c0_i32_0 = arith.constant 0 : i32
    %c0_i32_1 = arith.constant 0 : i32
    return %arg0, %c0_i32, %c0_i32_0 : i32, i32, i32
  }
}

</mosaic_0001>

<bundles_post_ra>
// kernel: encoder_forward.1
= control target key start
LH: loop header
LB: loop body
LE: loop exit
PB: predicated region body
PF: predicated region fallthrough
CT: control target
= control target key end

     0   :  { %16 = vsyncpa [#allocation3], 0  ;;  %s14132_s0 = inlined_call_operand.vmem [shape: f32[2,8,128], index: 0, kind: input, shape index: {}]   ;;  %s14133_s1 = inlined_call_operand.vmem [shape: s32[2,1,8], index: 1, kind: input, shape index: {}]   ;;  %s14134_s2 = inlined_call_operand.hbm [shape: bf16[2,128,384], index: 2, kind: input, shape index: {}]   ;;  %s14135_s3 = inlined_call_operand.hbm [shape: bf16[2,128,128], index: 3, kind: input, shape index: {}]   ;;  %s14136_s4 = inlined_call_operand.vmem [shape: bf16[2,128,256], index: 4, kind: input, shape index: {}]   ;;  %s14137_s5 = inlined_call_operand.hbm [shape: bf16[2,256,128], index: 5, kind: input, shape index: {}]   ;;  %s14138_s6 = inlined_call_operand.vmem [shape: f32[2,6,128], index: 6, kind: input, shape index: {}]   ;;  %s14139_s7 = inlined_call_operand.vmem [shape: f32[2,1,384], index: 7, kind: input, shape index: {}]   ;;  %s14140_s8 = inlined_call_operand.vmem [shape: f32[2,1,256], index: 8, kind: input, shape index: {}]   ;;  %s14141_s9 = inlined_call_operand.hbm [shape: f32[2,8,128], index: 9, kind: output, shape index: {0}]   ;;  %s14142_s10 = inlined_call_operand.vmem [shape: f32[1,8,128], index: 10, kind: output, shape index: {1}]  }
   0x1   :  { %17 = vsyncpa [#allocation6], 0 }
   0x2   :  { %18 = vsyncpa [#allocation4], 0  ;;  %s11301_s13 = smov [#allocation5]   ;;  %s11207_s17 = scalar_lea.hbm %s14135_s3, 2048 }
   0x3   :  { %s40_s14 = sshll.u32 %s11301_s13, 4  ;;  %p11208_p0 = scmp.ne.s32.totalorder %s14135_s3, %s11207_s17  ;;  %s41_s14 = int_to_ptr.vmem [resolvable:$true] %s40_s14 }
   0x4   :  { %p11211_p1 = scmp.lt.u32.totalorder %s11207_s17, %s14135_s3 }
   0x6   :  { %p11213_p2 = pnand %p11211_p1, %p11208_p0 }
   0x8   :  { %11216 = shalt.err (!%p11213_p2)
}
   0x9   :  { %s11217_s22 = scalar_lea.vmem %s41_s14, 2048  ;;  %p11222_p4 = scmp.lt.s32.totalorder %s41_s14, %s41_s14 }
   0xa   :  { %p11218_p3 = scmp.ne.s32.totalorder %s41_s14, %s11217_s22  ;;  %p11223_p5 = scmp.lt.s32.totalorder %s11217_s22, %s11217_s22 }
   0xc   :  { %p11224_p6 = por %p11223_p5, %p11222_p4 }
   0xe   :  { %p11225_p7 = pnand %p11224_p6, %p11218_p3 }
  0x10   :  { %11228 = shalt.err (!%p11225_p7)
}
  0x11   :  { %s11302_s23 = smov 64   ;;  %s11303_s24 = smov 4  }
  0x12   :  { %46 = dma.hbm_to_vmem [thread:$0]  %s14135_s3, 2048, %s41_s14, [#allocation6], %s11302_s23, %s11302_s23, %s11303_s24  }
  0x13   :  { %s11304_s27 = smov [#allocation2]   ;;  %s11229_s11 = scalar_lea.hbm %s14134_s2, 6144 }
  0x14   :  { %s28_s28 = sshll.u32 %s11304_s27, 4  ;;  %p11230_p8 = scmp.ne.s32.totalorder %s14134_s2, %s11229_s11  ;;  %s29_s28 = int_to_ptr.vmem [resolvable:$true] %s28_s28 }
  0x15   :  { %p11233_p9 = scmp.lt.u32.totalorder %s11229_s11, %s14134_s2 }
  0x17   :  { %p11235_p10 = pnand %p11233_p9, %p11230_p8 }
  0x19   :  { %11238 = shalt.err (!%p11235_p10)
}
  0x1a   :  { %s11239_s17 = scalar_lea.vmem %s29_s28, 6144  ;;  %p11244_p12 = scmp.lt.s32.totalorder %s29_s28, %s29_s28 }
  0x1b   :  { %p11240_p11 = scmp.ne.s32.totalorder %s29_s28, %s11239_s17  ;;  %p11245_p13 = scmp.lt.s32.totalorder %s11239_s17, %s11239_s17 }
  0x1d   :  { %p11246_p0 = por %p11245_p13, %p11244_p12 }
  0x1f   :  { %p11247_p1 = pnand %p11246_p0, %p11240_p11 }
  0x21   :  { %11250 = shalt.err (!%p11247_p1)
}
  0x22   :  { %s11305_s3 = smov 192   ;;  %s11306_s14 = smov 12  }
  0x23   :  { %34 = dma.hbm_to_vmem [thread:$0]  %s14134_s2, 6144, %s29_s28, [#allocation3], %s11305_s3, %s11305_s3, %s11306_s14  }
  0x24   :  { %s11307_s20 = smov [#allocation7]   ;;  %s11251_s26 = scalar_lea.hbm %s14137_s5, 4096 }
  0x25   :  { %s54_s21 = sshll.u32 %s11307_s20, 4  ;;  %p11252_p2 = scmp.ne.s32.totalorder %s14137_s5, %s11251_s26  ;;  %s55_s21 = int_to_ptr.vmem [resolvable:$true] %s54_s21 }
  0x26   :  { %p11255_p3 = scmp.lt.u32.totalorder %s11251_s26, %s14137_s5 }
  0x28   :  { %p11257_p4 = pnand %p11255_p3, %p11252_p2 }
  0x2a   :  { %11260 = shalt.err (!%p11257_p4)
}
  0x2b   :  { %s11261_s12 = scalar_lea.vmem %s55_s21, 4096  ;;  %p11266_p6 = scmp.lt.s32.totalorder %s55_s21, %s55_s21 }
  0x2c   :  { %p11262_p5 = scmp.ne.s32.totalorder %s55_s21, %s11261_s12  ;;  %p11267_p7 = scmp.lt.s32.totalorder %s11261_s12, %s11261_s12 }
  0x2e   :  { %p11268_p8 = por %p11267_p7, %p11266_p6 }
  0x30   :  { %p11269_p9 = pnand %p11268_p8, %p11262_p5 }
  0x32   :  { %11272 = shalt.err (!%p11269_p9)
}
  0x33   :  { %60 = dma.hbm_to_vmem [thread:$0]  %s14137_s5, 4096, %s55_s21, [#allocation6], %s11302_s23, %s11302_s23, %s11303_s24  }
  0x34   :  { %11295 = dma.done.wait [#allocation3], 6144  }
  0x35   :  { %11296 = vsyncadd [#allocation3], 4294961152 }
  0x36   :  { %11297 = dma.done.wait [#allocation6], 6144  }
  0x37   :  { %11298 = vsyncadd [#allocation6], 4294961152  ;;  %v14143_v0 = vmov 0   ;;  %v14145_v1 = vmov 0.0   ;;  %vm11310_vm0 = vmmov 0   ;;  %v77_v23 = vld [vmem:[%s14132_s0] sm:$0xff]  ;;  %v120_v29 = vlaneseq }
  0x38   :  { %295 = vmatprep.mubr.bf16.mxu0 %v14143_v0  ;;  %10442 = vmatprep.subr.bf16.mxu1 %v14145_v1  ;;  %v10740_v2 = vld [vmem:[#allocation2 + $0x4] ss:$12 sps:$4 sm:$0xff]   ;;  %v10742_v3 = vld [vmem:[#allocation2] ss:$12 sps:$4 sm:$0xff]   ;;  %v10743_v4 = vld [vmem:[#allocation2 + $0x1c] ss:$12 sps:$4 sm:$0xff]  }
  0x39   :  { %10458 = vmatprep.mubr.msk.bf16.mxu1 %vm11310_vm0, %v14145_v1  ;;  %263 = vmatprep.subr.bf16.mxu0 %v10740_v2  ;;  %v10745_v5 = vld [vmem:[#allocation2 + $0x18] ss:$12 sps:$4 sm:$0xff]   ;;  %v10746_v6 = vld [vmem:[#allocation2 + $0x34] ss:$12 sps:$4 sm:$0xff]   ;;  %v10748_v7 = vld [vmem:[#allocation2 + $0x30] ss:$12 sps:$4 sm:$0xff]  }
  0x3a   :  { %264 = vmatpush1.bf16.msra.mxu0 %v10742_v3  ;;  %v10749_v8 = vld [vmem:[#allocation2 + $0x4c] ss:$12 sps:$4 sm:$0xff]   ;;  %v10751_v9 = vld [vmem:[#allocation2 + $0x48] ss:$12 sps:$4 sm:$0xff]   ;;  %v10752_v10 = vld [vmem:[#allocation2 + $0x64] ss:$12 sps:$4 sm:$0xff]  }
  0x3b   :  { %265 = vmatprep.subr.bf16.mxu0 %v10743_v4  ;;  %v10764_v11 = vld [vmem:[#allocation2 + $0x8] ss:$12 sps:$4 sm:$0xff]   ;;  %v10765_v12 = vld [vmem:[#allocation2 + $0x20] ss:$12 sps:$4 sm:$0xff]   ;;  %v10766_v15 = vld [vmem:[#allocation2 + $0x38] ss:$12 sps:$4 sm:$0xff]  }
  0x3c   :  { %10443 = vmatpush3.bf16.msra.mxu1 %v10764_v11  ;;  %v10754_v13 = vld [vmem:[#allocation2 + $0x60] ss:$12 sps:$4 sm:$0xff]   ;;  %v10755_v14 = vld [vmem:[#allocation2 + $0x7c] ss:$12 sps:$4 sm:$0xff]   ;;  %v10757_v16 = vld [vmem:[#allocation2 + $0x78] ss:$12 sps:$4 sm:$0xff]  }
  0x3d   :  { %10444 = vmatprep.subr.bf16.mxu1 %v14145_v1  ;;  %v10758_v17 = vld [vmem:[#allocation2 + $0x94] ss:$12 sps:$4 sm:$0xff]   ;;  %v10767_v18 = vld [vmem:[#allocation2 + $0x50] ss:$12 sps:$4 sm:$0xff]   ;;  %v10761_v20 = vld [vmem:[#allocation2 + $0xac] ss:$12 sps:$4 sm:$0xff]  }
  0x3e   :  { %266 = vmatpush1.bf16.msra.mxu0 %v10745_v5  ;;  %v10760_v19 = vld [vmem:[#allocation2 + $0x90] ss:$12 sps:$4 sm:$0xff]   ;;  %v10768_v21 = vld [vmem:[#allocation2 + $0x68] ss:$12 sps:$4 sm:$0xff]   ;;  %v10769_v25 = vld [vmem:[#allocation2 + $0x80] ss:$12 sps:$4 sm:$0xff]  }
  0x3f   :  { %267 = vmatprep.subr.bf16.mxu0 %v10746_v6  ;;  %v10763_v22 = vld [vmem:[#allocation2 + $0xa8] ss:$12 sps:$4 sm:$0xff]   ;;  %v10770_v27 = vld [vmem:[#allocation2 + $0x98] ss:$12 sps:$4 sm:$0xff]   ;;  %v10771_v28 = vld [vmem:[#allocation2 + $0xb0] ss:$12 sps:$4 sm:$0xff]  }
  0x40   :  { %10445 = vmatpush3.bf16.msra.mxu1 %v10765_v12  ;;  %v78_v24 = vld [vmem:[%s14132_s0 + $0x8] sm:$0xff]  ;;  %v11439_v30 = vshrl.u32 %v120_v29, 7  ;;  %v84_v33 = vld [vmem:[%s14139_s7] sm:$0x7]  ;;  %vm349_vm1 = vcmask 261120   ;;  %s11311_s3 = smov 96  }
  0x41   :  { %10446 = vmatprep.subr.bf16.mxu1 %v14145_v1  ;;  %v86_v26 = vpack.c.bf16 %v78_v24, %v77_v23  ;;  %s11312_s14 = smov 32   ;;  %v11313_v59 = vmov 1966171168   ;;  %v11498_v63 = vld [vmem:[%s14133_s1] sm:$0x1]  ;;  %vm1158_vm3 = vcmask 64512  }
  0x42   :  { %268 = vmatpush1.bf16.msra.mxu0 %v10748_v7  ;;  %v11442_v31 = vsub.s32 0, %v11439_v30  ;;  %v11445_v32 = vsub.s32 1, %v11439_v30  ;;  %v11461_v45 = vsub.s32 2, %v11439_v30  ;;  %v668_v60 = vunpack.c.l.s4 %v11313_v59  ;;  %14198 = vst [vmem:[#allocation14_spill] sm:$0xff] %v11498_v63  ;;  %s11315_s2 = smov 16   ;;  %s11316_s28 = smov 24  }
  0x43   :  { %269 = vmatprep.subr.bf16.mxu0 %v10749_v8  ;;  %vm81_vm2 = vcmp.ne.s32.totalorder %v11498_v63, 0  ;;  %vm2414_vm5 = vcmask 523264   ;;  %vm2416_vm6 = vcmask 785408   ;;  %vm2534_vm7 = vcmask 130048  }
  0x44   :  { %10447 = vmatpush3.bf16.msra.mxu1 %v10766_v15  ;;  %v123_v34 = vrot.slane %v84_v33, %v11442_v31  ;;  %v127_v35 = vrot.slane %v84_v33, %v11445_v32  ;;  %v131_v46 = vrot.slane %v84_v33, %v11461_v45  ;;  %v669_v61 = vunpack.c.0.s8 %v668_v60 }
  0x45   :  { %10448 = vmatprep.subr.bf16.mxu1 %v14145_v1  ;;  %vm2536_vm8 = vcmask 195584  }
  0x46   :  { %270 = vmatpush1.bf16.msra.mxu0 %v10751_v9  ;;  %v11493_v62 = vsub.s32 %v669_v61, %v11439_v30 }
  0x47   :  { %271 = vmatprep.subr.bf16.mxu0 %v10752_v10 }
  0x48   :  { %10449 = vmatpush3.bf16.msra.mxu1 %v10767_v18 }
  0x49   :  { %10450 = vmatprep.subr.bf16.mxu1 %v14145_v1 }
  0x4a   :  { %272 = vmatpush1.bf16.msra.mxu0 %v10754_v13 }
  0x4b   :  { %273 = vmatprep.subr.bf16.mxu0 %v10755_v14 }
  0x4c   :  { %10451 = vmatpush3.bf16.msra.mxu1 %v10768_v21 }
  0x4d   :  { %10452 = vmatprep.subr.bf16.mxu1 %v14145_v1 }
  0x4e   :  { %274 = vmatpush1.bf16.msra.mxu0 %v10757_v16 }
  0x4f   :  { %275 = vmatprep.subr.bf16.mxu0 %v10758_v17 }
  0x50   :  { %10453 = vmatpush3.bf16.msra.mxu1 %v10769_v25 }
  0x51   :  { %10454 = vmatprep.subr.bf16.mxu1 %v14145_v1 }
  0x52   :  { %276 = vmatpush1.bf16.msra.mxu0 %v10760_v19 }
  0x53   :  { %277 = vmatprep.subr.bf16.mxu0 %v10761_v20 }
  0x54   :  { %10455 = vmatpush3.bf16.msra.mxu1 %v10770_v27 }
  0x55   :  { %10456 = vmatprep.subr.bf16.mxu1 %v14145_v1 }
  0x56   :  { %278 = vmatpush1.bf16.msra.mxu0 %v10763_v22 }
  0x57   :  { %10492 = vmatprep.subr.mxu0 %v14145_v1 }
  0x58   :  { %10457 = vmatpush3.bf16.msra.mxu1 %v10771_v28 }
  0x59   :  { %296 = vmatmul.mubr.bf16.vlgmr.msra.gmra.mrb[0].mxu0 %v86_v26  ;;  %10462 = vmatprep.subr.mxu1 %v14145_v1 }
  0x5a   :  { %10494 = vmatprep.mubr.msk.f32.mxu0 %vm11310_vm0, %v14145_v1 }
  0x5b   :  { %10459 = vmatmul.mubr.bf16.vlgmr.msra.gmra.mrb[0].mxu1 %v86_v26 }
  0x5c   :  { %10464 = vmatprep.mubr.msk.f32.mxu1 %vm11310_vm0, %v14145_v1 }
 0x12c   :  { %v297_v36 = vpop.f32.mrb[0].mxu0 }
 0x12d   :  { %v299_v37 = vpop.f32.mrb[1].mxu0  ;;  %v298_v38 = vadd.f32 %v297_v36, %v123_v34 }
 0x12e   :  { %v300_v39 = vadd.f32 %v299_v37, %v127_v35  ;;  %v301_v40 = vpop.f32.mrb[2].mxu0  ;;  %v340_v47 = vpop.f32.mrb[0].mxu1 }
 0x12f   :  { %v11452_v41 = vadd.f32 %v301_v40, %v123_v34  ;;  %v303_v42 = vpop.f32.mrb[3].mxu0  ;;  %v347_v44 = vmul.f32 0.17677669, %v298_v38  ;;  %v10460_v48 = vpop.f32.mrb[1].mxu1  ;;  %v11484_v57 = vadd.f32 %v340_v47, %v131_v46 }
 0x130   :  { %v11454_v43 = vadd.f32 %v303_v42, %v127_v35  ;;  %506 = vrot.lane.b32.xlu1 %v300_v39, %s11302_s23  ;;  %428 = vrot.lane.b32.xlu0 %v300_v39, %s11311_s3  ;;  %v343_v49 = vpop.f32.mrb[2].mxu1 }
 0x131   :  { %10463 = vmatpush3.xpose.msk.msra.mxu1 %vm349_vm1, %v300_v39  ;;  %v11471_v50 = vadd.f32 %v343_v49, %v131_v46  ;;  %v10461_v51 = vpop.f32.mrb[3].mxu1  ;;  %14197 = vst [vmem:[#allocation13_spill] sm:$0xff] %v11484_v57 }
 0x132   :  { %10467 = vmatprep.subr.mxu1 %v14145_v1 }
 0x133   :  { %14196 = vst [vmem:[#allocation12_spill] sm:$0xff] %v11471_v50 }
 0x134   :  { %10465 = vmatmul.mubr.msk.f32.vlgmr.msra.gmra.mrb[4].mxu1 %vm349_vm1, %v347_v44  ;;  %504 = vrot.lane.b32.xlu1 %v347_v44, %s11302_s23 }
 0x135   :  { %426 = vrot.lane.b32.xlu0 %v347_v44, %s11311_s3  ;;  %10469 = vmatprep.mubr.msk.f32.mxu1 %vm11310_vm0, %v14145_v1 }
 0x138   :  { %582 = vrot.lane.b32.xlu1 %v347_v44, %s11312_s14 }
 0x139   :  { %584 = vrot.lane.b32.xlu0 %v300_v39, %s11312_s14 }
 0x1a2   :  { %v429_v52 = vpop.permute.xlu0 %428  ;;  %v507_v53 = vpop.permute.xlu1 %506 }
 0x1a3   :  { %10468 = vmatpush3.xpose.msk.msra.mxu1 %vm349_vm1, %v429_v52 }
 0x1a4   :  { %10472 = vmatprep.subr.mxu1 %v14145_v1 }
 0x1a6   :  { %v505_v55 = vpop.permute.xlu1 %504 }
 0x1a7   :  { %v427_v54 = vpop.permute.xlu0 %426 }
 0x1a8   :  { %10470 = vmatmul.mubr.msk.f32.vlgmr.msra.gmra.mrb[6].mxu1 %vm349_vm1, %v427_v54 }
 0x1a9   :  { %10473 = vmatpush3.xpose.msk.msra.mxu1 %vm349_vm1, %v507_v53  ;;  %10474 = vmatprep.mubr.msk.f32.mxu1 %vm11310_vm0, %v14145_v1 }
 0x1aa   :  { %10477 = vmatprep.subr.mxu1 %v14145_v1  ;;  %v583_v58 = vpop.permute.xlu1 %582 }
 0x1ab   :  { %v585_v56 = vpop.permute.xlu0 %584 }
 0x1ac   :  { %10475 = vmatmul.mubr.msk.f32.vlgmr.msra.gmra.mrb[8].mxu1 %vm349_vm1, %v505_v55 }
 0x1ad   :  { %10478 = vmatpush3.xpose.msk.msra.mxu1 %vm349_vm1, %v585_v56  ;;  %10479 = vmatprep.mubr.msk.f32.mxu1 %vm11310_vm0, %v14145_v1 }
 0x1ae   :  { %10482 = vmatprep.subr.mxu1 %v14145_v1 }
 0x1b0   :  { %10480 = vmatmul.mubr.msk.f32.vlgmr.msra.gmra.mrb[10].mxu1 %vm349_vm1, %v583_v58 }
 0x1b1   :  { %10483 = vmatpush3.msra.mxu1 %v11484_v57  ;;  %10484 = vmatprep.mubr.msk.f32.mxu1 %vm11310_vm0, %v14145_v1 }
 0x1b2   :  { %10487 = vmatprep.subr.mxu1 %v14145_v1 }
 0x207   :  { %v422_v2 = vpop.f32.mrb[4].mxu1 }
 0x208   :  { %v666_v3 = vcombine.high %v422_v2, %v422_v2  ;;  %v673_v4 = vrot.slane %v422_v2, %v11493_v62  ;;  %v10466_v5 = vpop.f32.mrb[5].mxu1 }
 0x20a   :  { %v680_v6 = vrot.slane %v666_v3, %v11493_v62  ;;  %v681_v7 = vcombine.high %v673_v4, %v673_v4  ;;  %v689_v8 = vrot.slane %v673_v4, %v11493_v62 }
 0x20c   :  { %v682_v9 = vcombine.high %v680_v6, %v680_v6  ;;  %v696_v10 = vrot.slane %v680_v6, %v11493_v62  ;;  %v703_v11 = vrot.slane %v681_v7, %v11493_v62  ;;  %v711_v12 = vcombine.high %v689_v8, %v689_v8 }
 0x20d   :  { %v11508_v13 = vsel %vm81_vm2, -1e+09, %v689_v8 }
 0x20e   :  { %v710_v14 = vrot.slane %v682_v9, %v11493_v62  ;;  %v712_v15 = vcombine.high %v696_v10, %v696_v10  ;;  %v713_v16 = vcombine.high %v703_v11, %v703_v11  ;;  %v11513_v17 = vsel %vm81_vm2, -1e+09, %v703_v11 }
 0x20f   :  { %v11517_v18 = vsel %vm81_vm2, -1e+09, %v711_v12  ;;  %v958_v19 = vcombine.low %v11508_v13, %v11513_v17  ;;  %v11527_v22 = vsel %vm81_vm2, -1e+09, %v696_v10 }
 0x210   :  { %v714_v20 = vcombine.high %v710_v14, %v710_v14  ;;  %v11523_v21 = vsel %vm81_vm2, -1e+09, %v713_v16  ;;  %v11531_v23 = vsel %vm81_vm2, -1e+09, %v710_v14  ;;  %v11539_v26 = vsel %vm81_vm2, -1e+09, %v712_v15 }
 0x211   :  { %v959_v24 = vcombine.low %v11517_v18, %v11523_v21  ;;  %v960_v25 = vcombine.low %v11527_v22, %v11531_v23  ;;  %v968_v29 = vrot.slane %v958_v19, %v11493_v62 }
 0x212   :  { %v11543_v27 = vsel %vm81_vm2, -1e+09, %v714_v20 }
 0x213   :  { %v961_v28 = vcombine.low %v11539_v26, %v11543_v27  ;;  %v975_v33 = vrot.slane %v959_v24, %v11493_v62  ;;  %v982_v34 = vrot.slane %v960_v25, %v11493_v62 }
 0x215   :  { %v989_v35 = vrot.slane %v961_v28, %v11493_v62  ;;  %v990_v36 = vcombine.low %v968_v29, %v975_v33 }
 0x217   :  { %v991_v37 = vcombine.low %v982_v34, %v989_v35  ;;  %v998_v38 = vrot.slane %v990_v36, %v11493_v62 }
 0x219   :  { %v1005_v39 = vrot.slane %v991_v37, %v11493_v62 }
 0x21b   :  { %v1006_v40 = vcombine.low %v998_v38, %v1005_v39 }
 0x21d   :  { %v1159_v42 = vsel %vm1158_vm3, %v1006_v40, -inf }
 0x21e   :  { %1160 = vmax.xlane.f32.xlu0 %v1159_v42 }
 0x27b   :  { %v500_v44 = vpop.f32.mrb[6].mxu1 }
 0x27c   :  { %v715_v46 = vcombine.high %v500_v44, %v500_v44  ;;  %v722_v47 = vrot.slane %v500_v44, %v11493_v62  ;;  %v10471_v48 = vpop.f32.mrb[7].mxu1 }
 0x27e   :  { %v729_v49 = vrot.slane %v715_v46, %v11493_v62  ;;  %v730_v51 = vcombine.high %v722_v47, %v722_v47  ;;  %v738_v52 = vrot.slane %v722_v47, %v11493_v62 }
 0x27f   :  { %v11557_v53 = vpop.f32.mrb[8].mxu1 }
 0x280   :  { %v731_v54 = vcombine.high %v729_v49, %v729_v49  ;;  %v752_v55 = vrot.slane %v730_v51, %v11493_v62  ;;  %v10476_v56 = vpop.f32.mrb[9].mxu1  ;;  %v745_v58 = vrot.slane %v729_v49, %v11493_v62  ;;  %v760_v61 = vcombine.high %v738_v52, %v738_v52 }
 0x281   :  { %v11572_v8 = vsel %vm81_vm2, -1e+09, %v738_v52 }
 0x282   :  { %v759_v59 = vrot.slane %v731_v54, %v11493_v62  ;;  %v762_v60 = vcombine.high %v752_v55, %v752_v55  ;;  %v11564_v4 = vsel %vm81_vm2, -1e+09, %v752_v55  ;;  %v761_v7 = vcombine.high %v745_v58, %v745_v58 }
 0x283   :  { %v656_v2 = vpop.f32.mrb[10].mxu1  ;;  %v11576_v9 = vsel %vm81_vm2, -1e+09, %v760_v61  ;;  %v1007_v14 = vcombine.low %v11572_v8, %v11564_v4  ;;  %v11589_v16 = vsel %vm81_vm2, -1e+09, %v745_v58 }
 0x284   :  { %v763_v3 = vcombine.high %v759_v59, %v759_v59  ;;  %v11568_v5 = vsel %vm81_vm2, -1e+09, %v762_v60  ;;  %v10481_v6 = vpop.f32.mrb[11].mxu1  ;;  %v11580_v10 = vsel %vm81_vm2, -1e+09, %v759_v59  ;;  %v813_v11 = vcombine.high %v656_v2, %v656_v2 }
 0x285   :  { %v820_v12 = vrot.slane %v656_v2, %v11493_v62  ;;  %v1008_v15 = vcombine.low %v11576_v9, %v11568_v5  ;;  %v1009_v20 = vcombine.low %v11589_v16, %v11580_v10  ;;  %v11599_v24 = vsel %vm81_vm2, -1e+09, %v761_v7 }
 0x286   :  { %v11593_v19 = vsel %vm81_vm2, -1e+09, %v763_v3  ;;  %v827_v25 = vrot.slane %v813_v11, %v11493_v62  ;;  %v1017_v34 = vrot.slane %v1007_v14, %v11493_v62 }
 0x287   :  { %v828_v28 = vcombine.high %v820_v12, %v820_v12  ;;  %v836_v29 = vrot.slane %v820_v12, %v11493_v62  ;;  %v1010_v33 = vcombine.low %v11599_v24, %v11593_v19  ;;  %v1024_v35 = vrot.slane %v1008_v15, %v11493_v62 }
 0x288   :  { %v829_v36 = vcombine.high %v827_v25, %v827_v25  ;;  %v843_v37 = vrot.slane %v827_v25, %v11493_v62  ;;  %v1031_v42 = vrot.slane %v1009_v20, %v11493_v62 }
 0x289   :  { %v850_v38 = vrot.slane %v828_v28, %v11493_v62  ;;  %v858_v39 = vcombine.high %v836_v29, %v836_v29  ;;  %v11611_v40 = vsel %vm81_vm2, -1e+09, %v836_v29  ;;  %v1038_v44 = vrot.slane %v1010_v33, %v11493_v62 }
 0x28a   :  { %v1039_v46 = vcombine.low %v1017_v34, %v1024_v35  ;;  %v857_v47 = vrot.slane %v829_v36, %v11493_v62  ;;  %v859_v48 = vcombine.high %v843_v37, %v843_v37  ;;  %v11632_v59 = vsel %vm81_vm2, -1e+09, %v843_v37 }
 0x28b   :  { %v860_v49 = vcombine.high %v850_v38, %v850_v38  ;;  %v11618_v51 = vsel %vm81_vm2, -1e+09, %v850_v38  ;;  %v11622_v52 = vsel %vm81_vm2, -1e+09, %v858_v39  ;;  %v1040_v55 = vcombine.low %v1031_v42, %v1038_v44 }
 0x28c   :  { %v1105_v54 = vcombine.low %v11611_v40, %v11618_v51  ;;  %v861_v56 = vcombine.high %v857_v47, %v857_v47  ;;  %v11636_v60 = vsel %vm81_vm2, -1e+09, %v857_v47  ;;  %v1047_v3 = vrot.slane %v1039_v46, %v11493_v62 }
 0x28d   :  { %v11628_v58 = vsel %vm81_vm2, -1e+09, %v860_v49  ;;  %v1107_v2 = vcombine.low %v11632_v59, %v11636_v60  ;;  %v1054_v6 = vrot.slane %v1040_v55, %v11493_v62  ;;  %v11646_v7 = vsel %vm81_vm2, -1e+09, %v859_v48 }
 0x28e   :  { %v1106_v61 = vcombine.low %v11622_v52, %v11628_v58  ;;  %v11650_v11 = vsel %vm81_vm2, -1e+09, %v861_v56  ;;  %v1115_v15 = vrot.slane %v1105_v54, %v11493_v62  ;;  %v11663_v39 = vsub.s32 3, %v11439_v30 }
 0x28f   :  { %v1055_v12 = vcombine.low %v1047_v3, %v1054_v6  ;;  %v1108_v14 = vcombine.low %v11646_v7, %v11650_v11  ;;  %v1129_v28 = vrot.slane %v1107_v2, %v11493_v62  ;;  %v11666_v42 = vsub.s32 4, %v11439_v30 }
 0x290   :  { %v1122_v20 = vrot.slane %v1106_v61, %v11493_v62  ;;  %v11669_v44 = vsub.s32 5, %v11439_v30  ;;  %v11672_v46 = vsub.s32 6, %v11439_v30  ;;  %v11675_v47 = vsub.s32 7, %v11439_v30 }
 0x291   :  { %v1162_v25 = vsel %vm1158_vm3, %v1055_v12, -inf  ;;  %v1136_v29 = vrot.slane %v1108_v14, %v11493_v62 }
 0x292   :  { %v1137_v33 = vcombine.low %v1115_v15, %v1122_v20  ;;  %1163 = vmax.xlane.f32.xlu1 %v1162_v25 }
 0x293   :  { %v1138_v34 = vcombine.low %v1129_v28, %v1136_v29 }
 0x294   :  { %v1145_v35 = vrot.slane %v1137_v33, %v11493_v62 }
 0x295   :  { %v1152_v36 = vrot.slane %v1138_v34, %v11493_v62 }
 0x297   :  { %v1153_v37 = vcombine.low %v1145_v35, %v1152_v36 }
 0x299   :  { %v1168_v38 = vsel %vm1158_vm3, %v1153_v37, -inf }
 0x29a   :  { %1169 = vmax.xlane.f32.xlu0 %v1168_v38 }
 0x2ab   :  { %v1161_v48 = vpop.xlane.xlu0 %1160 }
 0x2ac   :  { %v1178_v49 = vrot.slane %v1161_v48, %v11442_v31  ;;  %v1182_v54 = vrot.slane %v1161_v48, %v11445_v32  ;;  %v1186_v55 = vrot.slane %v1161_v48, %v11461_v45  ;;  %v1190_v56 = vrot.slane %v1161_v48, %v11663_v39 }
 0x2ad   :  { %v1194_v61 = vrot.slane %v1161_v48, %v11666_v42  ;;  %v1198_v2 = vrot.slane %v1161_v48, %v11669_v44  ;;  %v1202_v3 = vrot.slane %v1161_v48, %v11672_v46  ;;  %v1206_v6 = vrot.slane %v1161_v48, %v11675_v47 }
 0x2ae   :  { %v1335_v30 = vsub.f32 %v11508_v13, %v1178_v49  ;;  %v1336_v12 = vsub.f32 %v11513_v17, %v1182_v54  ;;  %v1337_v14 = vsub.f32 %v11517_v18, %v1186_v55  ;;  %v1338_v15 = vsub.f32 %v11523_v21, %v1190_v56 }
 0x2af   :  { %v1339_v20 = vsub.f32 %v11527_v22, %v1194_v61  ;;  %v1340_v25 = vsub.f32 %v11531_v23, %v1198_v2  ;;  %v1341_v28 = vsub.f32 %v11539_v26, %v1202_v3  ;;  %v1342_v35 = vsub.f32 %v11543_v27, %v1206_v6 }
 0x2b0   :  { %v1367_v29 = vmul.f32 1.442695, %v1335_v30  ;;  %v1369_v33 = vmul.f32 1.442695, %v1336_v12  ;;  %v1371_v34 = vmul.f32 1.442695, %v1337_v14 }
 0x2b1   :  { %v1373_v36 = vmul.f32 1.442695, %v1338_v15  ;;  %v1375_v13 = vmul.f32 1.442695, %v1339_v20  ;;  %v1377_v17 = vmul.f32 1.442695, %v1340_v25 }
 0x2b2   :  { %10900 = vpow2.f32 %v1367_v29  ;;  %v1379_v18 = vmul.f32 1.442695, %v1341_v28  ;;  %v1381_v21 = vmul.f32 1.442695, %v1342_v35 }
 0x2b3   :  { %10902 = vpow2.f32 %v1369_v33 }
 0x2b4   :  { %10904 = vpow2.f32 %v1371_v34 }
 0x2b5   :  { %10906 = vpow2.f32 %v1373_v36 }
 0x2b6   :  { %10908 = vpow2.f32 %v1375_v13 }
 0x2b7   :  { %10910 = vpow2.f32 %v1377_v17 }
 0x2b8   :  { %10912 = vpow2.f32 %v1379_v18 }
 0x2b9   :  { %10914 = vpow2.f32 %v1381_v21 }
 0x2bc   :  { %v11693_v22 = vpop.eup %10900 }
 0x2bd   :  { %v11695_v23 = vpop.eup %10902 }
 0x2be   :  { %v11697_v26 = vpop.eup %10904  ;;  %v1463_v27 = vcombine.low %v11693_v22, %v11695_v23 }
 0x2bf   :  { %v11701_v37 = vpop.eup %10906 }
 0x2c0   :  { %v11703_v38 = vpop.eup %10908  ;;  %v1464_v48 = vcombine.low %v11697_v26, %v11701_v37  ;;  %v1473_v49 = vrot.slane %v1463_v27, %v11493_v62 }
 0x2c1   :  { %v11708_v54 = vpop.eup %10910 }
 0x2c2   :  { %v11710_v55 = vpop.eup %10912  ;;  %v1465_v56 = vcombine.low %v11703_v38, %v11708_v54  ;;  %v1480_v61 = vrot.slane %v1464_v48, %v11493_v62 }
 0x2c3   :  { %v11715_v2 = vpop.eup %10914 }
 0x2c4   :  { %v1466_v3 = vcombine.low %v11710_v55, %v11715_v2  ;;  %v1487_v6 = vrot.slane %v1465_v56, %v11493_v62  ;;  %v1495_v30 = vcombine.low %v1473_v49, %v1480_v61 }
 0x2c6   :  { %v1494_v12 = vrot.slane %v1466_v3, %v11493_v62  ;;  %v1503_v15 = vrot.slane %v1495_v30, %v11493_v62 }
 0x2c8   :  { %v1496_v14 = vcombine.low %v1487_v6, %v1494_v12 }
 0x2ca   :  { %v1510_v20 = vrot.slane %v1496_v14, %v11493_v62 }
 0x2cc   :  { %v1511_v25 = vcombine.low %v1503_v15, %v1510_v20 }
 0x2ce   :  { %v1663_v28 = vsel %vm1158_vm3, %v1511_v25, 0.0 }
 0x2cf   :  { %1664 = vadd.xlane.f32.xlu0 %v1663_v28 }
 0x31f   :  { %v1164_v29 = vpop.xlane.xlu1 %1163 }
 0x320   :  { %v1210_v33 = vrot.slane %v1164_v29, %v11442_v31  ;;  %v1214_v34 = vrot.slane %v1164_v29, %v11445_v32  ;;  %v1218_v35 = vrot.slane %v1164_v29, %v11461_v45  ;;  %v1222_v36 = vrot.slane %v1164_v29, %v11663_v39 }
 0x321   :  { %v1226_v13 = vrot.slane %v1164_v29, %v11666_v42  ;;  %v1230_v17 = vrot.slane %v1164_v29, %v11669_v44  ;;  %v1234_v18 = vrot.slane %v1164_v29, %v11672_v46  ;;  %v1238_v21 = vrot.slane %v1164_v29, %v11675_v47 }
 0x322   :  { %v1343_v27 = vsub.f32 %v11572_v8, %v1210_v33  ;;  %v1344_v48 = vsub.f32 %v11564_v4, %v1214_v34  ;;  %v1345_v49 = vsub.f32 %v11576_v9, %v1218_v35  ;;  %v1346_v56 = vsub.f32 %v11568_v5, %v1222_v36 }
 0x323   :  { %v1347_v61 = vsub.f32 %v11589_v16, %v1226_v13  ;;  %v1348_v3 = vsub.f32 %v11580_v10, %v1230_v17  ;;  %v1349_v6 = vsub.f32 %v11599_v24, %v1234_v18  ;;  %v1350_v30 = vsub.f32 %v11593_v19, %v1238_v21 }
 0x324   :  { %v1383_v12 = vmul.f32 1.442695, %v1343_v27  ;;  %v1385_v14 = vmul.f32 1.442695, %v1344_v48  ;;  %v1387_v15 = vmul.f32 1.442695, %v1345_v49 }
 0x325   :  { %v1389_v20 = vmul.f32 1.442695, %v1346_v56  ;;  %v1391_v8 = vmul.f32 1.442695, %v1347_v61  ;;  %v1393_v4 = vmul.f32 1.442695, %v1348_v3 }
 0x326   :  { %10916 = vpow2.f32 %v1383_v12  ;;  %v1395_v9 = vmul.f32 1.442695, %v1349_v6  ;;  %v1397_v28 = vmul.f32 1.442695, %v1350_v30 }
 0x327   :  { %v1170_v25 = vpop.xlane.xlu0 %1169  ;;  %10918 = vpow2.f32 %v1385_v14 }
 0x328   :  { %10920 = vpow2.f32 %v1387_v15  ;;  %v1274_v5 = vrot.slane %v1170_v25, %v11442_v31  ;;  %v1278_v10 = vrot.slane %v1170_v25, %v11445_v32  ;;  %v1282_v16 = vrot.slane %v1170_v25, %v11461_v45 }
 0x329   :  { %10922 = vpow2.f32 %v1389_v20  ;;  %v1286_v19 = vrot.slane %v1170_v25, %v11663_v39  ;;  %v1290_v24 = vrot.slane %v1170_v25, %v11666_v42  ;;  %v1294_v29 = vrot.slane %v1170_v25, %v11669_v44 }
 0x32a   :  { %10924 = vpow2.f32 %v1391_v8  ;;  %v1298_v33 = vrot.slane %v1170_v25, %v11672_v46  ;;  %v1302_v34 = vrot.slane %v1170_v25, %v11675_v47  ;;  %v1359_v35 = vsub.f32 %v11611_v40, %v1274_v5 }
 0x32b   :  { %10926 = vpow2.f32 %v1393_v4  ;;  %v1360_v36 = vsub.f32 %v11618_v51, %v1278_v10  ;;  %v1361_v13 = vsub.f32 %v11622_v52, %v1282_v16  ;;  %v1362_v17 = vsub.f32 %v11628_v58, %v1286_v19 }
 0x32c   :  { %10928 = vpow2.f32 %v1395_v9  ;;  %v1363_v18 = vsub.f32 %v11632_v59, %v1290_v24  ;;  %v1364_v21 = vsub.f32 %v11636_v60, %v1294_v29  ;;  %v1365_v27 = vsub.f32 %v11646_v7, %v1298_v33 }
 0x32d   :  { %10930 = vpow2.f32 %v1397_v28  ;;  %v1415_v48 = vmul.f32 1.442695, %v1359_v35  ;;  %v1417_v49 = vmul.f32 1.442695, %v1360_v36  ;;  %v1366_v56 = vsub.f32 %v11650_v11, %v1302_v34 }
 0x32e   :  { %v1419_v40 = vmul.f32 1.442695, %v1361_v13  ;;  %v1421_v61 = vmul.f32 1.442695, %v1362_v17  ;;  %v1423_v51 = vmul.f32 1.442695, %v1363_v18 }
 0x32f   :  { %10932 = vpow2.f32 %v1415_v48  ;;  %v1425_v52 = vmul.f32 1.442695, %v1364_v21  ;;  %v1427_v59 = vmul.f32 1.442695, %v1365_v27  ;;  %v1429_v6 = vmul.f32 1.442695, %v1366_v56 }
 0x330   :  { %v11756_v3 = vpop.eup %10916  ;;  %10934 = vpow2.f32 %v1417_v49 }
 0x331   :  { %v11758_v58 = vpop.eup %10918  ;;  %10936 = vpow2.f32 %v1419_v40 }
 0x332   :  { %v11760_v60 = vpop.eup %10920  ;;  %v1512_v7 = vcombine.low %v11756_v3, %v11758_v58  ;;  %10938 = vpow2.f32 %v1421_v61 }
 0x333   :  { %v11764_v11 = vpop.eup %10922  ;;  %10940 = vpow2.f32 %v1423_v51 }
 0x334   :  { %v11766_v30 = vpop.eup %10924  ;;  %v1513_v12 = vcombine.low %v11760_v60, %v11764_v11  ;;  %v1522_v14 = vrot.slane %v1512_v7, %v11493_v62  ;;  %10942 = vpow2.f32 %v1425_v52 }
 0x335   :  { %v11771_v15 = vpop.eup %10926  ;;  %10944 = vpow2.f32 %v1427_v59 }
 0x336   :  { %v11773_v20 = vpop.eup %10928  ;;  %v1514_v8 = vcombine.low %v11766_v30, %v11771_v15  ;;  %v1529_v25 = vrot.slane %v1513_v12, %v11493_v62  ;;  %10946 = vpow2.f32 %v1429_v6 }
 0x337   :  { %v11778_v4 = vpop.eup %10930 }
 0x338   :  { %v1515_v9 = vcombine.low %v11773_v20, %v11778_v4  ;;  %v1536_v28 = vrot.slane %v1514_v8, %v11493_v62  ;;  %v1544_v5 = vcombine.low %v1522_v14, %v1529_v25 }
 0x339   :  { %v11783_v10 = vpop.eup %10932 }
 0x33a   :  { %v11785_v16 = vpop.eup %10934  ;;  %v1543_v19 = vrot.slane %v1515_v9, %v11493_v62  ;;  %v1552_v35 = vrot.slane %v1544_v5, %v11493_v62  ;;  %v764_v5 = vcombine.high %v11557_v53, %v11557_v53 }
 0x33b   :  { %v11788_v24 = vpop.eup %10936  ;;  %v1610_v29 = vcombine.low %v11783_v10, %v11785_v16 }
 0x33c   :  { %v11792_v33 = vpop.eup %10938  ;;  %v1545_v34 = vcombine.low %v1536_v28, %v1543_v19  ;;  %v11823_v28 = vmul.f32 0.17677669, %v11452_v41  ;;  %v778_v19 = vrot.slane %v764_v5, %v11493_v62 }
 0x33d   :  { %v11795_v36 = vpop.eup %10940  ;;  %v1611_v13 = vcombine.low %v11788_v24, %v11792_v33  ;;  %v1620_v17 = vrot.slane %v1610_v29, %v11493_v62 }
 0x33e   :  { %v11800_v18 = vpop.eup %10942  ;;  %v1559_v21 = vrot.slane %v1545_v34, %v11493_v62  ;;  %v771_v34 = vrot.slane %v11557_v53, %v11493_v62 }
 0x33f   :  { %v11803_v27 = vpop.eup %10944  ;;  %v1612_v48 = vcombine.low %v11795_v36, %v11800_v18  ;;  %v1627_v49 = vrot.slane %v1611_v13, %v11493_v62 }
 0x340   :  { %v11808_v56 = vpop.eup %10946  ;;  %v1560_v40 = vcombine.low %v1552_v35, %v1559_v21  ;;  %v780_v35 = vcombine.high %v778_v19, %v778_v19 }
 0x341   :  { %v1613_v61 = vcombine.low %v11803_v27, %v11808_v56  ;;  %v1634_v51 = vrot.slane %v1612_v48, %v11493_v62  ;;  %v1642_v52 = vcombine.low %v1620_v17, %v1627_v49 }
 0x342   :  { %v1666_v59 = vsel %vm1158_vm3, %v1560_v40, 0.0 }
 0x343   :  { %1667 = vadd.xlane.f32.xlu1 %v1666_v59  ;;  %v1641_v7 = vrot.slane %v1613_v61, %v11493_v62  ;;  %v1650_v12 = vrot.slane %v1642_v52, %v11493_v62 }
 0x345   :  { %v1643_v6 = vcombine.low %v1634_v51, %v1641_v7 }
 0x347   :  { %v1657_v14 = vrot.slane %v1643_v6, %v11493_v62 }
 0x349   :  { %v1658_v8 = vcombine.low %v1650_v12, %v1657_v14 }
 0x34b   :  { %v1672_v25 = vsel %vm1158_vm3, %v1658_v8, 0.0  ;;  %v779_v8 = vcombine.high %v771_v34, %v771_v34 }
 0x34c   :  { %1673 = vadd.xlane.f32.xlu0 %v1672_v25 }
 0x354   :  { %2062 = vrot.lane.b32.xlu1 %v11484_v57, %s11311_s3 }
 0x358   :  { %2616 = vrot.lane.b32.xlu1 %v11454_v43, %s11311_s3 }
 0x35c   :  { %v1665_v9 = vpop.xlane.xlu0 %1664  ;;  %2614 = vrot.lane.b32.xlu1 %v11823_v28, %s11311_s3 }
 0x35d   :  { %10948 = vrcp.f32 %v1665_v9 }
 0x360   :  { %2692 = vrot.lane.b32.xlu1 %v11823_v28, %s11302_s23 }
 0x362   :  { %2326 = vrot.lane.b32.xlu0 %v11484_v57, %s11312_s14 }
 0x364   :  { %2770 = vrot.lane.b32.xlu1 %v11823_v28, %s11312_s14 }
 0x366   :  { %2694 = vrot.lane.b32.xlu0 %v11454_v43, %s11302_s23 }
 0x367   :  { %v10949_v29 = vpop.eup %10948 }
 0x368   :  { %v1686_v41 = vrot.slane %v10949_v29, %v11442_v31  ;;  %v1690_v13 = vrot.slane %v10949_v29, %v11445_v32  ;;  %v1694_v17 = vrot.slane %v10949_v29, %v11461_v45  ;;  %v1698_v21 = vrot.slane %v10949_v29, %v11663_v39 }
 0x369   :  { %v1702_v48 = vrot.slane %v10949_v29, %v11666_v42  ;;  %v1706_v49 = vrot.slane %v10949_v29, %v11669_v44  ;;  %v1710_v53 = vrot.slane %v10949_v29, %v11672_v46  ;;  %v1714_v40 = vrot.slane %v10949_v29, %v11675_v47 }
 0x36a   :  { %v1843_v61 = vmul.f32 %v11693_v22, %v1686_v41  ;;  %v1844_v51 = vmul.f32 %v11695_v23, %v1690_v13  ;;  %v1845_v52 = vmul.f32 %v11697_v26, %v1694_v17  ;;  %v1846_v59 = vmul.f32 %v11701_v37, %v1698_v21  ;;  %2772 = vrot.lane.b32.xlu0 %v11454_v43, %s11312_s14 }
 0x36b   :  { %v1847_v7 = vmul.f32 %v11703_v38, %v1702_v48  ;;  %v1848_v6 = vmul.f32 %v11708_v54, %v1706_v49  ;;  %v1849_v12 = vmul.f32 %v11710_v55, %v1710_v53  ;;  %v1850_v14 = vmul.f32 %v11715_v2, %v1714_v40 }
 0x36c   :  { %v1883_v25 = vcombine.low %v1843_v61, %v1844_v51  ;;  %v1884_v22 = vcombine.low %v1845_v52, %v1846_v59  ;;  %v808_v26 = vrot.slane %v780_v35, %v11493_v62  ;;  %v794_v55 = vrot.slane %v778_v19, %v11493_v62 }
 0x36d   :  { %v1885_v9 = vcombine.low %v1847_v7, %v1848_v6  ;;  %v1886_v23 = vcombine.low %v1849_v12, %v1850_v14  ;;  %v801_v2 = vrot.slane %v779_v8, %v11493_v62  ;;  %v787_v13 = vrot.slane %v771_v34, %v11493_v62 }
 0x36e   :  { %v1893_v37 = vrot.slane %v1883_v25, %v11493_v62  ;;  %v1900_v5 = vrot.slane %v1884_v22, %v11493_v62  ;;  %v812_v35 = vcombine.high %v808_v26, %v808_v26  ;;  %v810_v48 = vcombine.high %v794_v55, %v794_v55 }
 0x36f   :  { %v1907_v38 = vrot.slane %v1885_v9, %v11493_v62  ;;  %v1914_v54 = vrot.slane %v1886_v23, %v11493_v62  ;;  %v811_v49 = vcombine.high %v801_v2, %v801_v2  ;;  %v809_v40 = vcombine.high %v787_v13, %v787_v13 }
 0x370   :  { %v1915_v29 = vcombine.low %v1893_v37, %v1900_v5  ;;  %v11872_v61 = vsel %vm81_vm2, -1e+09, %v812_v35  ;;  %v11882_v34 = vsel %vm81_vm2, -1e+09, %v808_v26  ;;  %v11886_v51 = vsel %vm81_vm2, -1e+09, %v810_v48 }
 0x371   :  { %v1916_v41 = vcombine.low %v1907_v38, %v1914_v54  ;;  %v11878_v19 = vsel %vm81_vm2, -1e+09, %v811_v49  ;;  %v1059_v52 = vcombine.low %v11886_v51, %v11872_v61  ;;  %v11894_v59 = vsel %vm81_vm2, -1e+09, %v801_v2 }
 0x372   :  { %v1923_v17 = vrot.slane %v1915_v29, %v11493_v62  ;;  %v11898_v7 = vsel %vm81_vm2, -1e+09, %v809_v40  ;;  %v11902_v6 = vsel %vm81_vm2, -1e+09, %v794_v55  ;;  %v11910_v8 = vsel %vm81_vm2, -1e+09, %v787_v13 }
 0x373   :  { %v1930_v21 = vrot.slane %v1916_v41, %v11493_v62  ;;  %v1057_v12 = vcombine.low %v11898_v7, %v11878_v19  ;;  %v1058_v14 = vcombine.low %v11902_v6, %v11882_v34  ;;  %v1056_v25 = vcombine.low %v11910_v8, %v11894_v59 }
 0x374   :  { %v1087_v22 = vrot.slane %v1059_v52, %v11493_v62 }
 0x375   :  { %v11868_v53 = vcombine.low %v1923_v17, %v1930_v21  ;;  %v1073_v9 = vrot.slane %v1057_v12, %v11493_v62  ;;  %v1080_v23 = vrot.slane %v1058_v14, %v11493_v62  ;;  %v1066_v26 = vrot.slane %v1056_v25, %v11493_v62 }
 0x377   :  { %14199 = vst [vmem:[#allocation15_spill] sm:$0xff] %v11868_v53  ;;  %10485 = vmatmul.mubr.msk.f32.vlgmr.msra.gmra.mrb[12].mxu1 %vm1158_vm3, %v11868_v53  ;;  %v1089_v37 = vcombine.low %v1080_v23, %v1087_v22  ;;  %v1088_v5 = vcombine.low %v1066_v26, %v1073_v9 }
 0x378   :  { %10489 = vmatprep.mubr.msk.f32.mxu1 %vm11310_vm0, %v14145_v1 }
 0x379   :  { %v1103_v38 = vrot.slane %v1089_v37, %v11493_v62  ;;  %v1096_v54 = vrot.slane %v1088_v5, %v11493_v62 }
 0x37b   :  { %v1104_v55 = vcombine.low %v1096_v54, %v1103_v38 }
 0x37d   :  { %v1165_v2 = vsel %vm1158_vm3, %v1104_v55, -inf }
 0x389   :  { %1166 = vmax.xlane.f32.xlu0 %v1165_v2 }
 0x3d0   :  { %v1668_v29 = vpop.xlane.xlu1 %1667 }
 0x3d1   :  { %10950 = vrcp.f32 %v1668_v29 }
 0x3d4   :  { %v2063_v41 = vpop.permute.xlu1 %2062 }
 0x3d5   :  { %10488 = vmatpush3.msra.mxu1 %v2063_v41 }
 0x3d6   :  { %10497 = vmatprep.subr.mxu1 %v14145_v1 }
 0x3d9   :  { %v1674_v13 = vpop.xlane.xlu0 %1673 }
 0x3da   :  { %10952 = vrcp.f32 %v1674_v13 }
 0x3db   :  { %v10951_v35 = vpop.eup %10950 }
 0x3dc   :  { %v1718_v17 = vrot.slane %v10951_v35, %v11442_v31  ;;  %v1722_v21 = vrot.slane %v10951_v35, %v11445_v32  ;;  %v1726_v48 = vrot.slane %v10951_v35, %v11461_v45  ;;  %v1730_v49 = vrot.slane %v10951_v35, %v11663_v39 }
 0x3dd   :  { %v1734_v40 = vrot.slane %v10951_v35, %v11666_v42  ;;  %v1738_v52 = vrot.slane %v10951_v35, %v11669_v44  ;;  %v1742_v12 = vrot.slane %v10951_v35, %v11672_v46  ;;  %v1746_v14 = vrot.slane %v10951_v35, %v11675_v47 }
 0x3de   :  { %v1851_v25 = vmul.f32 %v11756_v3, %v1718_v17  ;;  %v1852_v22 = vmul.f32 %v11758_v58, %v1722_v21  ;;  %v1853_v9 = vmul.f32 %v11760_v60, %v1726_v48  ;;  %v1854_v23 = vmul.f32 %v11764_v11, %v1730_v49 }
 0x3df   :  { %v1855_v26 = vmul.f32 %v11766_v30, %v1734_v40  ;;  %v1856_v37 = vmul.f32 %v11771_v15, %v1738_v52  ;;  %v1857_v5 = vmul.f32 %v11773_v20, %v1742_v12  ;;  %v1858_v38 = vmul.f32 %v11778_v4, %v1746_v14 }
 0x3e0   :  { %v2012_v54 = vcombine.low %v1851_v25, %v1852_v22  ;;  %v2013_v55 = vcombine.low %v1853_v9, %v1854_v23 }
 0x3e1   :  { %v2014_v2 = vcombine.low %v1855_v26, %v1856_v37  ;;  %v2015_v29 = vcombine.low %v1857_v5, %v1858_v38 }
 0x3e2   :  { %v2022_v3 = vrot.slane %v2012_v54, %v11493_v62  ;;  %v2029_v58 = vrot.slane %v2013_v55, %v11493_v62  ;;  %v2327_v55 = vpop.permute.xlu0 %2326 }
 0x3e3   :  { %v2036_v60 = vrot.slane %v2014_v2, %v11493_v62  ;;  %v2043_v11 = vrot.slane %v2015_v29, %v11493_v62 }
 0x3e4   :  { %v10953_v41 = vpop.eup %10952  ;;  %v2044_v30 = vcombine.low %v2022_v3, %v2029_v58  ;;  %v2617_v3 = vpop.permute.xlu1 %2616 }
 0x3e5   :  { %v2045_v13 = vcombine.low %v2036_v60, %v2043_v11  ;;  %v1782_v15 = vrot.slane %v10953_v41, %v11442_v31  ;;  %v1786_v20 = vrot.slane %v10953_v41, %v11445_v32  ;;  %v1790_v4 = vrot.slane %v10953_v41, %v11461_v45 }
 0x3e6   :  { %v2052_v35 = vrot.slane %v2044_v30, %v11493_v62  ;;  %v1794_v17 = vrot.slane %v10953_v41, %v11663_v39  ;;  %v1798_v21 = vrot.slane %v10953_v41, %v11666_v42  ;;  %v1802_v48 = vrot.slane %v10953_v41, %v11669_v44  ;;  %v2695_v11 = vpop.permute.xlu0 %2694 }
 0x3e7   :  { %v2059_v49 = vrot.slane %v2045_v13, %v11493_v62  ;;  %v1806_v40 = vrot.slane %v10953_v41, %v11672_v46  ;;  %v1810_v52 = vrot.slane %v10953_v41, %v11675_v47  ;;  %v1867_v12 = vmul.f32 %v11783_v10, %v1782_v15 }
 0x3e8   :  { %v1868_v14 = vmul.f32 %v11785_v16, %v1786_v20  ;;  %v1869_v25 = vmul.f32 %v11788_v24, %v1790_v4  ;;  %v1870_v22 = vmul.f32 %v11792_v33, %v1794_v17  ;;  %v1871_v9 = vmul.f32 %v11795_v36, %v1798_v21  ;;  %v2615_v60 = vpop.permute.xlu1 %2614 }
 0x3e9   :  { %v11957_v23 = vcombine.low %v2052_v35, %v2059_v49  ;;  %v1872_v26 = vmul.f32 %v11800_v18, %v1802_v48  ;;  %v1873_v37 = vmul.f32 %v11803_v27, %v1806_v40  ;;  %v1874_v5 = vmul.f32 %v11808_v56, %v1810_v52 }
 0x3ea   :  { %v2277_v38 = vcombine.low %v1867_v12, %v1868_v14  ;;  %v2278_v54 = vcombine.low %v1869_v25, %v1870_v22  ;;  %v2773_v41 = vpop.permute.xlu0 %2772 }
 0x3eb   :  { %14200 = vst [vmem:[#allocation16_spill] sm:$0xff] %v11957_v23  ;;  %10490 = vmatmul.mubr.msk.f32.vlgmr.msra.gmra.mrb[14].mxu1 %vm1158_vm3, %v11957_v23  ;;  %v2279_v10 = vcombine.low %v1871_v9, %v1872_v26  ;;  %v2280_v16 = vcombine.low %v1873_v37, %v1874_v5 }
 0x3ec   :  { %10498 = vmatpush3.msra.mxu1 %v2327_v55  ;;  %10499 = vmatprep.mubr.msk.f32.mxu1 %vm11310_vm0, %v14145_v1  ;;  %v2287_v24 = vrot.slane %v2277_v38, %v11493_v62  ;;  %v2294_v33 = vrot.slane %v2278_v54, %v11493_v62 }
 0x3ed   :  { %10522 = vmatprep.subr.mxu1 %v14145_v1  ;;  %v2301_v36 = vrot.slane %v2279_v10, %v11493_v62  ;;  %v2308_v18 = vrot.slane %v2280_v16, %v11493_v62 }
 0x3ee   :  { %v2309_v27 = vcombine.low %v2287_v24, %v2294_v33 }
 0x3ef   :  { %v2310_v56 = vcombine.low %v2301_v36, %v2308_v18 }
 0x3f0   :  { %v2317_v2 = vrot.slane %v2309_v27, %v11493_v62 }
 0x3f1   :  { %v2324_v29 = vrot.slane %v2310_v56, %v11493_v62 }
 0x3f3   :  { %v11973_v58 = vcombine.low %v2317_v2, %v2324_v29 }
 0x3f5   :  { %14201 = vst [vmem:[#allocation17_spill] sm:$0xff] %v11973_v58  ;;  %10500 = vmatmul.mubr.msk.f32.vlgmr.msra.gmra.mrb[16].mxu1 %vm1158_vm3, %v11973_v58 }
 0x3f6   :  { %10523 = vmatpush3.xpose.msk.msra.mxu1 %vm349_vm1, %v11454_v43  ;;  %10524 = vmatprep.mubr.msk.f32.mxu1 %vm11310_vm0, %v14145_v1  ;;  %v2693_v43 = vpop.permute.xlu1 %2692 }
 0x3f7   :  { %10527 = vmatprep.subr.mxu1 %v14145_v1 }
 0x3f9   :  { %10525 = vmatmul.mubr.msk.f32.vlgmr.msra.gmra.mrb[18].mxu1 %vm349_vm1, %v11823_v28 }
 0x3fa   :  { %10528 = vmatpush3.xpose.msk.msra.mxu1 %vm349_vm1, %v2617_v3  ;;  %10529 = vmatprep.mubr.msk.f32.mxu1 %vm11310_vm0, %v14145_v1  ;;  %v2771_v28 = vpop.permute.xlu1 %2770 }
 0x3fb   :  { %10532 = vmatprep.subr.mxu1 %v14145_v1 }
 0x3fd   :  { %10530 = vmatmul.mubr.msk.f32.vlgmr.msra.gmra.mrb[20].mxu1 %vm349_vm1, %v2615_v60  ;;  %v12048_v60 = vld [vmem:[%s14133_s1 + $0x1] sm:$0x1] }
 0x3fe   :  { %10533 = vmatpush3.xpose.msk.msra.mxu1 %vm349_vm1, %v2695_v11  ;;  %10534 = vmatprep.mubr.msk.f32.mxu1 %vm11310_vm0, %v14145_v1  ;;  %14213 = vst [vmem:[#allocation29_spill] sm:$0xff] %v12048_v60  ;;  %vm82_vm4 = vcmp.ne.s32.totalorder %v12048_v60, 0 }
 0x3ff   :  { %10537 = vmatprep.subr.mxu1 %v14145_v1 }
 0x401   :  { %10535 = vmatmul.mubr.msk.f32.vlgmr.msra.gmra.mrb[22].mxu1 %vm349_vm1, %v2693_v43 }
 0x402   :  { %10538 = vmatpush3.xpose.msk.msra.mxu1 %vm349_vm1, %v2773_v41  ;;  %10539 = vmatprep.mubr.msk.f32.mxu1 %vm11310_vm0, %v14145_v1 }
 0x403   :  { %10542 = vmatprep.subr.mxu1 %v14145_v1 }
 0x405   :  { %10540 = vmatmul.mubr.msk.f32.vlgmr.msra.gmra.mrb[24].mxu1 %vm349_vm1, %v2771_v28 }
 0x406   :  { %10543 = vmatpush3.msra.mxu1 %v11471_v50  ;;  %10544 = vmatprep.mubr.msk.f32.mxu1 %vm11310_vm0, %v14145_v1 }
 0x407   :  { %10547 = vmatprep.subr.mxu1 %v14145_v1 }
 0x416   :  { %v1167_v15 = vpop.xlane.xlu0 %1166 }
 0x417   :  { %v1242_v20 = vrot.slane %v1167_v15, %v11442_v31  ;;  %v1246_v4 = vrot.slane %v1167_v15, %v11445_v32  ;;  %v1250_v35 = vrot.slane %v1167_v15, %v11461_v45  ;;  %v1254_v17 = vrot.slane %v1167_v15, %v11663_v39 }
 0x418   :  { %v1258_v49 = vrot.slane %v1167_v15, %v11666_v42  ;;  %v1262_v52 = vrot.slane %v1167_v15, %v11669_v44  ;;  %v1266_v14 = vrot.slane %v1167_v15, %v11672_v46  ;;  %v1270_v22 = vrot.slane %v1167_v15, %v11675_v47 }
 0x419   :  { %v1351_v21 = vsub.f32 %v11910_v8, %v1242_v20  ;;  %v1352_v48 = vsub.f32 %v11894_v59, %v1246_v4  ;;  %v1353_v40 = vsub.f32 %v11898_v7, %v1250_v35  ;;  %v1354_v12 = vsub.f32 %v11878_v19, %v1254_v17 }
 0x41a   :  { %v1355_v26 = vsub.f32 %v11902_v6, %v1258_v49  ;;  %v1356_v8 = vsub.f32 %v11882_v34, %v1262_v52  ;;  %v1357_v5 = vsub.f32 %v11886_v51, %v1266_v14  ;;  %v1358_v7 = vsub.f32 %v11872_v61, %v1270_v22 }
 0x41b   :  { %v1399_v25 = vmul.f32 1.442695, %v1351_v21  ;;  %v1401_v9 = vmul.f32 1.442695, %v1352_v48  ;;  %v1403_v37 = vmul.f32 1.442695, %v1353_v40 }
 0x41c   :  { %v1405_v59 = vmul.f32 1.442695, %v1354_v12  ;;  %v1407_v19 = vmul.f32 1.442695, %v1355_v26  ;;  %v1409_v38 = vmul.f32 1.442695, %v1356_v8 }
 0x41d   :  { %10954 = vpow2.f32 %v1399_v25  ;;  %v1411_v55 = vmul.f32 1.442695, %v1357_v5  ;;  %v1413_v16 = vmul.f32 1.442695, %v1358_v7 }
 0x41e   :  { %10956 = vpow2.f32 %v1401_v9 }
 0x41f   :  { %10958 = vpow2.f32 %v1403_v37 }
 0x420   :  { %10960 = vpow2.f32 %v1405_v59 }
 0x421   :  { %10962 = vpow2.f32 %v1407_v19 }
 0x422   :  { %10964 = vpow2.f32 %v1409_v38 }
 0x423   :  { %10966 = vpow2.f32 %v1411_v55 }
 0x424   :  { %10968 = vpow2.f32 %v1413_v16 }
 0x427   :  { %v12023_v34 = vpop.eup %10954 }
 0x428   :  { %14204 = vst [vmem:[#allocation20_spill] sm:$0xff] %v12023_v34  ;;  %v12025_v51 = vpop.eup %10956 }
 0x429   :  { %14205 = vst [vmem:[#allocation21_spill] sm:$0xff] %v12025_v51  ;;  %v12027_v6 = vpop.eup %10958  ;;  %v1561_v18 = vcombine.low %v12023_v34, %v12025_v51 }
 0x42a   :  { %14206 = vst [vmem:[#allocation22_spill] sm:$0xff] %v12027_v6  ;;  %v12029_v61 = vpop.eup %10960 }
 0x42b   :  { %14207 = vst [vmem:[#allocation23_spill] sm:$0xff] %v12029_v61  ;;  %v12033_v36 = vpop.eup %10962  ;;  %v1562_v27 = vcombine.low %v12027_v6, %v12029_v61 }
 0x42c   :  { %14209 = vst [vmem:[#allocation25_spill] sm:$0xff] %v12033_v36  ;;  %v12039_v56 = vpop.eup %10964 }
 0x42d   :  { %14210 = vst [vmem:[#allocation26_spill] sm:$0xff] %v12039_v56  ;;  %v12041_v2 = vpop.eup %10966  ;;  %v1563_v28 = vcombine.low %v12033_v36, %v12039_v56  ;;  %v12057_v15 = vrot.slane %v1562_v27, %v11493_v62 }
 0x42e   :  { %14211 = vst [vmem:[#allocation27_spill] sm:$0xff] %v12041_v2  ;;  %v12043_v3 = vpop.eup %10968 }
 0x42f   :  { %14212 = vst [vmem:[#allocation28_spill] sm:$0xff] %v12043_v3  ;;  %v1564_v21 = vcombine.low %v12041_v2, %v12043_v3  ;;  %v12068_v22 = vrot.slane %v1563_v28, %v11493_v62 }
 0x431   :  { %v12087_v55 = vrot.slane %v1564_v21, %v11493_v62 }
 0x44a   :  { %v12003_v30 = vpop.f32.mrb[12].mxu1 }
 0x44b   :  { %14202 = vst [vmem:[#allocation18_spill] sm:$0xff] %v12003_v30  ;;  %v10486_v13 = vpop.f32.mrb[13].mxu1 }
 0x44c   :  { %v12054_v13 = vrot.slane %v1561_v18, %v11493_v62 }
 0x4be   :  { %v12021_v54 = vpop.f32.mrb[14].mxu1 }
 0x4bf   :  { %14203 = vst [vmem:[#allocation19_spill] sm:$0xff] %v12021_v54  ;;  %v10491_v10 = vpop.f32.mrb[15].mxu1 }
 0x4c8   :  { %v12031_v24 = vpop.f32.mrb[16].mxu1 }
 0x4c9   :  { %14208 = vst [vmem:[#allocation24_spill] sm:$0xff] %v12031_v24  ;;  %v10501_v33 = vpop.f32.mrb[17].mxu1 }
 0x4cc   :  { %v2610_v29 = vpop.f32.mrb[18].mxu1 }
 0x4cd   :  { %v2854_v11 = vcombine.high %v2610_v29, %v2610_v29  ;;  %v2861_v43 = vrot.slane %v2610_v29, %v11493_v62  ;;  %v10526_v41 = vpop.f32.mrb[19].mxu1 }
 0x4cf   :  { %v2868_v20 = vrot.slane %v2854_v11, %v11493_v62  ;;  %v2869_v4 = vcombine.high %v2861_v43, %v2861_v43  ;;  %v2877_v35 = vrot.slane %v2861_v43, %v11493_v62 }
 0x4d0   :  { %v2688_v17 = vpop.f32.mrb[20].mxu1 }
 0x4d1   :  { %v2870_v48 = vcombine.high %v2868_v20, %v2868_v20  ;;  %v2884_v49 = vrot.slane %v2868_v20, %v11493_v62  ;;  %v2891_v40 = vrot.slane %v2869_v4, %v11493_v62  ;;  %v2899_v52 = vcombine.high %v2877_v35, %v2877_v35  ;;  %v10531_v12 = vpop.f32.mrb[21].mxu1 }
 0x4d2   :  { %v2903_v14 = vcombine.high %v2688_v17, %v2688_v17  ;;  %v2910_v25 = vrot.slane %v2688_v17, %v11493_v62  ;;  %v12079_v5 = vsel %vm82_vm4, -1e+09, %v2877_v35 }
 0x4d3   :  { %v2898_v26 = vrot.slane %v2870_v48, %v11493_v62  ;;  %v2900_v37 = vcombine.high %v2884_v49, %v2884_v49  ;;  %v2901_v8 = vcombine.high %v2891_v40, %v2891_v40  ;;  %v12075_v59 = vsel %vm82_vm4, -1e+09, %v2891_v40 }
 0x4d4   :  { %v12083_v7 = vsel %vm82_vm4, -1e+09, %v2899_v52  ;;  %v2917_v19 = vrot.slane %v2903_v14, %v11493_v62  ;;  %v2766_v38 = vpop.f32.mrb[22].mxu1  ;;  %v3146_v18 = vcombine.low %v12079_v5, %v12075_v59  ;;  %v12101_v27 = vsel %vm82_vm4, -1e+09, %v2884_v49 }
 0x4d5   :  { %v2902_v10 = vcombine.high %v2898_v26, %v2898_v26  ;;  %v12091_v16 = vsel %vm82_vm4, -1e+09, %v2901_v8  ;;  %v12095_v33 = vsel %vm82_vm4, -1e+09, %v2898_v26  ;;  %v12105_v29 = vsel %vm82_vm4, -1e+09, %v2900_v37 }
 0x4d6   :  { %v2918_v11 = vcombine.high %v2910_v25, %v2910_v25  ;;  %v2919_v43 = vcombine.high %v2917_v19, %v2917_v19  ;;  %v10536_v41 = vpop.f32.mrb[23].mxu1  ;;  %v3147_v28 = vcombine.low %v12083_v7, %v12091_v16  ;;  %v2926_v4 = vrot.slane %v2910_v25, %v11493_v62 }
 0x4d7   :  { %v2933_v35 = vrot.slane %v2917_v19, %v11493_v62  ;;  %v2952_v48 = vcombine.high %v2766_v38, %v2766_v38  ;;  %v2959_v49 = vrot.slane %v2766_v38, %v11493_v62  ;;  %v12120_v26 = vsel %vm82_vm4, -1e+09, %v2902_v10 }
 0x4d8   :  { %v2940_v17 = vrot.slane %v2918_v11, %v11493_v62  ;;  %v12115_v21 = vrot.slane %v2919_v43, %v11493_v62  ;;  %v2844_v40 = vpop.f32.mrb[24].mxu1  ;;  %v2948_v52 = vcombine.high %v2926_v4, %v2926_v4  ;;  %v12123_v25 = vrot.slane %v3146_v18, %v11493_v62 }
 0x4d9   :  { %v2949_v12 = vcombine.high %v2933_v35, %v2933_v35  ;;  %v10541_v14 = vpop.f32.mrb[25].mxu1  ;;  %v12127_v8 = vsel %vm82_vm4, -1e+09, %v2926_v4  ;;  %v12146_v11 = vsel %vm82_vm4, -1e+09, %v2933_v35  ;;  %v2966_v4 = vrot.slane %v2952_v48, %v11493_v62 }
 0x4da   :  { %v2950_v37 = vcombine.high %v2940_v17, %v2940_v17  ;;  %v12131_v19 = vsel %vm82_vm4, -1e+09, %v2940_v17  ;;  %v12136_v38 = vsel %vm82_vm4, -1e+09, %v12115_v21  ;;  %v2951_v10 = vcombine.high %v12115_v21, %v12115_v21 }
 0x4db   :  { %v12142_v18 = vsel %vm82_vm4, -1e+09, %v2948_v52  ;;  %v12150_v43 = vsel %vm82_vm4, -1e+09, %v2949_v12  ;;  %v2967_v17 = vcombine.high %v2959_v49, %v2959_v49  ;;  %v2975_v21 = vrot.slane %v2959_v49, %v11493_v62 }
 0x4dc   :  { %v12154_v41 = vsel %vm82_vm4, -1e+09, %v2950_v37  ;;  %v3195_v52 = vcombine.low %v12127_v8, %v12131_v19  ;;  %v3197_v35 = vcombine.low %v12146_v11, %v12136_v38  ;;  %v3001_v14 = vcombine.high %v2844_v40, %v2844_v40 }
 0x4dd   :  { %v3008_v0 = vrot.slane %v2844_v40, %v11493_v62  ;;  %v2968_v12 = vcombine.high %v2966_v4, %v2966_v4  ;;  %v2982_v1 = vrot.slane %v2966_v4, %v11493_v62  ;;  %v2989_v37 = vrot.slane %v2967_v17, %v11493_v62 }
 0x4de   :  { %v2997_v9 = vcombine.high %v2975_v21, %v2975_v21  ;;  %v3196_v48 = vcombine.low %v12142_v18, %v12154_v41  ;;  %v3015_v49 = vrot.slane %v3001_v14, %v11493_v62  ;;  %v12176_v4 = vsel %vm82_vm4, -1e+09, %v2975_v21 }
 0x4df   :  { %v3016_v20 = vcombine.high %v3008_v0, %v3008_v0  ;;  %v3024_v53 = vrot.slane %v3008_v0, %v11493_v62  ;;  %v2996_v58 = vrot.slane %v2968_v12, %v11493_v62  ;;  %v2998_v23 = vcombine.high %v2982_v1, %v2982_v1 }
 0x4e0   :  { %v2999_v63 = vcombine.high %v2989_v37, %v2989_v37  ;;  %v12172_v40 = vsel %vm82_vm4, -1e+09, %v2989_v37  ;;  %v12180_v17 = vsel %vm82_vm4, -1e+09, %v2997_v9  ;;  %v3017_v14 = vcombine.high %v3015_v49, %v3015_v49 }
 0x4e1   :  { %v3149_v0 = vcombine.low %v12105_v29, %v12120_v26  ;;  %v12190_v37 = vsel %vm82_vm4, -1e+09, %v2982_v1  ;;  %v12194_v21 = vsel %vm82_vm4, -1e+09, %v2996_v58  ;;  %v3244_v9 = vcombine.low %v12176_v4, %v12172_v40 }
 0x4e2   :  { %v12186_v12 = vsel %vm82_vm4, -1e+09, %v2999_v63  ;;  %v3000_v30 = vcombine.high %v2996_v58, %v2996_v58  ;;  %v12200_v3 = vsel %vm82_vm4, -1e+09, %v2998_v23  ;;  %v3031_v2 = vrot.slane %v3015_v49, %v11493_v62 }
 0x4e3   :  { %v3038_v63 = vrot.slane %v3016_v20, %v11493_v62  ;;  %v3245_v1 = vcombine.low %v12180_v17, %v12186_v12  ;;  %v3045_v56 = vrot.slane %v3017_v14, %v11493_v62  ;;  %v3046_v36 = vcombine.high %v3024_v53, %v3024_v53 }
 0x4e4   :  { %v3163_v61 = vrot.slane %v3147_v28, %v11493_v62  ;;  %v3246_v6 = vcombine.low %v12190_v37, %v12194_v21  ;;  %v3047_v58 = vcombine.high %v3031_v2, %v3031_v2  ;;  %v12216_v20 = vsel %vm82_vm4, -1e+09, %v3024_v53 }
 0x4e5   :  { %v3048_v51 = vcombine.high %v3038_v63, %v3038_v63  ;;  %v12212_v23 = vsel %vm82_vm4, -1e+09, %v3038_v63  ;;  %v3049_v49 = vcombine.high %v3045_v56, %v3045_v56  ;;  %14215 = vst [vmem:[#allocation31_spill] sm:$0xff] %v12216_v20  ;;  %v12220_v14 = vsel %vm82_vm4, -1e+09, %v3046_v36 }
 0x4e6   :  { %14214 = vst [vmem:[#allocation30_spill] sm:$0xff] %v12212_v23  ;;  %14216 = vst [vmem:[#allocation32_spill] sm:$0xff] %v12220_v14  ;;  %v12224_v28 = vsel %vm82_vm4, -1e+09, %v3031_v2  ;;  %v12232_v63 = vsel %vm82_vm4, -1e+09, %v3045_v56  ;;  %v3293_v36 = vcombine.low %v12216_v20, %v12212_v23  ;;  %v14218_v2 = vcombine.low %v12101_v27, %v12095_v33 }
 0x4e7   :  { %v12228_v34 = vsel %vm82_vm4, -1e+09, %v3048_v51  ;;  %v12236_v53 = vsel %vm82_vm4, -1e+09, %v3047_v58  ;;  %v3177_v54 = vrot.slane %v3149_v0, %v11493_v62  ;;  %v3178_v51 = vcombine.low %v12123_v25, %v3163_v61 }
 0x4e8   :  { %14217 = vst [vmem:[#allocation33_spill] sm:$0xff] %v12228_v34  ;;  %v3170_v24 = vrot.slane %v14218_v2, %v11493_v62  ;;  %v12248_v56 = vsel %vm82_vm4, -1e+09, %v2951_v10  ;;  %v3294_v58 = vcombine.low %v12220_v14, %v12228_v34  ;;  %v3205_v57 = vrot.slane %v3195_v52, %v11493_v62 }
 0x4e9   :  { %v3198_v50 = vcombine.low %v12150_v43, %v12248_v56  ;;  %v3212_v23 = vrot.slane %v3196_v48, %v11493_v62  ;;  %v3219_v2 = vrot.slane %v3197_v35, %v11493_v62  ;;  %v12259_v61 = vsel %vm82_vm4, -1e+09, %v3000_v30 }
 0x4ea   :  { %v3179_v20 = vcombine.low %v3170_v24, %v3177_v54  ;;  %v3254_v25 = vrot.slane %v3244_v9, %v11493_v62  ;;  %v3247_v34 = vcombine.low %v12200_v3, %v12259_v61  ;;  %v3261_v14 = vrot.slane %v3245_v1, %v11493_v62 }
 0x4eb   :  { %v3226_v10 = vrot.slane %v3198_v50, %v11493_v62  ;;  %v3227_v0 = vcombine.low %v3205_v57, %v3212_v23  ;;  %v3295_v52 = vcombine.low %v12224_v28, %v12232_v63  ;;  %v3186_v54 = vrot.slane %v3178_v51, %v11493_v62 }
 0x4ec   :  { %v3193_v24 = vrot.slane %v3179_v20, %v11493_v62  ;;  %v12272_v30 = vsel %vm82_vm4, -1e+09, %v3049_v49  ;;  %v3268_v50 = vrot.slane %v3246_v6, %v11493_v62  ;;  %v3275_v57 = vrot.slane %v3247_v34, %v11493_v62 }
 0x4ed   :  { %v3228_v35 = vcombine.low %v3219_v2, %v3226_v10  ;;  %v3276_v48 = vcombine.low %v3254_v25, %v3261_v14  ;;  %v3296_v1 = vcombine.low %v12236_v53, %v12272_v30  ;;  %v3303_v23 = vrot.slane %v3293_v36, %v11493_v62 }
 0x4ee   :  { %v3194_v9 = vcombine.low %v3186_v54, %v3193_v24  ;;  %v3310_v51 = vrot.slane %v3294_v58, %v11493_v62  ;;  %v3235_v20 = vrot.slane %v3227_v0, %v11493_v62  ;;  %v3277_v49 = vcombine.low %v3268_v50, %v3275_v57 }
 0x4ef   :  { %v3242_v60 = vrot.slane %v3228_v35, %v11493_v62  ;;  %v1594_v2 = vcombine.low %v12068_v22, %v12087_v55  ;;  %v3317_v34 = vrot.slane %v3295_v52, %v11493_v62  ;;  %v3324_v14 = vrot.slane %v3296_v1, %v11493_v62 }
 0x4f0   :  { %v3346_v6 = vsel %vm1158_vm3, %v3194_v9, -inf  ;;  %v3325_v25 = vcombine.low %v3303_v23, %v3310_v51  ;;  %v3284_v36 = vrot.slane %v3276_v48, %v11493_v62  ;;  %v3291_v58 = vrot.slane %v3277_v49, %v11493_v62 }
 0x4f1   :  { %3347 = vmax.xlane.f32.xlu1 %v3346_v6  ;;  %v3243_v10 = vcombine.low %v3235_v20, %v3242_v60  ;;  %v3326_v0 = vcombine.low %v3317_v34, %v3324_v14  ;;  %v14219_v22 = vcombine.low %v12054_v13, %v12057_v15  ;;  %v1608_v52 = vrot.slane %v1594_v2, %v11493_v62 }
 0x4f2   :  { %v3292_v24 = vcombine.low %v3284_v36, %v3291_v58  ;;  %v3333_v35 = vrot.slane %v3325_v25, %v11493_v62 }
 0x4f3   :  { %v3349_v54 = vsel %vm1158_vm3, %v3243_v10, -inf  ;;  %v1601_v55 = vrot.slane %v14219_v22, %v11493_v62  ;;  %v3340_v60 = vrot.slane %v3326_v0, %v11493_v62 }
 0x4f4   :  { %3350 = vmax.xlane.f32.xlu0 %v3349_v54  ;;  %v3352_v50 = vsel %vm1158_vm3, %v3292_v24, -inf }
 0x4f5   :  { %v3341_v57 = vcombine.low %v3333_v35, %v3340_v60  ;;  %v1609_v48 = vcombine.low %v1601_v55, %v1608_v52 }
 0x4f7   :  { %v3355_v9 = vsel %vm1158_vm3, %v3341_v57, -inf  ;;  %v1669_v1 = vsel %vm1158_vm3, %v1609_v48, 0.0 }
 0x4f8   :  { %3353 = vmax.xlane.f32.xlu0 %v3352_v50  ;;  %3356 = vmax.xlane.f32.xlu1 %v3355_v9 }
 0x4fc   :  { %1670 = vadd.xlane.f32.xlu0 %v1669_v1 }
 0x57e   :  { %v3348_v13 = vpop.xlane.xlu1 %3347 }
 0x57f   :  { %v3365_v15 = vrot.slane %v3348_v13, %v11442_v31  ;;  %v3369_v23 = vrot.slane %v3348_v13, %v11445_v32  ;;  %v3373_v51 = vrot.slane %v3348_v13, %v11461_v45  ;;  %v3377_v20 = vrot.slane %v3348_v13, %v11663_v39 }
 0x580   :  { %v3381_v2 = vrot.slane %v3348_v13, %v11666_v42  ;;  %v3385_v6 = vrot.slane %v3348_v13, %v11669_v44  ;;  %v3389_v34 = vrot.slane %v3348_v13, %v11672_v46  ;;  %v3393_v14 = vrot.slane %v3348_v13, %v11675_v47 }
 0x581   :  { %v3351_v49 = vpop.xlane.xlu0 %3350  ;;  %v3522_v25 = vsub.f32 %v12079_v5, %v3365_v15  ;;  %v3523_v10 = vsub.f32 %v12075_v59, %v3369_v23  ;;  %v3524_v36 = vsub.f32 %v12083_v7, %v3373_v51  ;;  %v3525_v0 = vsub.f32 %v12091_v16, %v3377_v20 }
 0x582   :  { %v3397_v58 = vrot.slane %v3351_v49, %v11442_v31  ;;  %v3401_v54 = vrot.slane %v3351_v49, %v11445_v32  ;;  %v3405_v24 = vrot.slane %v3351_v49, %v11461_v45  ;;  %v3409_v22 = vrot.slane %v3351_v49, %v11663_v39 }
 0x583   :  { %v3526_v55 = vsub.f32 %v12101_v27, %v3381_v2  ;;  %v3527_v52 = vsub.f32 %v12095_v33, %v3385_v6  ;;  %v3413_v5 = vrot.slane %v3351_v49, %v11666_v42  ;;  %v3417_v59 = vrot.slane %v3351_v49, %v11669_v44 }
 0x584   :  { %v3528_v7 = vsub.f32 %v12105_v29, %v3389_v34  ;;  %v3529_v35 = vsub.f32 %v12120_v26, %v3393_v14  ;;  %v3421_v16 = vrot.slane %v3351_v49, %v11672_v46  ;;  %v3425_v60 = vrot.slane %v3351_v49, %v11675_v47 }
 0x585   :  { %v3530_v50 = vsub.f32 %v12127_v8, %v3397_v58  ;;  %v3554_v57 = vmul.f32 1.442695, %v3522_v25  ;;  %v3556_v48 = vmul.f32 1.442695, %v3523_v10  ;;  %v3558_v9 = vmul.f32 1.442695, %v3524_v36  ;;  %v3354_v13 = vpop.xlane.xlu0 %3353 }
 0x586   :  { %v3531_v27 = vsub.f32 %v12131_v19, %v3401_v54  ;;  %v3532_v33 = vsub.f32 %v12142_v18, %v3405_v24  ;;  %v3533_v1 = vsub.f32 %v12154_v41, %v3409_v22  ;;  %v3560_v15 = vmul.f32 1.442695, %v3525_v0  ;;  %v12344_v54 = vpop.xlane.xlu1 %3356 }
 0x587   :  { %v3534_v29 = vsub.f32 %v12146_v11, %v3413_v5  ;;  %v3535_v26 = vsub.f32 %v12136_v38, %v3417_v59  ;;  %10970 = vpow2.f32 %v3554_v57  ;;  %v3562_v23 = vmul.f32 1.442695, %v3526_v55 }
 0x588   :  { %v3536_v51 = vsub.f32 %v12150_v43, %v3421_v16  ;;  %v3537_v8 = vsub.f32 %v12248_v56, %v3425_v60  ;;  %10972 = vpow2.f32 %v3556_v48  ;;  %v3564_v20 = vmul.f32 1.442695, %v3527_v52 }
 0x589   :  { %v3429_v19 = vrot.slane %v3354_v13, %v11442_v31  ;;  %v3433_v18 = vrot.slane %v3354_v13, %v11445_v32  ;;  %10974 = vpow2.f32 %v3558_v9  ;;  %v3566_v41 = vmul.f32 1.442695, %v3528_v7 }
 0x58a   :  { %v3437_v49 = vrot.slane %v3354_v13, %v11461_v45  ;;  %v3441_v11 = vrot.slane %v3354_v13, %v11663_v39  ;;  %10976 = vpow2.f32 %v3560_v15  ;;  %v3568_v38 = vmul.f32 1.442695, %v3529_v35 }
 0x58b   :  { %v3445_v2 = vrot.slane %v3354_v13, %v11666_v42  ;;  %v3449_v43 = vrot.slane %v3354_v13, %v11669_v44  ;;  %10978 = vpow2.f32 %v3562_v23  ;;  %v3570_v56 = vmul.f32 1.442695, %v3530_v50  ;;  %v14220_v23 = vld [vmem:[#allocation31_spill] sm:$0xff] }
 0x58c   :  { %v3453_v6 = vrot.slane %v3354_v13, %v11672_v46  ;;  %v3457_v34 = vrot.slane %v3354_v13, %v11675_v47  ;;  %10980 = vpow2.f32 %v3564_v20  ;;  %v3572_v14 = vmul.f32 1.442695, %v3531_v27 }
 0x58d   :  { %v3538_v25 = vsub.f32 %v12176_v4, %v3429_v19  ;;  %v3539_v10 = vsub.f32 %v12172_v40, %v3433_v18  ;;  %10982 = vpow2.f32 %v3566_v41  ;;  %v3574_v36 = vmul.f32 1.442695, %v3532_v33 }
 0x58e   :  { %v3540_v58 = vsub.f32 %v12180_v17, %v3437_v49  ;;  %v3541_v0 = vsub.f32 %v12186_v12, %v3441_v11  ;;  %10984 = vpow2.f32 %v3568_v38  ;;  %v3576_v24 = vmul.f32 1.442695, %v3533_v1  ;;  %v14221_v11 = vld [vmem:[#allocation30_spill] sm:$0xff] }
 0x58f   :  { %v3542_v22 = vsub.f32 %v12190_v37, %v3445_v2  ;;  %v3543_v55 = vsub.f32 %v12194_v21, %v3449_v43  ;;  %10986 = vpow2.f32 %v3570_v56  ;;  %v3578_v52 = vmul.f32 1.442695, %v3534_v29 }
 0x590   :  { %v3544_v4 = vsub.f32 %v12200_v3, %v3453_v6  ;;  %v3545_v40 = vsub.f32 %v12259_v61, %v3457_v34  ;;  %10988 = vpow2.f32 %v3572_v14  ;;  %v3580_v5 = vmul.f32 1.442695, %v3535_v26 }
 0x591   :  { %v12350_v59 = vpop.eup %10970  ;;  %v3461_v17 = vrot.slane %v12344_v54, %v11442_v31  ;;  %v3465_v12 = vrot.slane %v12344_v54, %v11445_v32  ;;  %10990 = vpow2.f32 %v3574_v36  ;;  %v3582_v37 = vmul.f32 1.442695, %v3536_v51 }
 0x592   :  { %v12356_v7 = vpop.eup %10972  ;;  %v3469_v21 = vrot.slane %v12344_v54, %v11461_v45  ;;  %v3473_v3 = vrot.slane %v12344_v54, %v11663_v39  ;;  %10992 = vpow2.f32 %v3576_v24  ;;  %v3584_v61 = vmul.f32 1.442695, %v3537_v8 }
 0x593   :  { %v12362_v35 = vpop.eup %10974  ;;  %v3477_v16 = vrot.slane %v12344_v54, %v11666_v42  ;;  %v3650_v60 = vcombine.low %v12350_v59, %v12356_v7  ;;  %10994 = vpow2.f32 %v3578_v52  ;;  %v3586_v50 = vmul.f32 1.442695, %v3538_v25 }
 0x594   :  { %v12368_v57 = vpop.eup %10976  ;;  %v3481_v48 = vrot.slane %v12344_v54, %v11669_v44  ;;  %v3485_v9 = vrot.slane %v12344_v54, %v11672_v46  ;;  %10996 = vpow2.f32 %v3580_v5  ;;  %v3588_v27 = vmul.f32 1.442695, %v3539_v10  ;;  %v14222_v10 = vld [vmem:[#allocation32_spill] sm:$0xff] }
 0x595   :  { %v12374_v33 = vpop.eup %10978  ;;  %v3651_v1 = vcombine.low %v12362_v35, %v12368_v57  ;;  %v3660_v13 = vrot.slane %v3650_v60, %v11493_v62  ;;  %10998 = vpow2.f32 %v3582_v37  ;;  %v3590_v15 = vmul.f32 1.442695, %v3540_v58  ;;  %v14223_v58 = vld [vmem:[#allocation33_spill] sm:$0xff] }
 0x596   :  { %v12379_v29 = vpop.eup %10980  ;;  %v3489_v26 = vrot.slane %v12344_v54, %v11675_v47  ;;  %v3546_v51 = vsub.f32 %v14220_v23, %v3461_v17  ;;  %11000 = vpow2.f32 %v3584_v61  ;;  %v3592_v8 = vmul.f32 1.442695, %v3541_v0 }
 0x597   :  { %v12384_v20 = vpop.eup %10982  ;;  %v3652_v19 = vcombine.low %v12374_v33, %v12379_v29  ;;  %v3667_v18 = vrot.slane %v3651_v1, %v11493_v62  ;;  %11002 = vpow2.f32 %v3586_v50  ;;  %v3594_v41 = vmul.f32 1.442695, %v3542_v22 }
 0x598   :  { %v12389_v49 = vpop.eup %10984  ;;  %v3547_v38 = vsub.f32 %v14221_v11, %v3465_v12  ;;  %11004 = vpow2.f32 %v3588_v27  ;;  %v3596_v2 = vmul.f32 1.442695, %v3543_v55  ;;  %v3598_v43 = vmul.f32 1.442695, %v3544_v4 }
 0x599   :  { %v12392_v56 = vpop.eup %10986  ;;  %v3653_v6 = vcombine.low %v12384_v20, %v12389_v49  ;;  %v3674_v34 = vrot.slane %v3652_v19, %v11493_v62  ;;  %v3682_v14 = vcombine.low %v3660_v13, %v3667_v18  ;;  %11006 = vpow2.f32 %v3590_v15 }
 0x59a   :  { %v12397_v25 = vpop.eup %10988  ;;  %v3548_v36 = vsub.f32 %v14222_v10, %v3469_v21  ;;  %v3549_v0 = vsub.f32 %v14223_v58, %v3473_v3  ;;  %11008 = vpow2.f32 %v3592_v8  ;;  %v3600_v54 = vmul.f32 1.442695, %v3545_v40 }
 0x59b   :  { %v12401_v24 = vpop.eup %10990  ;;  %v3681_v22 = vrot.slane %v3653_v6, %v11493_v62  ;;  %v3699_v55 = vcombine.low %v12392_v56, %v12397_v25  ;;  %11010 = vpow2.f32 %v3594_v41  ;;  %v3602_v52 = vmul.f32 1.442695, %v3546_v51 }
 0x59c   :  { %v12406_v4 = vpop.eup %10992  ;;  %v3550_v5 = vsub.f32 %v12224_v28, %v3477_v16  ;;  %v3690_v17 = vrot.slane %v3682_v14, %v11493_v62  ;;  %11012 = vpow2.f32 %v3596_v2  ;;  %v3604_v12 = vmul.f32 1.442695, %v3547_v38 }
 0x59d   :  { %v12410_v37 = vpop.eup %10994  ;;  %v3683_v40 = vcombine.low %v3674_v34, %v3681_v22  ;;  %v3700_v21 = vcombine.low %v12401_v24, %v12406_v4  ;;  %v3709_v3 = vrot.slane %v3699_v55, %v11493_v62  ;;  %11014 = vpow2.f32 %v3598_v43 }
 0x59e   :  { %v12415_v61 = vpop.eup %10996  ;;  %v3551_v60 = vsub.f32 %v12232_v63, %v3481_v48  ;;  %v3552_v50 = vsub.f32 %v12236_v53, %v3485_v9  ;;  %11016 = vpow2.f32 %v3600_v54  ;;  %v3606_v28 = vmul.f32 1.442695, %v3548_v36 }
 0x59f   :  { %v12419_v16 = vpop.eup %10998  ;;  %v3697_v27 = vrot.slane %v3683_v40, %v11493_v62  ;;  %v3701_v1 = vcombine.low %v12410_v37, %v12415_v61  ;;  %v3716_v13 = vrot.slane %v3700_v21, %v11493_v62  ;;  %11018 = vpow2.f32 %v3602_v52 }
 0x5a0   :  { %v12425_v15 = vpop.eup %11000  ;;  %v3553_v23 = vsub.f32 %v12272_v30, %v3489_v26  ;;  %11020 = vpow2.f32 %v3604_v12  ;;  %v3608_v63 = vmul.f32 1.442695, %v3549_v0  ;;  %v3610_v48 = vmul.f32 1.442695, %v3550_v5 }
 0x5a1   :  { %v12428_v53 = vpop.eup %11002  ;;  %v3698_v9 = vcombine.low %v3690_v17, %v3697_v27  ;;  %v3702_v51 = vcombine.low %v12419_v16, %v12425_v15  ;;  %v3723_v8 = vrot.slane %v3701_v1, %v11493_v62  ;;  %v3731_v19 = vcombine.low %v3709_v3, %v3716_v13 }
 0x5a2   :  { %v12433_v18 = vpop.eup %11004  ;;  %11022 = vpow2.f32 %v3606_v28  ;;  %v3612_v41 = vmul.f32 1.442695, %v3551_v60  ;;  %v3614_v2 = vmul.f32 1.442695, %v3552_v50  ;;  %v3616_v34 = vmul.f32 1.442695, %v3553_v23 }
 0x5a3   :  { %v12435_v11 = vpop.eup %11006  ;;  %v3850_v30 = vsel %vm1158_vm3, %v3698_v9, 0.0  ;;  %v3730_v26 = vrot.slane %v3702_v51, %v11493_v62  ;;  %v3748_v38 = vcombine.low %v12428_v53, %v12433_v18  ;;  %v3739_v6 = vrot.slane %v3731_v19, %v11493_v62 }
 0x5a4   :  { %v12441_v43 = vpop.eup %11008  ;;  %3851 = vadd.xlane.f32.xlu1 %v3850_v30  ;;  %11024 = vpow2.f32 %v3608_v63 }
 0x5a5   :  { %v12444_v14 = vpop.eup %11010  ;;  %v3732_v10 = vcombine.low %v3723_v8, %v3730_v26  ;;  %v3749_v36 = vcombine.low %v12435_v11, %v12441_v43  ;;  %v3758_v58 = vrot.slane %v3748_v38, %v11493_v62  ;;  %11026 = vpow2.f32 %v3610_v48 }
 0x5a6   :  { %v12449_v0 = vpop.eup %11012  ;;  %11028 = vpow2.f32 %v3612_v41 }
 0x5a7   :  { %v12451_v54 = vpop.eup %11014  ;;  %v3746_v22 = vrot.slane %v3732_v10, %v11493_v62  ;;  %v3750_v55 = vcombine.low %v12444_v14, %v12449_v0  ;;  %v3765_v52 = vrot.slane %v3749_v36, %v11493_v62  ;;  %11030 = vpow2.f32 %v3614_v2 }
 0x5a8   :  { %v12457_v5 = vpop.eup %11016  ;;  %11032 = vpow2.f32 %v3616_v34 }
 0x5a9   :  { %v12459_v17 = vpop.eup %11018  ;;  %v3747_v12 = vcombine.low %v3739_v6, %v3746_v22  ;;  %v3751_v40 = vcombine.low %v12451_v54, %v12457_v5  ;;  %v3772_v21 = vrot.slane %v3750_v55, %v11493_v62  ;;  %v3780_v3 = vcombine.low %v3758_v58, %v3765_v52 }
 0x5aa   :  { %v12464_v60 = vpop.eup %11020 }
 0x5ab   :  { %v3853_v50 = vsel %vm1158_vm3, %v3747_v12, 0.0  ;;  %v3779_v28 = vrot.slane %v3751_v40, %v11493_v62  ;;  %v3797_v27 = vcombine.low %v12459_v17, %v12464_v60  ;;  %v3788_v23 = vrot.slane %v3780_v3, %v11493_v62  ;;  %v14231_v3 = vld [vmem:[#allocation12_spill] sm:$0xff] }
 0x5ac   :  { %v12470_v1 = vpop.eup %11022  ;;  %3854 = vadd.xlane.f32.xlu0 %v3853_v50  ;;  %v14232_v50 = vld [vmem:[#allocation19_spill] sm:$0xff] }
 0x5ad   :  { %14224 = vst [vmem:[#allocation31_spill] sm:$0xff] %v12470_v1  ;;  %v3781_v13 = vcombine.low %v3772_v21, %v3779_v28  ;;  %v3807_v8 = vrot.slane %v3797_v27, %v11493_v62  ;;  %v14230_v21 = vld [vmem:[#allocation13_spill] sm:$0xff]  ;;  %v14233_v28 = vld [vmem:[#allocation24_spill] sm:$0xff]  ;;  %v1671_v27 = vpop.xlane.xlu0 %1670 }
 0x5ae   :  { %v12473_v63 = vpop.eup %11024  ;;  %11034 = vrcp.f32 %v1671_v27 }
 0x5af   :  { %14225 = vst [vmem:[#allocation30_spill] sm:$0xff] %v12473_v63  ;;  %v12475_v48 = vpop.eup %11026  ;;  %v3795_v9 = vrot.slane %v3781_v13, %v11493_v62  ;;  %v3798_v51 = vcombine.low %v12470_v1, %v12473_v63 }
 0x5b0   :  { %14226 = vst [vmem:[#allocation32_spill] sm:$0xff] %v12475_v48  ;;  %v12481_v19 = vpop.eup %11028 }
 0x5b1   :  { %14227 = vst [vmem:[#allocation33_spill] sm:$0xff] %v12481_v19  ;;  %v12483_v41 = vpop.eup %11030  ;;  %v3796_v30 = vcombine.low %v3788_v23, %v3795_v9  ;;  %v3799_v26 = vcombine.low %v12475_v48, %v12481_v19  ;;  %v3814_v38 = vrot.slane %v3798_v51, %v11493_v62 }
 0x5b2   :  { %14228 = vst [vmem:[#allocation34_spill] sm:$0xff] %v12483_v41  ;;  %v12488_v2 = vpop.eup %11032 }
 0x5b3   :  { %14229 = vst [vmem:[#allocation35_spill] sm:$0xff] %v12488_v2  ;;  %v3856_v6 = vsel %vm1158_vm3, %v3796_v30, 0.0  ;;  %v3800_v34 = vcombine.low %v12483_v41, %v12488_v2  ;;  %v3821_v10 = vrot.slane %v3799_v26, %v11493_v62  ;;  %v3829_v36 = vcombine.low %v3807_v8, %v3814_v38  ;;  %v14241_v2 = vld [vmem:[#allocation28_spill] sm:$0xff] }
 0x5b4   :  { %3857 = vadd.xlane.f32.xlu1 %v3856_v6 }
 0x5b5   :  { %v3828_v58 = vrot.slane %v3800_v34, %v11493_v62  ;;  %v3837_v55 = vrot.slane %v3829_v36, %v11493_v62  ;;  %v14234_v34 = vld [vmem:[#allocation20_spill] sm:$0xff]  ;;  %v14235_v36 = vld [vmem:[#allocation21_spill] sm:$0xff] }
 0x5b7   :  { %v3830_v22 = vcombine.low %v3821_v10, %v3828_v58 }
 0x5b8   :  { %v11035_v13 = vpop.eup %11034 }
 0x5b9   :  { %v3844_v52 = vrot.slane %v3830_v22, %v11493_v62  ;;  %v1750_v23 = vrot.slane %v11035_v13, %v11442_v31  ;;  %v1754_v9 = vrot.slane %v11035_v13, %v11445_v32  ;;  %v1758_v51 = vrot.slane %v11035_v13, %v11461_v45  ;;  %v14236_v22 = vld [vmem:[#allocation22_spill] sm:$0xff] }
 0x5ba   :  { %v1762_v8 = vrot.slane %v11035_v13, %v11663_v39  ;;  %v1766_v30 = vrot.slane %v11035_v13, %v11666_v42  ;;  %v1770_v26 = vrot.slane %v11035_v13, %v11669_v44  ;;  %v1774_v38 = vrot.slane %v11035_v13, %v11672_v46 }
 0x5bb   :  { %v3845_v12 = vcombine.low %v3837_v55, %v3844_v52  ;;  %v1778_v6 = vrot.slane %v11035_v13, %v11675_v47  ;;  %v1859_v10 = vmul.f32 %v14234_v34, %v1750_v23  ;;  %v1860_v58 = vmul.f32 %v14235_v36, %v1754_v9  ;;  %v14237_v52 = vld [vmem:[#allocation23_spill] sm:$0xff] }
 0x5bc   :  { %v1861_v55 = vmul.f32 %v14236_v22, %v1758_v51 }
 0x5bd   :  { %v3859_v40 = vsel %vm1158_vm3, %v3845_v12, 0.0  ;;  %v1862_v12 = vmul.f32 %v14237_v52, %v1762_v8  ;;  %v1866_v41 = vmul.f32 %v14241_v2, %v1778_v6  ;;  %v2145_v19 = vcombine.low %v1859_v10, %v1860_v58 }
 0x5be   :  { %3860 = vadd.xlane.f32.xlu0 %v3859_v40  ;;  %v14238_v40 = vld [vmem:[#allocation25_spill] sm:$0xff] }
 0x5bf   :  { %v2146_v48 = vcombine.low %v1861_v55, %v1862_v12  ;;  %v2155_v23 = vrot.slane %v2145_v19, %v11493_v62 }
 0x5c1   :  { %v2162_v9 = vrot.slane %v2146_v48, %v11493_v62 }
 0x5c5   :  { %2194 = vrot.lane.b32.xlu1 %v14230_v21, %s11302_s23  ;;  %v1863_v21 = vmul.f32 %v14238_v40, %v1766_v30  ;;  %v2177_v30 = vcombine.low %v2155_v23, %v2162_v9 }
 0x5c7   :  { %v2185_v2 = vrot.slane %v2177_v30, %v11493_v62 }
 0x5c9   :  { %4381 = vrot.lane.b32.xlu1 %v14231_v3, %s11302_s23 }
 0x5cd   :  { %4513 = vrot.lane.b32.xlu1 %v14231_v3, %s11312_s14 }
 0x5d4   :  { %4249 = vrot.lane.b32.xlu0 %v14231_v3, %s11311_s3  ;;  %v14239_v3 = vld [vmem:[#allocation26_spill] sm:$0xff] }
 0x5d8   :  { %2402 = vrot.lane.b32.xlu0 %v14232_v50, %s11312_s14  ;;  %v1864_v50 = vmul.f32 %v14239_v3, %v1770_v26 }
 0x5da   :  { %v2147_v63 = vcombine.low %v1863_v21, %v1864_v50 }
 0x5dc   :  { %2410 = vrot.lane.b32.xlu0 %v14233_v28, %s11311_s3  ;;  %v14240_v28 = vld [vmem:[#allocation27_spill] sm:$0xff]  ;;  %v2169_v51 = vrot.slane %v2147_v63, %v11493_v62 }
 0x5dd   :  { %v1865_v27 = vmul.f32 %v14240_v28, %v1774_v38 }
 0x5df   :  { %v2148_v13 = vcombine.low %v1865_v27, %v1866_v41 }
 0x5e1   :  { %v2176_v8 = vrot.slane %v2148_v13, %v11493_v62 }
 0x5e3   :  { %v2178_v26 = vcombine.low %v2169_v51, %v2176_v8 }
 0x5e5   :  { %v2192_v6 = vrot.slane %v2178_v26, %v11493_v62 }
 0x631   :  { %v3852_v1 = vpop.xlane.xlu1 %3851 }
 0x632   :  { %11036 = vrcp.f32 %v3852_v1 }
 0x639   :  { %v3855_v34 = vpop.xlane.xlu0 %3854 }
 0x63a   :  { %11038 = vrcp.f32 %v3855_v34 }
 0x63c   :  { %v11037_v38 = vpop.eup %11036 }
 0x63d   :  { %v3873_v41 = vrot.slane %v11037_v38, %v11442_v31  ;;  %v3877_v1 = vrot.slane %v11037_v38, %v11445_v32  ;;  %v3881_v19 = vrot.slane %v11037_v38, %v11461_v45  ;;  %v3885_v48 = vrot.slane %v11037_v38, %v11663_v39 }
 0x63e   :  { %v3889_v63 = vrot.slane %v11037_v38, %v11666_v42  ;;  %v3893_v10 = vrot.slane %v11037_v38, %v11669_v44  ;;  %v3897_v36 = vrot.slane %v11037_v38, %v11672_v46  ;;  %v3901_v58 = vrot.slane %v11037_v38, %v11675_v47 }
 0x63f   :  { %v4030_v22 = vmul.f32 %v12350_v59, %v3873_v41  ;;  %v4031_v55 = vmul.f32 %v12356_v7, %v3877_v1  ;;  %v4032_v52 = vmul.f32 %v12362_v35, %v3881_v19  ;;  %v4033_v12 = vmul.f32 %v12368_v57, %v3885_v48 }
 0x640   :  { %v4034_v40 = vmul.f32 %v12374_v33, %v3889_v63  ;;  %v4035_v21 = vmul.f32 %v12379_v29, %v3893_v10  ;;  %v4036_v3 = vmul.f32 %v12384_v20, %v3897_v36  ;;  %v4037_v50 = vmul.f32 %v12389_v49, %v3901_v58 }
 0x641   :  { %v3858_v28 = vpop.xlane.xlu1 %3857  ;;  %v4070_v27 = vcombine.low %v4030_v22, %v4031_v55  ;;  %v4071_v13 = vcombine.low %v4032_v52, %v4033_v12  ;;  %v12550_v57 = vcombine.low %v2185_v2, %v2192_v6  ;;  %v14243_v58 = vmov 0.0  }
 0x642   :  { %11040 = vrcp.f32 %v3858_v28  ;;  %v4072_v23 = vcombine.low %v4034_v40, %v4035_v21  ;;  %v4073_v59 = vcombine.low %v4036_v3, %v4037_v50 }
 0x643   :  { %v4080_v7 = vrot.slane %v4070_v27, %v11493_v62  ;;  %v4087_v35 = vrot.slane %v4071_v13, %v11493_v62  ;;  %14242 = vst [vmem:[#allocation13_spill] sm:$0xff] %v12550_v57 }
 0x644   :  { %v11039_v9 = vpop.eup %11038  ;;  %v4094_v33 = vrot.slane %v4072_v23, %v11493_v62  ;;  %v4101_v29 = vrot.slane %v4073_v59, %v11493_v62 }
 0x645   :  { %v2195_v20 = vpop.permute.xlu1 %2194  ;;  %v4102_v51 = vcombine.low %v4080_v7, %v4087_v35  ;;  %v3905_v49 = vrot.slane %v11039_v9, %v11442_v31  ;;  %v3909_v8 = vrot.slane %v11039_v9, %v11445_v32  ;;  %v3913_v30 = vrot.slane %v11039_v9, %v11461_v45 }
 0x646   :  { %10493 = vmatpush3.msra.mxu0 %v2195_v20  ;;  %v4103_v26 = vcombine.low %v4094_v33, %v4101_v29  ;;  %v3917_v34 = vrot.slane %v11039_v9, %v11663_v39  ;;  %v3921_v38 = vrot.slane %v11039_v9, %v11666_v42  ;;  %v3925_v2 = vrot.slane %v11039_v9, %v11669_v44 }
 0x647   :  { %10495 = vmatmul.mubr.msk.f32.vlgmr.msra.gmra.mrb[4].mxu0 %vm1158_vm3, %v12550_v57  ;;  %v4110_v6 = vrot.slane %v4102_v51, %v11493_v62  ;;  %v3929_v41 = vrot.slane %v11039_v9, %v11672_v46  ;;  %v3933_v1 = vrot.slane %v11039_v9, %v11675_v47  ;;  %v4038_v19 = vmul.f32 %v12392_v56, %v3905_v49 }
 0x648   :  { %v4117_v48 = vrot.slane %v4103_v26, %v11493_v62  ;;  %v4039_v63 = vmul.f32 %v12397_v25, %v3909_v8  ;;  %v4040_v10 = vmul.f32 %v12401_v24, %v3913_v30  ;;  %v4041_v36 = vmul.f32 %v12406_v4, %v3917_v34  ;;  %10502 = vmatprep.subr.bf16.mxu0 %v14243_v58 }
 0x649   :  { %v4042_v22 = vmul.f32 %v12410_v37, %v3921_v38  ;;  %v4043_v55 = vmul.f32 %v12415_v61, %v3925_v2  ;;  %v4044_v52 = vmul.f32 %v12419_v16, %v3929_v41  ;;  %v4045_v12 = vmul.f32 %v12425_v15, %v3933_v1  ;;  %10518 = vmatprep.mubr.msk.bf16.mxu0 %vm11310_vm0, %v14243_v58 }
 0x64a   :  { %v12577_v56 = vcombine.low %v4110_v6, %v4117_v48  ;;  %v4199_v25 = vcombine.low %v4038_v19, %v4039_v63  ;;  %v4200_v40 = vcombine.low %v4040_v10, %v4041_v36  ;;  %v4382_v48 = vpop.permute.xlu1 %4381 }
 0x64b   :  { %v3861_v24 = vpop.xlane.xlu0 %3860  ;;  %v4201_v21 = vcombine.low %v4042_v22, %v4043_v55  ;;  %v4202_v4 = vcombine.low %v4044_v52, %v4045_v12 }
 0x64c   :  { %14244 = vst [vmem:[#allocation12_spill] sm:$0xff] %v12577_v56  ;;  %v11041_v3 = vpop.eup %11040  ;;  %11042 = vrcp.f32 %v3861_v24  ;;  %10545 = vmatmul.mubr.msk.f32.vlgmr.msra.gmra.mrb[26].mxu1 %vm1158_vm3, %v12577_v56  ;;  %v4209_v37 = vrot.slane %v4199_v25, %v11493_v62  ;;  %v4216_v61 = vrot.slane %v4200_v40, %v11493_v62 }
 0x64d   :  { %10549 = vmatprep.mubr.msk.f32.mxu1 %vm11310_vm0, %v14243_v58  ;;  %v4223_v16 = vrot.slane %v4201_v21, %v11493_v62  ;;  %v4230_v15 = vrot.slane %v4202_v4, %v11493_v62  ;;  %v3937_v50 = vrot.slane %v11041_v3, %v11442_v31  ;;  %v3941_v28 = vrot.slane %v11041_v3, %v11445_v32 }
 0x64e   :  { %v4231_v27 = vcombine.low %v4209_v37, %v4216_v61  ;;  %v3945_v13 = vrot.slane %v11041_v3, %v11461_v45  ;;  %v3949_v23 = vrot.slane %v11041_v3, %v11663_v39  ;;  %v3953_v59 = vrot.slane %v11041_v3, %v11666_v42  ;;  %v14246_v37 = vld [vmem:[#allocation31_spill] sm:$0xff] }
 0x64f   :  { %v4250_v7 = vpop.permute.xlu0 %4249  ;;  %v4232_v35 = vcombine.low %v4223_v16, %v4230_v15  ;;  %v3957_v9 = vrot.slane %v11041_v3, %v11669_v44  ;;  %v3961_v33 = vrot.slane %v11041_v3, %v11672_v46  ;;  %v3965_v29 = vrot.slane %v11041_v3, %v11675_v47  ;;  %v14247_v16 = vld [vmem:[#allocation30_spill] sm:$0xff] }
 0x650   :  { %10548 = vmatpush3.msra.mxu1 %v4250_v7  ;;  %v4239_v20 = vrot.slane %v4231_v27, %v11493_v62  ;;  %v4046_v51 = vmul.f32 %v12428_v53, %v3937_v50  ;;  %v4047_v49 = vmul.f32 %v12433_v18, %v3941_v28  ;;  %v4048_v8 = vmul.f32 %v12435_v11, %v3945_v13  ;;  %v14248_v50 = vld [vmem:[#allocation32_spill] sm:$0xff]  ;;  %v14249_v27 = vld [vmem:[#allocation33_spill] sm:$0xff]  ;;  %v14251_v7 = vld [vmem:[#allocation35_spill] sm:$0xff] }
 0x651   :  { %10552 = vmatprep.subr.mxu1 %v14243_v58  ;;  %v4246_v30 = vrot.slane %v4232_v35, %v11493_v62  ;;  %v4049_v26 = vmul.f32 %v12441_v43, %v3949_v23  ;;  %v4050_v34 = vmul.f32 %v12444_v14, %v3953_v59  ;;  %v4051_v38 = vmul.f32 %v12449_v0, %v3957_v9  ;;  %v14250_v23 = vld [vmem:[#allocation34_spill] sm:$0xff] }
 0x652   :  { %v4052_v2 = vmul.f32 %v12451_v54, %v3961_v33  ;;  %v4053_v6 = vmul.f32 %v12457_v5, %v3965_v29  ;;  %v4332_v41 = vcombine.low %v4046_v51, %v4047_v49  ;;  %v4514_v51 = vpop.permute.xlu1 %4513 }
 0x653   :  { %v12606_v53 = vcombine.low %v4239_v20, %v4246_v30  ;;  %v4333_v18 = vcombine.low %v4048_v8, %v4049_v26  ;;  %v4334_v1 = vcombine.low %v4050_v34, %v4051_v38 }
 0x654   :  { %v4335_v11 = vcombine.low %v4052_v2, %v4053_v6  ;;  %v4342_v19 = vrot.slane %v4332_v41, %v11493_v62  ;;  %v14254_v41 = vmov 0  }
 0x655   :  { %14245 = vst [vmem:[#allocation19_spill] sm:$0xff] %v12606_v53  ;;  %10550 = vmatmul.mubr.msk.f32.vlgmr.msra.gmra.mrb[28].mxu1 %vm1158_vm3, %v12606_v53  ;;  %v4349_v43 = vrot.slane %v4333_v18, %v11493_v62  ;;  %v4356_v14 = vrot.slane %v4334_v1, %v11493_v62  ;;  %v10772_v18 = vld [vmem:[#allocation5] sm:$0xff]   ;;  %v10773_v1 = vld [vmem:[#allocation5 + $0x8] sm:$0xff]  }
 0x656   :  { %v11043_v0 = vpop.eup %11042  ;;  %10553 = vmatpush3.msra.mxu1 %v4382_v48  ;;  %10554 = vmatprep.mubr.msk.f32.mxu1 %vm11310_vm0, %v14243_v58  ;;  %v4363_v54 = vrot.slane %v4335_v11, %v11493_v62  ;;  %v10774_v11 = vld [vmem:[#allocation5 + $0x10] sm:$0xff]   ;;  %v10776_v48 = vld [vmem:[#allocation5 + $0x20] sm:$0xff]  }
 0x657   :  { %10557 = vmatprep.subr.mxu1 %v14243_v58  ;;  %v4364_v5 = vcombine.low %v4342_v19, %v4349_v43  ;;  %v3969_v63 = vrot.slane %v11043_v0, %v11442_v31  ;;  %v3973_v10 = vrot.slane %v11043_v0, %v11445_v32  ;;  %v3977_v36 = vrot.slane %v11043_v0, %v11461_v45  ;;  %v10775_v19 = vld [vmem:[#allocation5 + $0x18] sm:$0xff]   ;;  %v10777_v43 = vld [vmem:[#allocation5 + $0x28] sm:$0xff]  }
 0x658   :  { %v4365_v22 = vcombine.low %v4356_v14, %v4363_v54  ;;  %v3981_v55 = vrot.slane %v11043_v0, %v11663_v39  ;;  %v3985_v52 = vrot.slane %v11043_v0, %v11666_v42  ;;  %v3989_v12 = vrot.slane %v11043_v0, %v11669_v44  ;;  %10503 = vmatpush3.bf16.msra.mxu0 %v10772_v18  ;;  %v10778_v14 = vld [vmem:[#allocation5 + $0x30] sm:$0xff]  }
 0x659   :  { %v4372_v25 = vrot.slane %v4364_v5, %v11493_v62  ;;  %v3993_v40 = vrot.slane %v11043_v0, %v11672_v46  ;;  %v3997_v24 = vrot.slane %v11043_v0, %v11675_v47  ;;  %v4054_v21 = vmul.f32 %v12459_v17, %v3969_v63  ;;  %10504 = vmatprep.subr.bf16.mxu0 %v14243_v58  ;;  %v10779_v0 = vld [vmem:[#allocation5 + $0x38] sm:$0xff]  }
 0x65a   :  { %v4379_v4 = vrot.slane %v4365_v22, %v11493_v62  ;;  %v4055_v3 = vmul.f32 %v12464_v60, %v3973_v10  ;;  %v4056_v61 = vmul.f32 %v14246_v37, %v3977_v36  ;;  %v4057_v15 = vmul.f32 %v14247_v16, %v3981_v55 }
 0x65b   :  { %v4058_v28 = vmul.f32 %v14248_v50, %v3985_v52  ;;  %v4059_v13 = vmul.f32 %v14249_v27, %v3989_v12  ;;  %v4060_v59 = vmul.f32 %v14250_v23, %v3993_v40  ;;  %v4061_v35 = vmul.f32 %v14251_v7, %v3997_v24  ;;  %v2403_v40 = vpop.permute.xlu0 %2402  ;;  %v14255_v24 = vld [vmem:[#allocation18_spill] sm:$0xff] }
 0x65c   :  { %v12635_v9 = vcombine.low %v4372_v25, %v4379_v4  ;;  %v4464_v33 = vcombine.low %v4054_v21, %v4055_v3  ;;  %v4465_v17 = vcombine.low %v4056_v61, %v4057_v15  ;;  %10505 = vmatpush3.bf16.msra.mxu0 %v10773_v1  ;;  %v2413_v21 = vsel %vm349_vm1, %v14255_v24, %v2403_v40  ;;  %v12683_v7 = vld [vmem:[%s14138_s6] sm:$0x3f]  ;;  %v10795_v24 = vld [vmem:[%s14136_s4 + $0x50] ss:$8 sps:$4 sm:$0xff]  }
 0x65d   :  { %v4466_v29 = vcombine.low %v4058_v28, %v4059_v13  ;;  %v4467_v20 = vcombine.low %v4060_v59, %v4061_v35  ;;  %10506 = vmatprep.subr.bf16.mxu0 %v14243_v58  ;;  %v4660_v35 = vrot.slane %v12683_v7, %v11442_v31  ;;  %v10792_v40 = vld [vmem:[%s14136_s4 + $0x40] ss:$8 sps:$4 sm:$0xff]  }
 0x65e   :  { %14252 = vst [vmem:[#allocation24_spill] sm:$0xff] %v12635_v9  ;;  %10555 = vmatmul.mubr.msk.f32.vlgmr.msra.gmra.mrb[30].mxu1 %vm1158_vm3, %v12635_v9  ;;  %v4474_v60 = vrot.slane %v4464_v33, %v11493_v62  ;;  %v4481_v49 = vrot.slane %v4465_v17, %v11493_v62  ;;  %v11204_v33 = vld [vmem:[%s14132_s0] sm:$0xff] }
 0x65f   :  { %10558 = vmatpush3.msra.mxu1 %v4514_v51  ;;  %10559 = vmatprep.mubr.msk.f32.mxu1 %vm11310_vm0, %v14243_v58  ;;  %v4488_v8 = vrot.slane %v4466_v29, %v11493_v62  ;;  %v4495_v30 = vrot.slane %v4467_v20, %v11493_v62  ;;  %v2411_v3 = vpop.permute.xlu0 %2410  ;;  %v4661_v17 = vadd.f32 %v11204_v33, %v4660_v35  ;;  %v10813_v33 = vld [vmem:[#allocation7 + $0x20] sm:$0xff]  }
 0x660   :  { %v4496_v26 = vcombine.low %v4474_v60, %v4481_v49  ;;  %10507 = vmatpush3.bf16.msra.mxu0 %v10774_v11 }
 0x661   :  { %v4497_v34 = vcombine.low %v4488_v8, %v4495_v30  ;;  %10508 = vmatprep.subr.bf16.mxu0 %v14243_v58  ;;  %v11205_v8 = vld [vmem:[%s14132_s0 + $0x8] sm:$0xff] }
 0x662   :  { %v4504_v38 = vrot.slane %v4496_v26, %v11493_v62  ;;  %v4662_v30 = vadd.f32 %v11205_v8, %v4660_v35  ;;  %v10812_v35 = vld [vmem:[#allocation7 + $0x60] sm:$0xff]  }
 0x663   :  { %v4511_v2 = vrot.slane %v4497_v34, %v11493_v62 }
 0x664   :  { %10509 = vmatpush3.bf16.msra.mxu0 %v10775_v19 }
 0x665   :  { %v12647_v6 = vcombine.low %v4504_v38, %v4511_v2  ;;  %10510 = vmatprep.subr.bf16.mxu0 %v14243_v58 }
 0x667   :  { %14253 = vst [vmem:[#allocation20_spill] sm:$0xff] %v12647_v6  ;;  %10560 = vmatmul.mubr.msk.f32.vlgmr.msra.gmra.mrb[32].mxu1 %vm1158_vm3, %v12647_v6 }
 0x668   :  { %4840 = vmatprep.mubr.bf16.mxu1 %v14254_v41  ;;  %10511 = vmatpush3.bf16.msra.mxu0 %v10776_v48 }
 0x669   :  { %10512 = vmatprep.subr.bf16.mxu0 %v14243_v58 }
 0x66c   :  { %10513 = vmatpush3.bf16.msra.mxu0 %v10777_v43 }
 0x66d   :  { %10514 = vmatprep.subr.bf16.mxu0 %v14243_v58 }
 0x670   :  { %10515 = vmatpush3.bf16.msra.mxu0 %v10778_v14 }
 0x671   :  { %10516 = vmatprep.subr.bf16.mxu0 %v14243_v58 }
 0x674   :  { %10517 = vmatpush3.bf16.msra.mxu0 %v10779_v0 }
 0x675   :  { %10562 = vmatprep.subr.bf16.mxu0 %v14243_v58 }
 0x71a   :  { %v2265_v54 = vpop.f32.mrb[4].mxu0 }
 0x71b   :  { %2406 = vrot.lane.b32.xlu1 %v2265_v54, %s11302_s23  ;;  %v10496_v5 = vpop.f32.mrb[5].mxu0  ;;  %v10780_v54 = vld [vmem:[%s14136_s4] ss:$8 sps:$4 sm:$0xff]  }
 0x71c   :  { %v10782_v5 = vld [vmem:[%s14136_s4 + $0x4] ss:$8 sps:$4 sm:$0xff]  }
 0x71d   :  { %4808 = vmatprep.subr.bf16.mxu1 %v10782_v5  ;;  %v10817_v5 = vld [vmem:[#allocation7 + $0x30] sm:$0xff]  }
 0x71e   :  { %4809 = vmatpush1.bf16.msra.mxu1 %v10780_v54  ;;  %v10815_v54 = vld [vmem:[#allocation7 + $0x28] sm:$0xff]  }
 0x71f   :  { %v4187_v63 = vpop.f32.mrb[26].mxu1 }
 0x720   :  { %v10546_v10 = vpop.f32.mrb[27].mxu1 }
 0x721   :  { %v10785_v10 = vld [vmem:[%s14136_s4 + $0x14] ss:$8 sps:$4 sm:$0xff]  }
 0x722   :  { %4810 = vmatprep.subr.bf16.mxu1 %v10785_v10  ;;  %v10819_v10 = vld [vmem:[#allocation7 + $0x38] sm:$0xff]  }
 0x728   :  { %v4320_v36 = vpop.f32.mrb[28].mxu1 }
 0x729   :  { %4589 = vrot.lane.b32.xlu1 %v4320_v36, %s11312_s14  ;;  %v10551_v22 = vpop.f32.mrb[29].mxu1  ;;  %v10783_v36 = vld [vmem:[%s14136_s4 + $0x10] ss:$8 sps:$4 sm:$0xff]  }
 0x72a   :  { %v10788_v22 = vld [vmem:[%s14136_s4 + $0x24] ss:$8 sps:$4 sm:$0xff]   ;;  %4811 = vmatpush1.bf16.msra.mxu1 %v10783_v36 }
 0x72b   :  { %4812 = vmatprep.subr.bf16.mxu1 %v10788_v22 }
 0x731   :  { %v4452_v55 = vpop.f32.mrb[30].mxu1 }
 0x732   :  { %4593 = vrot.lane.b32.xlu0 %v4452_v55, %s11302_s23  ;;  %v10556_v52 = vpop.f32.mrb[31].mxu1  ;;  %v10786_v55 = vld [vmem:[%s14136_s4 + $0x20] ss:$8 sps:$4 sm:$0xff]  }
 0x733   :  { %4813 = vmatpush1.bf16.msra.mxu1 %v10786_v55  ;;  %v10791_v52 = vld [vmem:[%s14136_s4 + $0x34] ss:$8 sps:$4 sm:$0xff]  }
 0x734   :  { %4814 = vmatprep.subr.bf16.mxu1 %v10791_v52 }
 0x73a   :  { %v4584_v12 = vpop.f32.mrb[32].mxu1 }
 0x73b   :  { %4597 = vrot.lane.b32.xlu1 %v4584_v12, %s11311_s3  ;;  %v10561_v25 = vpop.f32.mrb[33].mxu1  ;;  %v10789_v12 = vld [vmem:[%s14136_s4 + $0x30] ss:$8 sps:$4 sm:$0xff]  }
 0x73c   :  { %4815 = vmatpush1.bf16.msra.mxu1 %v10789_v12  ;;  %v10794_v25 = vld [vmem:[%s14136_s4 + $0x44] ss:$8 sps:$4 sm:$0xff]  }
 0x73d   :  { %4816 = vmatprep.subr.bf16.mxu1 %v10794_v25 }
 0x740   :  { %4817 = vmatpush1.bf16.msra.mxu1 %v10792_v40 }
 0x78d   :  { %v2407_v4 = vpop.permute.xlu1 %2406 }
 0x78e   :  { %v2415_v37 = vsel %vm2414_vm5, %v2413_v21, %v2407_v4  ;;  %v10797_v21 = vld [vmem:[%s14136_s4 + $0x54] ss:$8 sps:$4 sm:$0xff]   ;;  %v10800_v4 = vld [vmem:[%s14136_s4 + $0x64] ss:$8 sps:$4 sm:$0xff]  }
 0x78f   :  { %v2417_v61 = vsel %vm2416_vm6, %v2415_v37, %v2411_v3  ;;  %4818 = vmatprep.subr.bf16.mxu1 %v10797_v21  ;;  %v10798_v3 = vld [vmem:[%s14136_s4 + $0x60] ss:$8 sps:$4 sm:$0xff]   ;;  %v10803_v37 = vld [vmem:[%s14136_s4 + $0x74] ss:$8 sps:$4 sm:$0xff]  }
 0x790   :  { %v2418_v16 = vpack.c.bf16 %v2417_v61, %v2417_v61  ;;  %4819 = vmatpush1.bf16.msra.mxu1 %v10795_v24  ;;  %v10801_v61 = vld [vmem:[%s14136_s4 + $0x70] ss:$8 sps:$4 sm:$0xff]  }
 0x791   :  { %4820 = vmatprep.subr.bf16.mxu1 %v10800_v4 }
 0x792   :  { %10519 = vmatmul.mubr.bf16.vlgmr.msra.gmra.mrb[8].mxu0 %v2418_v16  ;;  %v10804_v16 = vld [vmem:[#allocation7 + $0x40] sm:$0xff]  }
 0x793   :  { %10563 = vmatpush3.bf16.msra.mxu0 %v10772_v18  ;;  %10578 = vmatprep.mubr.msk.bf16.mxu0 %vm11310_vm0, %v14243_v58 }
 0x794   :  { %10564 = vmatprep.subr.bf16.mxu0 %v14243_v58  ;;  %4821 = vmatpush1.bf16.msra.mxu1 %v10798_v3 }
 0x795   :  { %4822 = vmatprep.subr.bf16.mxu1 %v10803_v37 }
 0x797   :  { %10565 = vmatpush3.bf16.msra.mxu0 %v10773_v1 }
 0x798   :  { %10566 = vmatprep.subr.bf16.mxu0 %v14243_v58  ;;  %4823 = vmatpush1.bf16.msra.mxu1 %v10801_v61 }
 0x79b   :  { %10567 = vmatpush3.bf16.msra.mxu0 %v10774_v11  ;;  %v4590_v15 = vpop.permute.xlu1 %4589 }
 0x79c   :  { %10568 = vmatprep.subr.bf16.mxu0 %v14243_v58  ;;  %v4600_v28 = vsel %vm349_vm1, %v4187_v63, %v4590_v15  ;;  %v10805_v15 = vld [vmem:[#allocation7] sm:$0xff]  }
 0x79f   :  { %10569 = vmatpush3.bf16.msra.mxu0 %v10775_v19 }
 0x7a0   :  { %10570 = vmatprep.subr.bf16.mxu0 %v14243_v58 }
 0x7a3   :  { %10571 = vmatpush3.bf16.msra.mxu0 %v10776_v48 }
 0x7a4   :  { %10572 = vmatprep.subr.bf16.mxu0 %v14243_v58  ;;  %v4594_v50 = vpop.permute.xlu0 %4593 }
 0x7a5   :  { %v4601_v27 = vsel %vm2414_vm5, %v4600_v28, %v4594_v50  ;;  %v10806_v50 = vld [vmem:[#allocation7 + $0x48] sm:$0xff]  }
 0x7a6   :  { %v10807_v28 = vld [vmem:[#allocation7 + $0x8] sm:$0xff]  }
 0x7a7   :  { %10573 = vmatpush3.bf16.msra.mxu0 %v10777_v43 }
 0x7a8   :  { %10574 = vmatprep.subr.bf16.mxu0 %v14243_v58 }
 0x7ab   :  { %10575 = vmatpush3.bf16.msra.mxu0 %v10778_v14 }
 0x7ac   :  { %10576 = vmatprep.subr.bf16.mxu0 %v14243_v58 }
 0x7ad   :  { %v4598_v13 = vpop.permute.xlu1 %4597 }
 0x7ae   :  { %v4602_v23 = vsel %vm2416_vm6, %v4601_v27, %v4598_v13  ;;  %v10808_v27 = vld [vmem:[#allocation7 + $0x50] sm:$0xff]  }
 0x7af   :  { %10577 = vmatpush3.bf16.msra.mxu0 %v10779_v0  ;;  %v4603_v59 = vpack.c.bf16 %v4602_v23, %v4602_v23  ;;  %v10809_v13 = vld [vmem:[#allocation7 + $0x10] sm:$0xff]   ;;  %v10810_v23 = vld [vmem:[#allocation7 + $0x58] sm:$0xff]  }
 0x7b0   :  { %10339 = vmatprep.subr.bf16.mxu0 %v10804_v16 }
 0x7b2   :  { %10579 = vmatmul.mubr.bf16.vlgmr.msra.gmra.mrb[12].mxu0 %v4603_v59  ;;  %v10811_v59 = vld [vmem:[#allocation7 + $0x18] sm:$0xff]  }
 0x7b3   :  { %10340 = vmatpush3.bf16.msra.mxu0 %v10805_v15 }
 0x7b4   :  { %10341 = vmatprep.subr.bf16.mxu0 %v10806_v50 }
 0x7b7   :  { %10342 = vmatpush3.bf16.msra.mxu0 %v10807_v28 }
 0x7b8   :  { %10343 = vmatprep.subr.bf16.mxu0 %v10808_v27  ;;  %v4892_v27 = vrot.slane %v12683_v7, %v11663_v39 }
 0x7bb   :  { %10344 = vmatpush3.bf16.msra.mxu0 %v10809_v13 }
 0x7bc   :  { %10345 = vmatprep.subr.bf16.mxu0 %v10810_v23 }
 0x7bf   :  { %10346 = vmatpush3.bf16.msra.mxu0 %v10811_v59 }
 0x7c0   :  { %10347 = vmatprep.subr.bf16.mxu0 %v10812_v35 }
 0x7c3   :  { %10348 = vmatpush3.bf16.msra.mxu0 %v10813_v33 }
 0x865   :  { %v2517_v29 = vpop.f32.mrb[8].mxu0 }
 0x866   :  { %v4663_v20 = vadd.f32 %v4661_v17, %v2517_v29  ;;  %v10520_v51 = vpop.f32.mrb[9].mxu0  ;;  %v10814_v17 = vld [vmem:[#allocation7 + $0x68] sm:$0xff]  }
 0x867   :  { %v2520_v60 = vpop.f32.mrb[10].mxu0  ;;  %10349 = vmatprep.subr.bf16.mxu0 %v10814_v17 }
 0x868   :  { %v10521_v49 = vpop.f32.mrb[11].mxu0  ;;  %4665 = vadd.xlane.f32.xlu0 %v4663_v20  ;;  %10350 = vmatpush3.bf16.msra.mxu0 %v10815_v54  ;;  %v10830_v54 = vld [vmem:[#allocation2 + $0xf4] ss:$12 sps:$4 sm:$0xff]  }
 0x885   :  { %v4638_v26 = vpop.f32.mrb[12].mxu0 }
 0x886   :  { %v4664_v34 = vadd.f32 %v4662_v30, %v4638_v26  ;;  %v10580_v38 = vpop.f32.mrb[13].mxu0 }
 0x887   :  { %v4641_v2 = vpop.f32.mrb[14].mxu0 }
 0x888   :  { %4667 = vadd.xlane.f32.xlu1 %v4664_v34  ;;  %v10581_v18 = vpop.f32.mrb[15].mxu0 }
 0x8f5   :  { %v4666_v1 = vpop.xlane.xlu0 %4665 }
 0x8f6   :  { %v4670_v11 = vmul.f32 0.0078125, %v4666_v1  ;;  %v4697_v1 = vrot.slane %v12683_v7, %v11461_v45 }
 0x8f8   :  { %v12693_v19 = vsub.f32 %v4663_v20, %v4670_v11 }
 0x8fa   :  { %v4674_v48 = vmul.f32 %v12693_v19, %v12693_v19 }
 0x8fc   :  { %4676 = vadd.xlane.f32.xlu0 %v4674_v48 }
 0x915   :  { %v4668_v43 = vpop.xlane.xlu1 %4667 }
 0x916   :  { %v4671_v14 = vmul.f32 0.0078125, %v4668_v43 }
 0x918   :  { %v12697_v0 = vsub.f32 %v4664_v34, %v4671_v14  ;;  %v4691_v34 = vrot.slane %v12683_v7, %v11445_v32 }
 0x91a   :  { %v4675_v63 = vmul.f32 %v12697_v0, %v12697_v0 }
 0x91c   :  { %4678 = vadd.xlane.f32.xlu0 %v4675_v63  ;;  %v10818_v63 = vld [vmem:[#allocation7 + $0x78] sm:$0xff]  }
 0x989   :  { %v4677_v29 = vpop.xlane.xlu0 %4676 }
 0x98a   :  { %v4680_v20 = vmul.f32 0.0078125, %v4677_v29 }
 0x98c   :  { %v4682_v51 = vadd.f32 1e-05, %v4680_v20 }
 0x98e   :  { %11044 = vrsqrt.f32 %v4682_v51 }
 0x998   :  { %v11045_v30 = vpop.eup %11044 }
 0x999   :  { %v4686_v26 = vmul.f32 %v11045_v30, %v12693_v19  ;;  %v10816_v19 = vld [vmem:[#allocation7 + $0x70] sm:$0xff]   ;;  %v10826_v30 = vld [vmem:[#allocation2 + $0xdc] ss:$12 sps:$4 sm:$0xff]  }
 0x99a   :  { %10351 = vmatprep.subr.bf16.mxu0 %v10816_v19  ;;  %v10828_v19 = vld [vmem:[#allocation2 + $0xf0] ss:$12 sps:$4 sm:$0xff]  }
 0x99b   :  { %v4692_v18 = vmul.f32 %v4691_v34, %v4686_v26  ;;  %10352 = vmatpush3.bf16.msra.mxu0 %v10817_v5  ;;  %v10827_v26 = vld [vmem:[#allocation2 + $0xe0] ss:$12 sps:$4 sm:$0xff]   ;;  %v10831_v5 = vld [vmem:[#allocation2 + $0xf8] ss:$12 sps:$4 sm:$0xff]  }
 0x99c   :  { %10353 = vmatprep.subr.bf16.mxu0 %v10818_v63  ;;  %v10834_v63 = vld [vmem:[#allocation2 + $0x10c] ss:$12 sps:$4 sm:$0xff]  }
 0x99d   :  { %v4698_v48 = vadd.f32 %v4697_v1, %v4692_v18 }
 0x99f   :  { %10354 = vmatpush3.bf16.msra.mxu0 %v10819_v10  ;;  %v10832_v10 = vld [vmem:[#allocation2 + $0x108] ss:$12 sps:$4 sm:$0xff]  }
 0x9a0   :  { %10582 = vmatprep.subr.bf16.mxu0 %v14243_v58 }
 0x9a9   :  { %v4679_v60 = vpop.xlane.xlu0 %4678 }
 0x9aa   :  { %v4681_v49 = vmul.f32 0.0078125, %v4679_v60  ;;  %v10820_v60 = vld [vmem:[#allocation2 + $0xc0] ss:$12 sps:$4 sm:$0xff]  }
 0x9ac   :  { %v4683_v8 = vadd.f32 1e-05, %v4681_v49  ;;  %v10822_v49 = vld [vmem:[#allocation2 + $0xc4] ss:$12 sps:$4 sm:$0xff]  }
 0x9ad   :  { %5250 = vmatprep.subr.bf16.mxu1 %v10822_v49 }
 0x9ae   :  { %11046 = vrsqrt.f32 %v4683_v8  ;;  %v10823_v8 = vld [vmem:[#allocation2 + $0xc8] ss:$12 sps:$4 sm:$0xff]  }
 0x9b8   :  { %v11047_v38 = vpop.eup %11046 }
 0x9b9   :  { %v4687_v2 = vmul.f32 %v11047_v38, %v12697_v0  ;;  %v85_v0 = vld [vmem:[%s14140_s8] sm:$0x3] }
 0x9ba   :  { %v4721_v36 = vrot.slane %v85_v0, %v11442_v31  ;;  %v4725_v22 = vrot.slane %v85_v0, %v11445_v32  ;;  %v10835_v0 = vld [vmem:[#allocation2 + $0x110] ss:$12 sps:$4 sm:$0xff]  }
 0x9bb   :  { %v4693_v11 = vmul.f32 %v4691_v34, %v4687_v2  ;;  %v10824_v34 = vld [vmem:[#allocation2 + $0xd8] ss:$12 sps:$4 sm:$0xff]  }
 0x9bd   :  { %v4699_v43 = vadd.f32 %v4697_v1, %v4693_v11 }
 0x9bf   :  { %v4700_v14 = vpack.c.bf16 %v4699_v43, %v4698_v48 }
 0x9c1   :  { %4841 = vmatmul.mubr.bf16.vlgmr.msra.gmra.mrb[36].mxu1 %v4700_v14 }
 0x9c2   :  { %5282 = vmatprep.mubr.bf16.mxu1 %v14254_v41  ;;  %5251 = vmatpush1.bf16.msra.mxu1 %v10820_v60 }
 0x9c3   :  { %5252 = vmatprep.subr.bf16.mxu1 %v10826_v30 }
 0x9c6   :  { %5253 = vmatpush1.bf16.msra.mxu1 %v10824_v34 }
 0x9c7   :  { %5254 = vmatprep.subr.bf16.mxu1 %v10830_v54 }
 0x9ca   :  { %5255 = vmatpush1.bf16.msra.mxu1 %v10828_v19 }
 0x9cb   :  { %5256 = vmatprep.subr.bf16.mxu1 %v10834_v63 }
 0x9ce   :  { %5257 = vmatpush1.bf16.msra.mxu1 %v10832_v10 }
 0xa94   :  { %v4842_v55 = vpop.f32.mrb[36].mxu1 }
 0xa95   :  { %v4843_v52 = vadd.f32 %v4842_v55, %v4721_v36  ;;  %v4844_v12 = vpop.f32.mrb[37].mxu1  ;;  %v10839_v55 = vld [vmem:[#allocation2 + $0x128] ss:$12 sps:$4 sm:$0xff]  }
 0xa96   :  { %v4845_v25 = vadd.f32 %v4844_v12, %v4725_v22  ;;  %v4846_v40 = vpop.f32.mrb[38].mxu1  ;;  %v10842_v12 = vld [vmem:[#allocation2 + $0x13c] ss:$12 sps:$4 sm:$0xff]  }
 0xa97   :  { %v4847_v24 = vadd.f32 %v4846_v40, %v4721_v36  ;;  %v4848_v21 = vpop.f32.mrb[39].mxu1  ;;  %v4851_v3 = vmax.f32 %v4843_v52, 0.0  ;;  %v10838_v36 = vld [vmem:[#allocation2 + $0x124] ss:$12 sps:$4 sm:$0xff]   ;;  %v10846_v40 = vld [vmem:[#allocation2 + $0x154] ss:$12 sps:$4 sm:$0xff]  }
 0xa98   :  { %v4849_v4 = vadd.f32 %v4848_v21, %v4725_v22  ;;  %v4852_v61 = vmax.f32 %v4845_v25, 0.0  ;;  %v10836_v22 = vld [vmem:[#allocation2 + $0x120] ss:$12 sps:$4 sm:$0xff]   ;;  %5258 = vmatprep.subr.bf16.mxu1 %v10838_v36  ;;  %v10840_v52 = vld [vmem:[#allocation2 + $0x138] ss:$12 sps:$4 sm:$0xff]  }
 0xa99   :  { %v4853_v37 = vmax.f32 %v4847_v24, 0.0  ;;  %5259 = vmatpush1.bf16.msra.mxu1 %v10836_v22  ;;  %v10843_v25 = vld [vmem:[#allocation2 + $0x140] ss:$12 sps:$4 sm:$0xff]   ;;  %v10844_v24 = vld [vmem:[#allocation2 + $0x150] ss:$12 sps:$4 sm:$0xff]  }
 0xa9a   :  { %v4854_v16 = vmax.f32 %v4849_v4, 0.0  ;;  %5260 = vmatprep.subr.bf16.mxu1 %v10842_v12  ;;  %v10847_v21 = vld [vmem:[#allocation2 + $0x158] ss:$12 sps:$4 sm:$0xff]  }
 0xa9b   :  { %v4855_v15 = vpack.c.bf16 %v4853_v37, %v4851_v3  ;;  %v10850_v4 = vld [vmem:[#allocation2 + $0x16c] ss:$12 sps:$4 sm:$0xff]   ;;  %v10848_v3 = vld [vmem:[#allocation2 + $0x168] ss:$12 sps:$4 sm:$0xff]   ;;  %v10851_v37 = vld [vmem:[#allocation2 + $0x170] ss:$12 sps:$4 sm:$0xff]  }
 0xa9c   :  { %v4856_v50 = vpack.c.bf16 %v4854_v16, %v4852_v61 }
 0xa9d   :  { %5261 = vmatpush1.bf16.msra.mxu1 %v10840_v52 }
 0xa9e   :  { %5021 = vmatprep.mubr.bf16.mxu0 %v4856_v50  ;;  %5262 = vmatprep.subr.bf16.mxu1 %v10846_v40 }
 0xa9f   :  { %5022 = vmatmul.mubr.bf16.vlgmr.msra.gmra.mrb[16].mxu0 %v4855_v15 }
 0xaa0   :  { %10598 = vmatprep.mubr.msk.bf16.mxu0 %vm11310_vm0, %v14243_v58  ;;  %10583 = vmatpush3.bf16.msra.mxu0 %v10823_v8 }
 0xaa1   :  { %10584 = vmatprep.subr.bf16.mxu0 %v14243_v58  ;;  %5263 = vmatpush1.bf16.msra.mxu1 %v10844_v24 }
 0xaa2   :  { %5264 = vmatprep.subr.bf16.mxu1 %v10850_v4 }
 0xaa4   :  { %10585 = vmatpush3.bf16.msra.mxu0 %v10827_v26 }
 0xaa5   :  { %10586 = vmatprep.subr.bf16.mxu0 %v14243_v58  ;;  %5265 = vmatpush1.bf16.msra.mxu1 %v10848_v3 }
 0xaa6   :  { %10602 = vmatprep.subr.mxu1 %v14243_v58 }
 0xaa8   :  { %10587 = vmatpush3.bf16.msra.mxu0 %v10831_v5 }
 0xaa9   :  { %10588 = vmatprep.subr.bf16.mxu0 %v14243_v58 }
 0xaac   :  { %10589 = vmatpush3.bf16.msra.mxu0 %v10835_v0 }
 0xaad   :  { %10590 = vmatprep.subr.bf16.mxu0 %v14243_v58 }
 0xab0   :  { %10591 = vmatpush3.bf16.msra.mxu0 %v10839_v55 }
 0xab1   :  { %10592 = vmatprep.subr.bf16.mxu0 %v14243_v58 }
 0xab4   :  { %10593 = vmatpush3.bf16.msra.mxu0 %v10843_v25 }
 0xab5   :  { %10594 = vmatprep.subr.bf16.mxu0 %v14243_v58 }
 0xab8   :  { %10595 = vmatpush3.bf16.msra.mxu0 %v10847_v21 }
 0xab9   :  { %10596 = vmatprep.subr.bf16.mxu0 %v14243_v58 }
 0xabc   :  { %10597 = vmatpush3.bf16.msra.mxu0 %v10851_v37 }
 0xabd   :  { %10642 = vmatprep.subr.bf16.mxu0 %v14243_v58 }
 0xb72   :  { %v10355_v28 = vpop.f32.mrb[16].mxu0 }
 0xb73   :  { %v10356_v13 = vpop.f32.mrb[17].mxu0 }
 0xb74   :  { %v10357_v23 = vadd.f32 %v10356_v13, %v10355_v28  ;;  %v10358_v59 = vpop.f32.mrb[18].mxu0  ;;  %v5057_v13 = vrot.slane %v12683_v7, %v11666_v42 }
 0xb75   :  { %v10359_v35 = vpop.f32.mrb[19].mxu0 }
 0xb76   :  { %v5024_v33 = vadd.f32 %v10357_v23, %v4892_v27  ;;  %v10360_v17 = vadd.f32 %v10359_v35, %v10358_v59 }
 0xb78   :  { %v5027_v29 = vadd.f32 %v10360_v17, %v4892_v27  ;;  %v5030_v20 = vadd.f32 %v5024_v33, %v4698_v48 }
 0xb7a   :  { %5032 = vadd.xlane.f32.xlu1 %v5030_v20  ;;  %v5031_v51 = vadd.f32 %v5027_v29, %v4699_v43  ;;  %v5063_v29 = vrot.slane %v12683_v7, %v11669_v44  ;;  %v10174_v7 = vld [vmem:[%s14139_s7 + $0x3] sm:$0x7] }
 0xb7b   :  { %v5110_v34 = vrot.slane %v10174_v7, %v11442_v31 }
 0xb7c   :  { %5034 = vadd.xlane.f32.xlu0 %v5031_v51 }
 0xc07   :  { %v5033_v38 = vpop.xlane.xlu1 %5032 }
 0xc08   :  { %v5036_v2 = vmul.f32 0.0078125, %v5033_v38  ;;  %v5114_v38 = vrot.slane %v10174_v7, %v11445_v32 }
 0xc09   :  { %v5035_v18 = vpop.xlane.xlu0 %5034 }
 0xc0a   :  { %v5038_v1 = vsub.f32 %v5030_v20, %v5036_v2  ;;  %v5037_v11 = vmul.f32 0.0078125, %v5035_v18  ;;  %v10173_v20 = vld [vmem:[%s14138_s6 + $0x8] sm:$0x3f] }
 0xc0b   :  { %v12785_v8 = vrot.slane %v10173_v20, %v11442_v31 }
 0xc0c   :  { %v5039_v48 = vsub.f32 %v5031_v51, %v5037_v11  ;;  %v5040_v43 = vmul.f32 %v5038_v1, %v5038_v1  ;;  %v5118_v11 = vrot.slane %v10174_v7, %v11461_v45 }
 0xc0d   :  { %14257 = vst [vmem:[#allocation22_spill] sm:$0xff] %v12785_v8 }
 0xc0e   :  { %5042 = vadd.xlane.f32.xlu1 %v5040_v43  ;;  %v5041_v14 = vmul.f32 %v5039_v48, %v5039_v48 }
 0xc10   :  { %5044 = vadd.xlane.f32.xlu0 %v5041_v14 }
 0xc9b   :  { %v5043_v61 = vpop.xlane.xlu1 %5042 }
 0xc9c   :  { %v5046_v16 = vmul.f32 0.0078125, %v5043_v61 }
 0xc9d   :  { %v5045_v15 = vpop.xlane.xlu0 %5044 }
 0xc9e   :  { %v5048_v50 = vadd.f32 1e-05, %v5046_v16  ;;  %v5047_v28 = vmul.f32 0.0078125, %v5045_v15 }
 0xca0   :  { %11048 = vrsqrt.f32 %v5048_v50  ;;  %v5049_v27 = vadd.f32 1e-05, %v5047_v28 }
 0xca2   :  { %11050 = vrsqrt.f32 %v5049_v27 }
 0xcaa   :  { %v11049_v23 = vpop.eup %11048 }
 0xcab   :  { %v5052_v59 = vmul.f32 %v11049_v23, %v5038_v1 }
 0xcac   :  { %v11051_v35 = vpop.eup %11050 }
 0xcad   :  { %v5053_v33 = vmul.f32 %v11051_v35, %v5039_v48  ;;  %v5058_v17 = vmul.f32 %v5057_v13, %v5052_v59 }
 0xcaf   :  { %v5059_v51 = vmul.f32 %v5057_v13, %v5053_v33  ;;  %v12782_v60 = vadd.f32 %v5063_v29, %v5058_v17 }
 0xcb1   :  { %14256 = vst [vmem:[#allocation21_spill] sm:$0xff] %v12782_v60  ;;  %v5065_v49 = vadd.f32 %v5063_v29, %v5059_v51 }
 0xcb3   :  { %v5072_v30 = vpack.c.bf16 %v5065_v49, %v12782_v60  ;;  %v12789_v26 = vadd.f32 %v12785_v8, %v5065_v49 }
 0xcb5   :  { %14258 = vst [vmem:[#allocation23_spill] sm:$0xff] %v12789_v26  ;;  %5283 = vmatmul.mubr.bf16.vlgmr.msra.gmra.mrb[40].mxu1 %v5072_v30  ;;  %10599 = vmatmul.mubr.bf16.vlgmr.msra.gmra.mrb[20].mxu0 %v5072_v30 }
 0xcb6   :  { %10604 = vmatprep.mubr.msk.f32.mxu1 %vm11310_vm0, %v14243_v58  ;;  %10658 = vmatprep.mubr.msk.bf16.mxu0 %vm11310_vm0, %v14243_v58 }
 0xd88   :  { %v5284_v2 = vpop.f32.mrb[40].mxu1  ;;  %v5327_v18 = vpop.f32.mrb[20].mxu0 }
 0xd89   :  { %v5285_v1 = vadd.f32 %v5284_v2, %v5110_v34  ;;  %v5286_v48 = vpop.f32.mrb[41].mxu1  ;;  %v10600_v43 = vpop.f32.mrb[21].mxu0  ;;  %v12830_v24 = vadd.f32 %v5327_v18, %v5118_v11 }
 0xd8a   :  { %v5287_v14 = vadd.f32 %v5286_v48, %v5114_v38  ;;  %v5288_v54 = vpop.f32.mrb[42].mxu1  ;;  %v5330_v19 = vpop.f32.mrb[22].mxu0 }
 0xd8b   :  { %v5334_v5 = vmul.f32 0.17677669, %v5285_v1  ;;  %v12801_v63 = vadd.f32 %v5288_v54, %v5110_v34  ;;  %v12803_v10 = vadd.f32 %v5330_v19, %v5118_v11  ;;  %v5290_v0 = vpop.f32.mrb[43].mxu1  ;;  %v10601_v36 = vpop.f32.mrb[23].mxu0 }
 0xd8c   :  { %v12805_v22 = vadd.f32 %v5290_v0, %v5114_v38  ;;  %5414 = vrot.lane.b32.xlu1 %v5287_v14, %s11311_s3  ;;  %10603 = vmatpush3.xpose.msk.msra.mxu1 %vm349_vm1, %v5287_v14 }
 0xd8d   :  { %14259 = vst [vmem:[#allocation25_spill] sm:$0xff] %v12803_v10  ;;  %5412 = vrot.lane.b32.xlu0 %v5334_v5, %s11311_s3  ;;  %10607 = vmatprep.subr.mxu1 %v14243_v58 }
 0xd8f   :  { %10605 = vmatmul.mubr.msk.f32.vlgmr.msra.gmra.mrb[34].mxu1 %vm349_vm1, %v5334_v5 }
 0xd90   :  { %5492 = vrot.lane.b32.xlu1 %v5287_v14, %s11302_s23  ;;  %10609 = vmatprep.mubr.msk.f32.mxu1 %vm11310_vm0, %v14243_v58 }
 0xd91   :  { %5570 = vrot.lane.b32.xlu0 %v5287_v14, %s11312_s14 }
 0xd94   :  { %5490 = vrot.lane.b32.xlu1 %v5334_v5, %s11302_s23 }
 0xd98   :  { %5568 = vrot.lane.b32.xlu1 %v5334_v5, %s11312_s14 }
 0xdfe   :  { %v5415_v55 = vpop.permute.xlu1 %5414 }
 0xdff   :  { %10608 = vmatpush3.xpose.msk.msra.mxu1 %vm349_vm1, %v5415_v55  ;;  %v5413_v52 = vpop.permute.xlu0 %5412 }
 0xe00   :  { %10612 = vmatprep.subr.mxu1 %v14243_v58 }
 0xe02   :  { %v5493_v12 = vpop.permute.xlu1 %5492  ;;  %10610 = vmatmul.mubr.msk.f32.vlgmr.msra.gmra.mrb[44].mxu1 %vm349_vm1, %v5413_v52 }
 0xe03   :  { %10613 = vmatpush3.xpose.msk.msra.mxu1 %vm349_vm1, %v5493_v12  ;;  %10614 = vmatprep.mubr.msk.f32.mxu1 %vm11310_vm0, %v14243_v58  ;;  %v5571_v40 = vpop.permute.xlu0 %5570 }
 0xe04   :  { %10617 = vmatprep.subr.mxu1 %v14243_v58 }
 0xe06   :  { %v5491_v25 = vpop.permute.xlu1 %5490 }
 0xe07   :  { %10615 = vmatmul.mubr.msk.f32.vlgmr.msra.gmra.mrb[46].mxu1 %vm349_vm1, %v5491_v25 }
 0xe08   :  { %10618 = vmatpush3.xpose.msk.msra.mxu1 %vm349_vm1, %v5571_v40  ;;  %10619 = vmatprep.mubr.msk.f32.mxu1 %vm11310_vm0, %v14243_v58 }
 0xe09   :  { %10622 = vmatprep.subr.mxu1 %v14243_v58 }
 0xe0a   :  { %v5569_v21 = vpop.permute.xlu1 %5568 }
 0xe0b   :  { %10620 = vmatmul.mubr.msk.f32.vlgmr.msra.gmra.mrb[48].mxu1 %vm349_vm1, %v5569_v21 }
 0xe0c   :  { %10623 = vmatpush3.msra.mxu1 %v12830_v24  ;;  %10624 = vmatprep.mubr.msk.f32.mxu1 %vm11310_vm0, %v14243_v58 }
 0xe0d   :  { %10627 = vmatprep.subr.mxu1 %v14243_v58 }
 0xe62   :  { %v5408_v4 = vpop.f32.mrb[34].mxu1 }
 0xe63   :  { %v5650_v3 = vcombine.high %v5408_v4, %v5408_v4  ;;  %v5657_v37 = vrot.slane %v5408_v4, %v11493_v62  ;;  %v10606_v61 = vpop.f32.mrb[35].mxu1 }
 0xe65   :  { %v5664_v16 = vrot.slane %v5650_v3, %v11493_v62  ;;  %v5665_v15 = vcombine.high %v5657_v37, %v5657_v37  ;;  %v5673_v50 = vrot.slane %v5657_v37, %v11493_v62 }
 0xe67   :  { %v5666_v28 = vcombine.high %v5664_v16, %v5664_v16  ;;  %v5680_v27 = vrot.slane %v5664_v16, %v11493_v62  ;;  %v5687_v13 = vrot.slane %v5665_v15, %v11493_v62  ;;  %v5695_v23 = vcombine.high %v5673_v50, %v5673_v50 }
 0xe68   :  { %v12844_v35 = vsel %vm81_vm2, -1e+09, %v5673_v50 }
 0xe69   :  { %v5694_v33 = vrot.slane %v5666_v28, %v11493_v62  ;;  %v5696_v17 = vcombine.high %v5680_v27, %v5680_v27  ;;  %v5697_v29 = vcombine.high %v5687_v13, %v5687_v13  ;;  %v12849_v20 = vsel %vm81_vm2, -1e+09, %v5687_v13 }
 0xe6a   :  { %v12853_v51 = vsel %vm81_vm2, -1e+09, %v5695_v23  ;;  %v5942_v49 = vcombine.low %v12844_v35, %v12849_v20  ;;  %v12863_v34 = vsel %vm81_vm2, -1e+09, %v5680_v27 }
 0xe6b   :  { %v5698_v30 = vcombine.high %v5694_v33, %v5694_v33  ;;  %v12859_v7 = vsel %vm81_vm2, -1e+09, %v5697_v29  ;;  %v12867_v38 = vsel %vm81_vm2, -1e+09, %v5694_v33  ;;  %v12875_v1 = vsel %vm81_vm2, -1e+09, %v5696_v17 }
 0xe6c   :  { %v5943_v2 = vcombine.low %v12853_v51, %v12859_v7  ;;  %v5944_v18 = vcombine.low %v12863_v34, %v12867_v38  ;;  %v5952_v43 = vrot.slane %v5942_v49, %v11493_v62 }
 0xe6d   :  { %v12879_v11 = vsel %vm81_vm2, -1e+09, %v5698_v30 }
 0xe6e   :  { %v5945_v48 = vcombine.low %v12875_v1, %v12879_v11  ;;  %v5959_v14 = vrot.slane %v5943_v2, %v11493_v62  ;;  %v5966_v54 = vrot.slane %v5944_v18, %v11493_v62 }
 0xe70   :  { %v5973_v19 = vrot.slane %v5945_v48, %v11493_v62  ;;  %v5974_v5 = vcombine.low %v5952_v43, %v5959_v14 }
 0xe72   :  { %v5975_v0 = vcombine.low %v5966_v54, %v5973_v19  ;;  %v5982_v36 = vrot.slane %v5974_v5, %v11493_v62 }
 0xe74   :  { %v5989_v55 = vrot.slane %v5975_v0, %v11493_v62 }
 0xe76   :  { %v5990_v52 = vcombine.low %v5982_v36, %v5989_v55 }
 0xe78   :  { %v6142_v12 = vsel %vm1158_vm3, %v5990_v52, -inf }
 0xe79   :  { %6143 = vmax.xlane.f32.xlu0 %v6142_v12 }
 0xed5   :  { %v5486_v25 = vpop.f32.mrb[44].mxu1 }
 0xed6   :  { %v5699_v40 = vcombine.high %v5486_v25, %v5486_v25  ;;  %v5706_v21 = vrot.slane %v5486_v25, %v11493_v62  ;;  %v10611_v4 = vpop.f32.mrb[45].mxu1 }
 0xed8   :  { %v5713_v3 = vrot.slane %v5699_v40, %v11493_v62  ;;  %v5714_v37 = vcombine.high %v5706_v21, %v5706_v21  ;;  %v5722_v61 = vrot.slane %v5706_v21, %v11493_v62 }
 0xeda   :  { %v5715_v16 = vcombine.high %v5713_v3, %v5713_v3  ;;  %v5729_v15 = vrot.slane %v5713_v3, %v11493_v62  ;;  %v5736_v50 = vrot.slane %v5714_v37, %v11493_v62  ;;  %v5744_v28 = vcombine.high %v5722_v61, %v5722_v61  ;;  %v5564_v27 = vpop.f32.mrb[46].mxu1 }
 0xedb   :  { %v5748_v13 = vcombine.high %v5564_v27, %v5564_v27  ;;  %v5755_v23 = vrot.slane %v5564_v27, %v11493_v62  ;;  %v10616_v33 = vpop.f32.mrb[47].mxu1  ;;  %v12903_v2 = vsel %vm81_vm2, -1e+09, %v5722_v61 }
 0xedc   :  { %v5743_v17 = vrot.slane %v5715_v16, %v11493_v62  ;;  %v5745_v29 = vcombine.high %v5729_v15, %v5729_v15  ;;  %v5746_v49 = vcombine.high %v5736_v50, %v5736_v50  ;;  %v12899_v30 = vsel %vm81_vm2, -1e+09, %v5736_v50 }
 0xedd   :  { %v12907_v18 = vsel %vm81_vm2, -1e+09, %v5744_v28  ;;  %v12911_v48 = vsel %vm81_vm2, -1e+09, %v5729_v15  ;;  %v5762_v43 = vrot.slane %v5748_v13, %v11493_v62  ;;  %v5991_v5 = vcombine.low %v12903_v2, %v12899_v30 }
 0xede   :  { %v5747_v14 = vcombine.high %v5743_v17, %v5743_v17  ;;  %v12916_v54 = vsel %vm81_vm2, -1e+09, %v5746_v49  ;;  %v12920_v19 = vsel %vm81_vm2, -1e+09, %v5743_v17  ;;  %v12926_v0 = vsel %vm81_vm2, -1e+09, %v5745_v29 }
 0xedf   :  { %v5992_v36 = vcombine.low %v12907_v18, %v12916_v54  ;;  %v5763_v55 = vcombine.high %v5755_v23, %v5755_v23  ;;  %v5764_v52 = vcombine.high %v5762_v43, %v5762_v43  ;;  %v5642_v12 = vpop.f32.mrb[48].mxu1  ;;  %v5993_v25 = vcombine.low %v12911_v48, %v12920_v19 }
 0xee0   :  { %v5771_v40 = vrot.slane %v5755_v23, %v11493_v62  ;;  %v5778_v21 = vrot.slane %v5762_v43, %v11493_v62  ;;  %v5797_v4 = vcombine.high %v5642_v12, %v5642_v12  ;;  %v10621_v3 = vpop.f32.mrb[49].mxu1  ;;  %v5804_v16 = vrot.slane %v5642_v12, %v11493_v62 }
 0xee1   :  { %v5785_v37 = vrot.slane %v5763_v55, %v11493_v62  ;;  %v5792_v61 = vrot.slane %v5764_v52, %v11493_v62  ;;  %v12939_v15 = vsel %vm81_vm2, -1e+09, %v5747_v14  ;;  %v6001_v13 = vrot.slane %v5991_v5, %v11493_v62 }
 0xee2   :  { %v5793_v50 = vcombine.high %v5771_v40, %v5771_v40  ;;  %v5794_v28 = vcombine.high %v5778_v21, %v5778_v21  ;;  %v12943_v27 = vsel %vm81_vm2, -1e+09, %v5771_v40  ;;  %v12952_v17 = vsel %vm81_vm2, -1e+09, %v5778_v21 }
 0xee3   :  { %v5795_v23 = vcombine.high %v5785_v37, %v5785_v37  ;;  %v12948_v33 = vsel %vm81_vm2, -1e+09, %v5785_v37  ;;  %v12956_v29 = vsel %vm81_vm2, -1e+09, %v5792_v61  ;;  %v5796_v49 = vcombine.high %v5792_v61, %v5792_v61 }
 0xee4   :  { %v12960_v43 = vsel %vm81_vm2, -1e+09, %v5793_v50  ;;  %v12964_v14 = vsel %vm81_vm2, -1e+09, %v5794_v28  ;;  %v6040_v5 = vcombine.low %v12943_v27, %v12948_v33  ;;  %v5811_v52 = vrot.slane %v5797_v4, %v11493_v62 }
 0xee5   :  { %v12970_v55 = vsel %vm81_vm2, -1e+09, %v5795_v23  ;;  %v5812_v12 = vcombine.high %v5804_v16, %v5804_v16  ;;  %v5820_v40 = vrot.slane %v5804_v16, %v11493_v62  ;;  %v6042_v3 = vcombine.low %v12952_v17, %v12956_v29 }
 0xee6   :  { %v6041_v21 = vcombine.low %v12960_v43, %v12970_v55  ;;  %v5994_v37 = vcombine.low %v12926_v0, %v12939_v15  ;;  %v6008_v61 = vrot.slane %v5992_v36, %v11493_v62  ;;  %v5813_v50 = vcombine.high %v5811_v52, %v5811_v52 }
 0xee7   :  { %v5827_v28 = vrot.slane %v5811_v52, %v11493_v62  ;;  %v5834_v23 = vrot.slane %v5812_v12, %v11493_v62  ;;  %v5842_v4 = vcombine.high %v5820_v40, %v5820_v40  ;;  %v12985_v16 = vsel %vm81_vm2, -1e+09, %v5820_v40 }
 0xee8   :  { %v6015_v56 = vrot.slane %v5993_v25, %v11493_v62  ;;  %v6022_v57 = vrot.slane %v5994_v37, %v11493_v62  ;;  %v6023_v6 = vcombine.low %v6001_v13, %v6008_v61  ;;  %v5841_v9 = vrot.slane %v5813_v50, %v11493_v62 }
 0xee9   :  { %v5843_v53 = vcombine.high %v5827_v28, %v5827_v28  ;;  %v5844_v26 = vcombine.high %v5834_v23, %v5834_v23  ;;  %v12992_v36 = vsel %vm81_vm2, -1e+09, %v5834_v23  ;;  %v12996_v52 = vsel %vm81_vm2, -1e+09, %v5842_v4 }
 0xeea   :  { %v13000_v12 = vsel %vm81_vm2, -1e+09, %v5827_v28  ;;  %v6024_v25 = vcombine.low %v6015_v56, %v6022_v57  ;;  %v13004_v13 = vsel %vm81_vm2, -1e+09, %v5796_v49  ;;  %v5845_v40 = vcombine.high %v5841_v9, %v5841_v9 }
 0xeeb   :  { %v13008_v37 = vsel %vm81_vm2, -1e+09, %v5844_v26  ;;  %v13012_v61 = vsel %vm81_vm2, -1e+09, %v5841_v9  ;;  %v6089_v50 = vcombine.low %v12985_v16, %v12992_v36  ;;  %v13018_v28 = vsel %vm81_vm2, -1e+09, %v5843_v53 }
 0xeec   :  { %v6090_v57 = vcombine.low %v12996_v52, %v13008_v37  ;;  %v6031_v56 = vrot.slane %v6023_v6, %v11493_v62  ;;  %v6038_v49 = vrot.slane %v6024_v25, %v11493_v62  ;;  %v6091_v26 = vcombine.low %v13000_v12, %v13012_v61 }
 0xeed   :  { %v6043_v9 = vcombine.low %v12964_v14, %v13004_v13  ;;  %v6050_v23 = vrot.slane %v6040_v5, %v11493_v62  ;;  %v6057_v4 = vrot.slane %v6041_v21, %v11493_v62  ;;  %v6064_v53 = vrot.slane %v6042_v3, %v11493_v62 }
 0xeee   :  { %v6039_v8 = vcombine.low %v6031_v56, %v6038_v49  ;;  %v13033_v60 = vsel %vm81_vm2, -1e+09, %v5845_v40  ;;  %v6106_v6 = vrot.slane %v6090_v57, %v11493_v62  ;;  %v6099_v58 = vrot.slane %v6089_v50, %v11493_v62 }
 0xeef   :  { %v6071_v25 = vrot.slane %v6043_v9, %v11493_v62  ;;  %v6072_v41 = vcombine.low %v6050_v23, %v6057_v4  ;;  %v6092_v10 = vcombine.low %v13018_v28, %v13033_v60  ;;  %v6113_v3 = vrot.slane %v6091_v26, %v11493_v62 }
 0xef0   :  { %v6145_v5 = vsel %vm1158_vm3, %v6039_v8, -inf  ;;  %v6121_v40 = vcombine.low %v6099_v58, %v6106_v6 }
 0xef1   :  { %6146 = vmax.xlane.f32.xlu1 %v6145_v5  ;;  %v6073_v21 = vcombine.low %v6064_v53, %v6071_v25  ;;  %v6120_v59 = vrot.slane %v6092_v10, %v11493_v62  ;;  %v6080_v56 = vrot.slane %v6072_v41, %v11493_v62 }
 0xef2   :  { %v6129_v23 = vrot.slane %v6121_v40, %v11493_v62 }
 0xef3   :  { %v6087_v57 = vrot.slane %v6073_v21, %v11493_v62  ;;  %v6122_v49 = vcombine.low %v6113_v3, %v6120_v59 }
 0xef5   :  { %v6088_v9 = vcombine.low %v6080_v56, %v6087_v57  ;;  %v6136_v4 = vrot.slane %v6122_v49, %v11493_v62 }
 0xef7   :  { %v6148_v50 = vsel %vm1158_vm3, %v6088_v9, -inf  ;;  %v6137_v8 = vcombine.low %v6129_v23, %v6136_v4 }
 0xef8   :  { %6149 = vmax.xlane.f32.xlu0 %v6148_v50 }
 0xef9   :  { %v6151_v53 = vsel %vm1158_vm3, %v6137_v8, -inf }
 0xefc   :  { %6152 = vmax.xlane.f32.xlu0 %v6151_v53 }
 0xf06   :  { %v6144_v26 = vpop.xlane.xlu0 %6143 }
 0xf07   :  { %v6161_v58 = vrot.slane %v6144_v26, %v11442_v31  ;;  %v6165_v41 = vrot.slane %v6144_v26, %v11445_v32  ;;  %v6169_v10 = vrot.slane %v6144_v26, %v11461_v45  ;;  %v6173_v6 = vrot.slane %v6144_v26, %v11663_v39 }
 0xf08   :  { %v6177_v25 = vrot.slane %v6144_v26, %v11666_v42  ;;  %v6181_v5 = vrot.slane %v6144_v26, %v11669_v44  ;;  %v6185_v21 = vrot.slane %v6144_v26, %v11672_v46  ;;  %v6189_v3 = vrot.slane %v6144_v26, %v11675_v47 }
 0xf09   :  { %v6318_v59 = vsub.f32 %v12844_v35, %v6161_v58  ;;  %v6319_v40 = vsub.f32 %v12849_v20, %v6165_v41  ;;  %v6320_v56 = vsub.f32 %v12853_v51, %v6169_v10  ;;  %v6321_v57 = vsub.f32 %v12859_v7, %v6173_v6 }
 0xf0a   :  { %v6322_v49 = vsub.f32 %v12863_v34, %v6177_v25  ;;  %v6323_v9 = vsub.f32 %v12867_v38, %v6181_v5  ;;  %v6324_v23 = vsub.f32 %v12875_v1, %v6185_v21  ;;  %v6325_v53 = vsub.f32 %v12879_v11, %v6189_v3 }
 0xf0b   :  { %v6350_v4 = vmul.f32 1.442695, %v6318_v59  ;;  %v6352_v50 = vmul.f32 1.442695, %v6319_v40  ;;  %v6354_v8 = vmul.f32 1.442695, %v6320_v56 }
 0xf0c   :  { %v6356_v26 = vmul.f32 1.442695, %v6321_v57  ;;  %v6358_v35 = vmul.f32 1.442695, %v6322_v49  ;;  %v6360_v20 = vmul.f32 1.442695, %v6323_v9 }
 0xf0d   :  { %11052 = vpow2.f32 %v6350_v4  ;;  %v6362_v51 = vmul.f32 1.442695, %v6324_v23  ;;  %v6364_v7 = vmul.f32 1.442695, %v6325_v53 }
 0xf0e   :  { %11054 = vpow2.f32 %v6352_v50 }
 0xf0f   :  { %11056 = vpow2.f32 %v6354_v8 }
 0xf10   :  { %11058 = vpow2.f32 %v6356_v26 }
 0xf11   :  { %11060 = vpow2.f32 %v6358_v35 }
 0xf12   :  { %11062 = vpow2.f32 %v6360_v20 }
 0xf13   :  { %11064 = vpow2.f32 %v6362_v51 }
 0xf14   :  { %11066 = vpow2.f32 %v6364_v7 }
 0xf17   :  { %v13065_v34 = vpop.eup %11052 }
 0xf18   :  { %v13067_v38 = vpop.eup %11054 }
 0xf19   :  { %v13069_v1 = vpop.eup %11056  ;;  %v6446_v11 = vcombine.low %v13065_v34, %v13067_v38 }
 0xf1a   :  { %v13073_v58 = vpop.eup %11058 }
 0xf1b   :  { %v13075_v41 = vpop.eup %11060  ;;  %v6447_v10 = vcombine.low %v13069_v1, %v13073_v58  ;;  %v6456_v6 = vrot.slane %v6446_v11, %v11493_v62 }
 0xf1c   :  { %v13080_v25 = vpop.eup %11062 }
 0xf1d   :  { %v13082_v5 = vpop.eup %11064  ;;  %v6448_v21 = vcombine.low %v13075_v41, %v13080_v25  ;;  %v6463_v3 = vrot.slane %v6447_v10, %v11493_v62 }
 0xf1e   :  { %v13087_v59 = vpop.eup %11066 }
 0xf1f   :  { %v6449_v40 = vcombine.low %v13082_v5, %v13087_v59  ;;  %v6470_v56 = vrot.slane %v6448_v21, %v11493_v62  ;;  %v6478_v57 = vcombine.low %v6456_v6, %v6463_v3 }
 0xf21   :  { %v6477_v49 = vrot.slane %v6449_v40, %v11493_v62  ;;  %v6486_v23 = vrot.slane %v6478_v57, %v11493_v62 }
 0xf23   :  { %v6479_v9 = vcombine.low %v6470_v56, %v6477_v49 }
 0xf25   :  { %v6493_v4 = vrot.slane %v6479_v9, %v11493_v62 }
 0xf27   :  { %v6494_v50 = vcombine.low %v6486_v23, %v6493_v4 }
 0xf29   :  { %v6646_v8 = vsel %vm1158_vm3, %v6494_v50, 0.0 }
 0xf2a   :  { %6647 = vadd.xlane.f32.xlu1 %v6646_v8 }
 0xf7e   :  { %v6147_v53 = vpop.xlane.xlu1 %6146 }
 0xf7f   :  { %v6193_v26 = vrot.slane %v6147_v53, %v11442_v31  ;;  %v6197_v35 = vrot.slane %v6147_v53, %v11445_v32  ;;  %v6201_v20 = vrot.slane %v6147_v53, %v11461_v45  ;;  %v6205_v51 = vrot.slane %v6147_v53, %v11663_v39 }
 0xf80   :  { %v6209_v11 = vrot.slane %v6147_v53, %v11666_v42  ;;  %v6213_v10 = vrot.slane %v6147_v53, %v11669_v44  ;;  %v6217_v3 = vrot.slane %v6147_v53, %v11672_v46  ;;  %v6221_v40 = vrot.slane %v6147_v53, %v11675_v47 }
 0xf81   :  { %v6326_v7 = vsub.f32 %v12903_v2, %v6193_v26  ;;  %v6327_v6 = vsub.f32 %v12899_v30, %v6197_v35  ;;  %v6328_v56 = vsub.f32 %v12907_v18, %v6201_v20  ;;  %v6329_v57 = vsub.f32 %v12916_v54, %v6205_v51 }
 0xf82   :  { %v6330_v9 = vsub.f32 %v12911_v48, %v6209_v11  ;;  %v6331_v23 = vsub.f32 %v12920_v19, %v6213_v10  ;;  %v6332_v30 = vsub.f32 %v12926_v0, %v6217_v3  ;;  %v6333_v8 = vsub.f32 %v12939_v15, %v6221_v40 }
 0xf83   :  { %v6366_v49 = vmul.f32 1.442695, %v6326_v7  ;;  %v6368_v50 = vmul.f32 1.442695, %v6327_v6  ;;  %v6370_v26 = vmul.f32 1.442695, %v6328_v56 }
 0xf84   :  { %v6372_v48 = vmul.f32 1.442695, %v6329_v57  ;;  %v6374_v20 = vmul.f32 1.442695, %v6330_v9  ;;  %v6376_v15 = vmul.f32 1.442695, %v6331_v23 }
 0xf85   :  { %v6150_v21 = vpop.xlane.xlu0 %6149  ;;  %11068 = vpow2.f32 %v6366_v49  ;;  %v6378_v6 = vmul.f32 1.442695, %v6332_v30 }
 0xf86   :  { %v6225_v2 = vrot.slane %v6150_v21, %v11442_v31  ;;  %v6229_v4 = vrot.slane %v6150_v21, %v11445_v32  ;;  %v6233_v53 = vrot.slane %v6150_v21, %v11461_v45  ;;  %v6237_v18 = vrot.slane %v6150_v21, %v11663_v39 }
 0xf87   :  { %v6241_v54 = vrot.slane %v6150_v21, %v11666_v42  ;;  %v6245_v35 = vrot.slane %v6150_v21, %v11669_v44  ;;  %v6249_v51 = vrot.slane %v6150_v21, %v11672_v46  ;;  %11070 = vpow2.f32 %v6368_v50 }
 0xf88   :  { %v6334_v19 = vsub.f32 %v12943_v27, %v6225_v2  ;;  %v6335_v0 = vsub.f32 %v12948_v33, %v6229_v4  ;;  %v6253_v11 = vrot.slane %v6150_v21, %v11675_v47  ;;  %v6336_v10 = vsub.f32 %v12960_v43, %v6233_v53 }
 0xf89   :  { %v6153_v7 = vpop.xlane.xlu0 %6152  ;;  %11072 = vpow2.f32 %v6370_v26  ;;  %v6337_v3 = vsub.f32 %v12970_v55, %v6237_v18  ;;  %v6338_v40 = vsub.f32 %v12952_v17, %v6241_v54  ;;  %v6380_v27 = vmul.f32 1.442695, %v6333_v8 }
 0xf8a   :  { %11074 = vpow2.f32 %v6372_v48  ;;  %v6339_v56 = vsub.f32 %v12956_v29, %v6245_v35  ;;  %v6257_v57 = vrot.slane %v6153_v7, %v11442_v31  ;;  %v6382_v33 = vmul.f32 1.442695, %v6334_v19 }
 0xf8b   :  { %11076 = vpow2.f32 %v6374_v20  ;;  %v6340_v49 = vsub.f32 %v12964_v14, %v6249_v51  ;;  %v6261_v21 = vrot.slane %v6153_v7, %v11445_v32  ;;  %v6384_v43 = vmul.f32 1.442695, %v6335_v0 }
 0xf8c   :  { %11078 = vpow2.f32 %v6376_v15  ;;  %v6341_v9 = vsub.f32 %v13004_v13, %v6253_v11  ;;  %v6265_v55 = vrot.slane %v6153_v7, %v11461_v45  ;;  %v6386_v17 = vmul.f32 1.442695, %v6336_v10 }
 0xf8d   :  { %11080 = vpow2.f32 %v6378_v6  ;;  %v6269_v2 = vrot.slane %v6153_v7, %v11663_v39  ;;  %v6273_v29 = vrot.slane %v6153_v7, %v11666_v42  ;;  %v6388_v23 = vmul.f32 1.442695, %v6337_v3 }
 0xf8e   :  { %11082 = vpow2.f32 %v6380_v27  ;;  %v6277_v4 = vrot.slane %v6153_v7, %v11669_v44  ;;  %v6342_v14 = vsub.f32 %v12985_v16, %v6257_v57  ;;  %v6390_v50 = vmul.f32 1.442695, %v6338_v40 }
 0xf8f   :  { %11084 = vpow2.f32 %v6382_v33  ;;  %v13135_v30 = vpop.eup %11068  ;;  %v6281_v13 = vrot.slane %v6153_v7, %v11672_v46  ;;  %v6343_v8 = vsub.f32 %v12992_v36, %v6261_v21  ;;  %v6392_v53 = vmul.f32 1.442695, %v6339_v56 }
 0xf90   :  { %11086 = vpow2.f32 %v6384_v43  ;;  %v6344_v26 = vsub.f32 %v12996_v52, %v6265_v55  ;;  %v6394_v18 = vmul.f32 1.442695, %v6340_v49  ;;  %v6285_v48 = vrot.slane %v6153_v7, %v11675_v47 }
 0xf91   :  { %11088 = vpow2.f32 %v6386_v17  ;;  %v13140_v54 = vpop.eup %11070  ;;  %v6345_v16 = vsub.f32 %v13008_v37, %v6269_v2  ;;  %v6396_v35 = vmul.f32 1.442695, %v6341_v9  ;;  %v6346_v20 = vsub.f32 %v13000_v12, %v6273_v29 }
 0xf92   :  { %11090 = vpow2.f32 %v6388_v23  ;;  %v6495_v36 = vcombine.low %v13135_v30, %v13140_v54  ;;  %v6398_v51 = vmul.f32 1.442695, %v6342_v14  ;;  %v6347_v0 = vsub.f32 %v13012_v61, %v6277_v4 }
 0xf93   :  { %v13144_v19 = vpop.eup %11072  ;;  %11092 = vpow2.f32 %v6390_v50  ;;  %v6348_v15 = vsub.f32 %v13018_v28, %v6281_v13  ;;  %v6400_v7 = vmul.f32 1.442695, %v6343_v8  ;;  %v6402_v10 = vmul.f32 1.442695, %v6344_v26 }
 0xf94   :  { %v13149_v52 = vpop.eup %11074  ;;  %11094 = vpow2.f32 %v6392_v53  ;;  %v6505_v12 = vrot.slane %v6495_v36, %v11493_v62  ;;  %v6349_v3 = vsub.f32 %v13033_v60, %v6285_v48  ;;  %v6404_v40 = vmul.f32 1.442695, %v6345_v16 }
 0xf95   :  { %v13153_v37 = vpop.eup %11076  ;;  %v6496_v11 = vcombine.low %v13144_v19, %v13149_v52  ;;  %11096 = vpow2.f32 %v6394_v18  ;;  %v6406_v56 = vmul.f32 1.442695, %v6346_v20  ;;  %v6408_v33 = vmul.f32 1.442695, %v6347_v0 }
 0xf96   :  { %v13158_v6 = vpop.eup %11078  ;;  %11098 = vpow2.f32 %v6396_v35  ;;  %v6410_v49 = vmul.f32 1.442695, %v6348_v15  ;;  %v6412_v17 = vmul.f32 1.442695, %v6349_v3 }
 0xf97   :  { %v13161_v61 = vpop.eup %11080  ;;  %v6497_v28 = vcombine.low %v13153_v37, %v13158_v6  ;;  %v6512_v27 = vrot.slane %v6496_v11, %v11493_v62  ;;  %11100 = vpow2.f32 %v6398_v51 }
 0xf98   :  { %v13166_v57 = vpop.eup %11082  ;;  %11102 = vpow2.f32 %v6400_v7 }
 0xf99   :  { %v13168_v21 = vpop.eup %11084  ;;  %v6498_v60 = vcombine.low %v13161_v61, %v13166_v57  ;;  %v6519_v43 = vrot.slane %v6497_v28, %v11493_v62  ;;  %v6527_v9 = vcombine.low %v6505_v12, %v6512_v27  ;;  %11104 = vpow2.f32 %v6402_v10 }
 0xf9a   :  { %v13173_v55 = vpop.eup %11086  ;;  %11106 = vpow2.f32 %v6404_v40 }
 0xf9b   :  { %v13175_v2 = vpop.eup %11088  ;;  %v6526_v29 = vrot.slane %v6498_v60, %v11493_v62  ;;  %v6544_v23 = vcombine.low %v13168_v21, %v13173_v55  ;;  %11108 = vpow2.f32 %v6406_v56  ;;  %v6535_v14 = vrot.slane %v6527_v9, %v11493_v62 }
 0xf9c   :  { %v13180_v4 = vpop.eup %11090  ;;  %11110 = vpow2.f32 %v6408_v33 }
 0xf9d   :  { %v13183_v50 = vpop.eup %11092  ;;  %v6528_v13 = vcombine.low %v6519_v43, %v6526_v29  ;;  %v6545_v8 = vcombine.low %v13175_v2, %v13180_v4  ;;  %v6554_v53 = vrot.slane %v6544_v23, %v11493_v62  ;;  %11112 = vpow2.f32 %v6410_v49 }
 0xf9e   :  { %v13188_v26 = vpop.eup %11094  ;;  %11114 = vpow2.f32 %v6412_v17 }
 0xf9f   :  { %v13190_v18 = vpop.eup %11096  ;;  %v6542_v48 = vrot.slane %v6528_v13, %v11493_v62  ;;  %v6546_v16 = vcombine.low %v13183_v50, %v13188_v26  ;;  %v6561_v35 = vrot.slane %v6545_v8, %v11493_v62 }
 0xfa0   :  { %v13196_v20 = vpop.eup %11098 }
 0xfa1   :  { %v13198_v36 = vpop.eup %11100  ;;  %v6543_v51 = vcombine.low %v6535_v14, %v6542_v48  ;;  %v6547_v0 = vcombine.low %v13190_v18, %v13196_v20  ;;  %v6568_v15 = vrot.slane %v6546_v16, %v11493_v62  ;;  %v6576_v7 = vcombine.low %v6554_v53, %v6561_v35 }
 0xfa2   :  { %v13203_v11 = vpop.eup %11102 }
 0xfa3   :  { %v13205_v12 = vpop.eup %11104  ;;  %v6649_v10 = vsel %vm1158_vm3, %v6543_v51, 0.0  ;;  %v6575_v3 = vrot.slane %v6547_v0, %v11493_v62  ;;  %v6593_v40 = vcombine.low %v13198_v36, %v13203_v11  ;;  %v6584_v33 = vrot.slane %v6576_v7, %v11493_v62 }
 0xfa4   :  { %v13211_v28 = vpop.eup %11106  ;;  %6650 = vadd.xlane.f32.xlu0 %v6649_v10 }
 0xfa5   :  { %v13213_v27 = vpop.eup %11108  ;;  %v6577_v56 = vcombine.low %v6568_v15, %v6575_v3  ;;  %v6594_v49 = vcombine.low %v13205_v12, %v13211_v28  ;;  %v6603_v60 = vrot.slane %v6593_v40, %v11493_v62 }
 0xfa6   :  { %v13219_v43 = vpop.eup %11110 }
 0xfa7   :  { %v13221_v9 = vpop.eup %11112  ;;  %v6591_v17 = vrot.slane %v6577_v56, %v11493_v62  ;;  %v6595_v29 = vcombine.low %v13213_v27, %v13219_v43  ;;  %v6610_v23 = vrot.slane %v6594_v49, %v11493_v62 }
 0xfa8   :  { %v13227_v14 = vpop.eup %11114 }
 0xfa9   :  { %v6592_v13 = vcombine.low %v6584_v33, %v6591_v17  ;;  %v6596_v8 = vcombine.low %v13221_v9, %v13227_v14  ;;  %v6617_v53 = vrot.slane %v6595_v29, %v11493_v62  ;;  %v6625_v48 = vcombine.low %v6603_v60, %v6610_v23 }
 0xfab   :  { %v6652_v16 = vsel %vm1158_vm3, %v6592_v13, 0.0  ;;  %v6624_v35 = vrot.slane %v6596_v8, %v11493_v62  ;;  %v6633_v0 = vrot.slane %v6625_v48, %v11493_v62 }
 0xfac   :  { %6653 = vadd.xlane.f32.xlu1 %v6652_v16 }
 0xfad   :  { %v6626_v51 = vcombine.low %v6617_v53, %v6624_v35 }
 0xfaf   :  { %v6640_v15 = vrot.slane %v6626_v51, %v11493_v62 }
 0xfb1   :  { %v6641_v7 = vcombine.low %v6633_v0, %v6640_v15 }
 0xfb3   :  { %v6655_v3 = vsel %vm1158_vm3, %v6641_v7, 0.0 }
 0xfb4   :  { %6656 = vadd.xlane.f32.xlu0 %v6655_v3 }
 0xfb7   :  { %v6648_v10 = vpop.xlane.xlu1 %6647 }
 0xfb8   :  { %11116 = vrcp.f32 %v6648_v10 }
 0xfbd   :  { %7045 = vrot.lane.b32.xlu1 %v12830_v24, %s11311_s3 }
 0xfc1   :  { %7309 = vrot.lane.b32.xlu1 %v12830_v24, %s11312_s14 }
 0xfc2   :  { %v11117_v40 = vpop.eup %11116 }
 0xfc3   :  { %v6669_v56 = vrot.slane %v11117_v40, %v11442_v31  ;;  %v6673_v33 = vrot.slane %v11117_v40, %v11445_v32  ;;  %v6677_v49 = vrot.slane %v11117_v40, %v11461_v45  ;;  %v6681_v60 = vrot.slane %v11117_v40, %v11663_v39 }
 0xfc4   :  { %v6685_v17 = vrot.slane %v11117_v40, %v11666_v42  ;;  %v6689_v29 = vrot.slane %v11117_v40, %v11669_v44  ;;  %v6693_v23 = vrot.slane %v11117_v40, %v11672_v46  ;;  %v6697_v13 = vrot.slane %v11117_v40, %v11675_v47 }
 0xfc5   :  { %v6826_v8 = vmul.f32 %v13065_v34, %v6669_v56  ;;  %v6827_v53 = vmul.f32 %v13067_v38, %v6673_v33  ;;  %v6828_v48 = vmul.f32 %v13069_v1, %v6677_v49  ;;  %v6829_v16 = vmul.f32 %v13073_v58, %v6681_v60  ;;  %7596 = vrot.lane.b32.xlu1 %v12805_v22, %s11311_s3 }
 0xfc6   :  { %v6830_v35 = vmul.f32 %v13075_v41, %v6685_v17  ;;  %v6831_v51 = vmul.f32 %v13080_v25, %v6689_v29  ;;  %v6832_v0 = vmul.f32 %v13082_v5, %v6693_v23  ;;  %v6833_v15 = vmul.f32 %v13087_v59, %v6697_v13 }
 0xfc7   :  { %v6866_v7 = vcombine.low %v6826_v8, %v6827_v53  ;;  %v6867_v10 = vcombine.low %v6828_v48, %v6829_v16  ;;  %v13272_v33 = vmul.f32 0.17677669, %v12801_v63  ;;  %v14262_v49 = vmov 0.0  }
 0xfc8   :  { %v6868_v34 = vcombine.low %v6830_v35, %v6831_v51  ;;  %v6869_v3 = vcombine.low %v6832_v0, %v6833_v15 }
 0xfc9   :  { %v6876_v38 = vrot.slane %v6866_v7, %v11493_v62  ;;  %v6883_v1 = vrot.slane %v6867_v10, %v11493_v62  ;;  %7674 = vrot.lane.b32.xlu1 %v12805_v22, %s11302_s23 }
 0xfca   :  { %v6890_v58 = vrot.slane %v6868_v34, %v11493_v62  ;;  %v6897_v41 = vrot.slane %v6869_v3, %v11493_v62  ;;  %7177 = vrot.lane.b32.xlu0 %v12830_v24, %s11302_s23 }
 0xfcb   :  { %v6898_v25 = vcombine.low %v6876_v38, %v6883_v1 }
 0xfcc   :  { %v6899_v5 = vcombine.low %v6890_v58, %v6897_v41 }
 0xfcd   :  { %v6906_v59 = vrot.slane %v6898_v25, %v11493_v62  ;;  %7752 = vrot.lane.b32.xlu1 %v12805_v22, %s11312_s14 }
 0xfce   :  { %v6913_v40 = vrot.slane %v6899_v5, %v11493_v62  ;;  %7594 = vrot.lane.b32.xlu0 %v13272_v33, %s11311_s3 }
 0xfd0   :  { %v13269_v56 = vcombine.low %v6906_v59, %v6913_v40 }
 0xfd2   :  { %14261 = vst [vmem:[#allocation26_spill] sm:$0xff] %v13269_v56  ;;  %10625 = vmatmul.mubr.msk.f32.vlgmr.msra.gmra.mrb[50].mxu1 %vm1158_vm3, %v13269_v56  ;;  %7672 = vrot.lane.b32.xlu0 %v13272_v33, %s11302_s23 }
 0xfd3   :  { %10629 = vmatprep.mubr.msk.f32.mxu1 %vm11310_vm0, %v14262_v49 }
 0xfd6   :  { %7750 = vrot.lane.b32.xlu0 %v13272_v33, %s11312_s14 }
0x1031   :  { %v6651_v63 = vpop.xlane.xlu0 %6650 }
0x1032   :  { %11118 = vrcp.f32 %v6651_v63 }
0x1039   :  { %v6654_v24 = vpop.xlane.xlu1 %6653 }
0x103a   :  { %11120 = vrcp.f32 %v6654_v24 }
0x103c   :  { %v11119_v60 = vpop.eup %11118 }
0x103d   :  { %v7046_v17 = vpop.permute.xlu1 %7045  ;;  %v6701_v29 = vrot.slane %v11119_v60, %v11442_v31  ;;  %v6705_v23 = vrot.slane %v11119_v60, %v11445_v32  ;;  %v6709_v13 = vrot.slane %v11119_v60, %v11461_v45  ;;  %v6713_v8 = vrot.slane %v11119_v60, %v11663_v39 }
0x103e   :  { %10628 = vmatpush3.msra.mxu1 %v7046_v17  ;;  %v6717_v53 = vrot.slane %v11119_v60, %v11666_v42  ;;  %v6721_v48 = vrot.slane %v11119_v60, %v11669_v44  ;;  %v6725_v16 = vrot.slane %v11119_v60, %v11672_v46  ;;  %v6729_v35 = vrot.slane %v11119_v60, %v11675_v47 }
0x103f   :  { %10632 = vmatprep.subr.mxu1 %v14262_v49  ;;  %v6834_v51 = vmul.f32 %v13135_v30, %v6701_v29  ;;  %v6835_v0 = vmul.f32 %v13140_v54, %v6705_v23  ;;  %v6836_v15 = vmul.f32 %v13144_v19, %v6709_v13  ;;  %v6837_v7 = vmul.f32 %v13149_v52, %v6713_v8 }
0x1040   :  { %v6838_v10 = vmul.f32 %v13153_v37, %v6717_v53  ;;  %v6839_v34 = vmul.f32 %v13158_v6, %v6721_v48  ;;  %v6840_v3 = vmul.f32 %v13161_v61, %v6725_v16  ;;  %v6841_v38 = vmul.f32 %v13166_v57, %v6729_v35 }
0x1041   :  { %v6657_v1 = vpop.xlane.xlu0 %6656  ;;  %v6995_v58 = vcombine.low %v6834_v51, %v6835_v0  ;;  %v6996_v41 = vcombine.low %v6836_v15, %v6837_v7 }
0x1042   :  { %11122 = vrcp.f32 %v6657_v1  ;;  %v6997_v25 = vcombine.low %v6838_v10, %v6839_v34  ;;  %v6998_v30 = vcombine.low %v6840_v3, %v6841_v38 }
0x1043   :  { %v7005_v54 = vrot.slane %v6995_v58, %v11493_v62  ;;  %v7012_v19 = vrot.slane %v6996_v41, %v11493_v62 }
0x1044   :  { %v11121_v5 = vpop.eup %11120  ;;  %v7019_v52 = vrot.slane %v6997_v25, %v11493_v62  ;;  %v7026_v37 = vrot.slane %v6998_v30, %v11493_v62 }
0x1045   :  { %v7027_v6 = vcombine.low %v7005_v54, %v7012_v19  ;;  %v6733_v61 = vrot.slane %v11121_v5, %v11442_v31  ;;  %v6737_v57 = vrot.slane %v11121_v5, %v11445_v32  ;;  %v6741_v59 = vrot.slane %v11121_v5, %v11461_v45 }
0x1046   :  { %v7028_v40 = vcombine.low %v7019_v52, %v7026_v37  ;;  %v6745_v63 = vrot.slane %v11121_v5, %v11663_v39  ;;  %v6749_v24 = vrot.slane %v11121_v5, %v11666_v42  ;;  %v6753_v60 = vrot.slane %v11121_v5, %v11669_v44 }
0x1047   :  { %v7035_v17 = vrot.slane %v7027_v6, %v11493_v62  ;;  %v6757_v29 = vrot.slane %v11121_v5, %v11672_v46  ;;  %v6761_v23 = vrot.slane %v11121_v5, %v11675_v47  ;;  %v6842_v13 = vmul.f32 %v13168_v21, %v6733_v61 }
0x1048   :  { %v7042_v8 = vrot.slane %v7028_v40, %v11493_v62  ;;  %v6843_v53 = vmul.f32 %v13173_v55, %v6737_v57  ;;  %v6844_v48 = vmul.f32 %v13175_v2, %v6741_v59  ;;  %v6845_v16 = vmul.f32 %v13180_v4, %v6745_v63  ;;  %v7178_v55 = vpop.permute.xlu0 %7177 }
0x1049   :  { %v6846_v35 = vmul.f32 %v13183_v50, %v6749_v24  ;;  %v6847_v51 = vmul.f32 %v13188_v26, %v6753_v60  ;;  %v6848_v0 = vmul.f32 %v13190_v18, %v6757_v29  ;;  %v6849_v15 = vmul.f32 %v13196_v20, %v6761_v23 }
0x104a   :  { %v13325_v7 = vcombine.low %v7035_v17, %v7042_v8  ;;  %v7128_v10 = vcombine.low %v6842_v13, %v6843_v53  ;;  %v7129_v21 = vcombine.low %v6844_v48, %v6845_v16  ;;  %v7310_v8 = vpop.permute.xlu1 %7309 }
0x104b   :  { %v7130_v34 = vcombine.low %v6846_v35, %v6847_v51  ;;  %v7131_v3 = vcombine.low %v6848_v0, %v6849_v15  ;;  %v14266_v15 = vld [vmem:[#allocation25_spill] sm:$0xff] }
0x104c   :  { %14263 = vst [vmem:[#allocation27_spill] sm:$0xff] %v13325_v7  ;;  %v11123_v38 = vpop.eup %11122  ;;  %10630 = vmatmul.mubr.msk.f32.vlgmr.msra.gmra.mrb[52].mxu1 %vm1158_vm3, %v13325_v7  ;;  %v7138_v2 = vrot.slane %v7128_v10, %v11493_v62  ;;  %v7145_v4 = vrot.slane %v7129_v21, %v11493_v62  ;;  %v7595_v35 = vpop.permute.xlu0 %7594 }
0x104d   :  { %10633 = vmatpush3.msra.mxu1 %v7178_v55  ;;  %10634 = vmatprep.mubr.msk.f32.mxu1 %vm11310_vm0, %v14262_v49  ;;  %v7152_v50 = vrot.slane %v7130_v34, %v11493_v62  ;;  %v7159_v26 = vrot.slane %v7131_v3, %v11493_v62  ;;  %v6765_v18 = vrot.slane %v11123_v38, %v11442_v31 }
0x104e   :  { %10637 = vmatprep.subr.mxu1 %v14262_v49  ;;  %v7160_v20 = vcombine.low %v7138_v2, %v7145_v4  ;;  %v6769_v1 = vrot.slane %v11123_v38, %v11445_v32  ;;  %v6773_v58 = vrot.slane %v11123_v38, %v11461_v45  ;;  %v6777_v41 = vrot.slane %v11123_v38, %v11663_v39  ;;  %v7597_v16 = vpop.permute.xlu1 %7596 }
0x104f   :  { %v7161_v25 = vcombine.low %v7152_v50, %v7159_v26  ;;  %v6781_v30 = vrot.slane %v11123_v38, %v11666_v42  ;;  %v6785_v54 = vrot.slane %v11123_v38, %v11669_v44  ;;  %v6789_v19 = vrot.slane %v11123_v38, %v11672_v46 }
0x1050   :  { %v7168_v5 = vrot.slane %v7160_v20, %v11493_v62  ;;  %v6793_v52 = vrot.slane %v11123_v38, %v11675_v47  ;;  %v6850_v37 = vmul.f32 %v13198_v36, %v6765_v18  ;;  %v6851_v6 = vmul.f32 %v13203_v11, %v6769_v1 }
0x1051   :  { %v7175_v61 = vrot.slane %v7161_v25, %v11493_v62  ;;  %v6852_v57 = vmul.f32 %v13205_v12, %v6773_v58  ;;  %v6853_v59 = vmul.f32 %v13211_v28, %v6777_v41  ;;  %v6854_v40 = vmul.f32 %v13213_v27, %v6781_v30 }
0x1052   :  { %v6855_v63 = vmul.f32 %v13219_v43, %v6785_v54  ;;  %v6856_v24 = vmul.f32 %v13221_v9, %v6789_v19  ;;  %v6857_v60 = vmul.f32 %v13227_v14, %v6793_v52  ;;  %v7260_v17 = vcombine.low %v6850_v37, %v6851_v6  ;;  %v7675_v51 = vpop.permute.xlu1 %7674 }
0x1053   :  { %v13354_v29 = vcombine.low %v7168_v5, %v7175_v61  ;;  %v7261_v36 = vcombine.low %v6852_v57, %v6853_v59 }
0x1054   :  { %v7262_v23 = vcombine.low %v6854_v40, %v6855_v63  ;;  %v7263_v11 = vcombine.low %v6856_v24, %v6857_v60  ;;  %v7270_v13 = vrot.slane %v7260_v17, %v11493_v62 }
0x1055   :  { %14264 = vst [vmem:[#allocation28_spill] sm:$0xff] %v13354_v29  ;;  %10635 = vmatmul.mubr.msk.f32.vlgmr.msra.gmra.mrb[54].mxu1 %vm1158_vm3, %v13354_v29  ;;  %v7277_v12 = vrot.slane %v7261_v36, %v11493_v62 }
0x1056   :  { %10638 = vmatpush3.msra.mxu1 %v7310_v8  ;;  %10639 = vmatprep.mubr.msk.f32.mxu1 %vm11310_vm0, %v14262_v49  ;;  %v7284_v28 = vrot.slane %v7262_v23, %v11493_v62  ;;  %v7291_v27 = vrot.slane %v7263_v11, %v11493_v62  ;;  %v7753_v0 = vpop.permute.xlu1 %7752 }
0x1057   :  { %v7292_v43 = vcombine.low %v7270_v13, %v7277_v12  ;;  %10662 = vmatprep.subr.mxu1 %v14262_v49 }
0x1058   :  { %v7293_v9 = vcombine.low %v7284_v28, %v7291_v27 }
0x1059   :  { %v7300_v14 = vrot.slane %v7292_v43, %v11493_v62 }
0x105a   :  { %v7307_v53 = vrot.slane %v7293_v9, %v11493_v62 }
0x105c   :  { %v13367_v48 = vcombine.low %v7300_v14, %v7307_v53 }
0x105e   :  { %14265 = vst [vmem:[#allocation31_spill] sm:$0xff] %v13367_v48  ;;  %10640 = vmatmul.mubr.msk.f32.vlgmr.msra.gmra.mrb[56].mxu1 %vm1158_vm3, %v13367_v48 }
0x105f   :  { %10663 = vmatpush3.xpose.msk.msra.mxu1 %vm349_vm1, %v12805_v22  ;;  %10664 = vmatprep.mubr.msk.f32.mxu1 %vm11310_vm0, %v14262_v49  ;;  %v7673_v22 = vpop.permute.xlu0 %7672 }
0x1060   :  { %10667 = vmatprep.subr.mxu1 %v14262_v49 }
0x1062   :  { %10665 = vmatmul.mubr.msk.f32.vlgmr.msra.gmra.mrb[58].mxu1 %vm349_vm1, %v13272_v33 }
0x1063   :  { %10668 = vmatpush3.xpose.msk.msra.mxu1 %vm349_vm1, %v7597_v16  ;;  %10669 = vmatprep.mubr.msk.f32.mxu1 %vm11310_vm0, %v14262_v49  ;;  %v7751_v33 = vpop.permute.xlu0 %7750 }
0x1064   :  { %10672 = vmatprep.subr.mxu1 %v14262_v49 }
0x1066   :  { %10670 = vmatmul.mubr.msk.f32.vlgmr.msra.gmra.mrb[60].mxu1 %vm349_vm1, %v7595_v35 }
0x1067   :  { %10673 = vmatpush3.xpose.msk.msra.mxu1 %vm349_vm1, %v7675_v51  ;;  %10674 = vmatprep.mubr.msk.f32.mxu1 %vm11310_vm0, %v14262_v49 }
0x1068   :  { %10677 = vmatprep.subr.mxu1 %v14262_v49 }
0x106a   :  { %10675 = vmatmul.mubr.msk.f32.vlgmr.msra.gmra.mrb[62].mxu1 %vm349_vm1, %v7673_v22 }
0x106b   :  { %10678 = vmatpush3.xpose.msk.msra.mxu1 %vm349_vm1, %v7753_v0  ;;  %10679 = vmatprep.mubr.msk.f32.mxu1 %vm11310_vm0, %v14262_v49 }
0x106c   :  { %10682 = vmatprep.subr.mxu1 %v14262_v49 }
0x106e   :  { %10680 = vmatmul.mubr.msk.f32.vlgmr.msra.gmra.mrb[64].mxu1 %vm349_vm1, %v7751_v33 }
0x106f   :  { %10683 = vmatpush3.msra.mxu1 %v14266_v15  ;;  %10684 = vmatprep.mubr.msk.f32.mxu1 %vm11310_vm0, %v14262_v49 }
0x1070   :  { %10687 = vmatprep.subr.mxu1 %v14262_v49 }
0x10a5   :  { %v13397_v10 = vpop.f32.mrb[50].mxu1 }
0x10a6   :  { %14267 = vst [vmem:[#allocation30_spill] sm:$0xff] %v13397_v10  ;;  %v10626_v21 = vpop.f32.mrb[51].mxu1 }
0x111f   :  { %v13399_v34 = vpop.f32.mrb[52].mxu1 }
0x1120   :  { %14268 = vst [vmem:[#allocation32_spill] sm:$0xff] %v13399_v34  ;;  %v10631_v3 = vpop.f32.mrb[53].mxu1 }
0x1128   :  { %v13401_v38 = vpop.f32.mrb[54].mxu1 }
0x1129   :  { %14269 = vst [vmem:[#allocation33_spill] sm:$0xff] %v13401_v38  ;;  %v10636_v55 = vpop.f32.mrb[55].mxu1 }
0x1131   :  { %v13403_v2 = vpop.f32.mrb[56].mxu1 }
0x1132   :  { %14270 = vst [vmem:[#allocation34_spill] sm:$0xff] %v13403_v2  ;;  %v10641_v4 = vpop.f32.mrb[57].mxu1 }
0x1135   :  { %v7590_v50 = vpop.f32.mrb[58].mxu1 }
0x1136   :  { %v7832_v26 = vcombine.high %v7590_v50, %v7590_v50  ;;  %v7839_v18 = vrot.slane %v7590_v50, %v11493_v62  ;;  %v10666_v20 = vpop.f32.mrb[59].mxu1 }
0x1138   :  { %v7846_v1 = vrot.slane %v7832_v26, %v11493_v62  ;;  %v7847_v58 = vcombine.high %v7839_v18, %v7839_v18  ;;  %v7855_v41 = vrot.slane %v7839_v18, %v11493_v62 }
0x1139   :  { %v7668_v25 = vpop.f32.mrb[60].mxu1 }
0x113a   :  { %v7848_v30 = vcombine.high %v7846_v1, %v7846_v1  ;;  %v7862_v54 = vrot.slane %v7846_v1, %v11493_v62  ;;  %v7869_v19 = vrot.slane %v7847_v58, %v11493_v62  ;;  %v7877_v5 = vcombine.high %v7855_v41, %v7855_v41  ;;  %v10671_v52 = vpop.f32.mrb[61].mxu1 }
0x113b   :  { %v7881_v37 = vcombine.high %v7668_v25, %v7668_v25  ;;  %v7888_v6 = vrot.slane %v7668_v25, %v11493_v62  ;;  %v13418_v24 = vsel %vm82_vm4, -1e+09, %v7855_v41 }
0x113c   :  { %v7876_v61 = vrot.slane %v7848_v30, %v11493_v62  ;;  %v7878_v57 = vcombine.high %v7862_v54, %v7862_v54  ;;  %v7879_v59 = vcombine.high %v7869_v19, %v7869_v19  ;;  %v13414_v63 = vsel %vm82_vm4, -1e+09, %v7869_v19 }
0x113d   :  { %v13422_v60 = vsel %vm82_vm4, -1e+09, %v7877_v5  ;;  %v7895_v17 = vrot.slane %v7881_v37, %v11493_v62  ;;  %v7746_v36 = vpop.f32.mrb[62].mxu1  ;;  %v8124_v8 = vcombine.low %v13418_v24, %v13414_v63  ;;  %v13437_v12 = vsel %vm82_vm4, -1e+09, %v7862_v54 }
0x113e   :  { %v7880_v23 = vcombine.high %v7876_v61, %v7876_v61  ;;  %v13427_v11 = vsel %vm82_vm4, -1e+09, %v7879_v59  ;;  %v13431_v13 = vsel %vm82_vm4, -1e+09, %v7876_v61  ;;  %v13441_v28 = vsel %vm82_vm4, -1e+09, %v7878_v57 }
0x113f   :  { %v7896_v27 = vcombine.high %v7888_v6, %v7888_v6  ;;  %v7897_v43 = vcombine.high %v7895_v17, %v7895_v17  ;;  %v10676_v9 = vpop.f32.mrb[63].mxu1  ;;  %v8125_v14 = vcombine.low %v13422_v60, %v13427_v11  ;;  %v7904_v16 = vrot.slane %v7888_v6, %v11493_v62 }
0x1140   :  { %v7911_v35 = vrot.slane %v7895_v17, %v11493_v62  ;;  %v7930_v0 = vcombine.high %v7746_v36, %v7746_v36  ;;  %v7937_v33 = vrot.slane %v7746_v36, %v11493_v62  ;;  %v13456_v50 = vsel %vm82_vm4, -1e+09, %v7880_v23 }
0x1141   :  { %v7918_v51 = vrot.slane %v7896_v27, %v11493_v62  ;;  %v13451_v22 = vrot.slane %v7897_v43, %v11493_v62  ;;  %v7824_v21 = vpop.f32.mrb[64].mxu1  ;;  %v7926_v3 = vcombine.high %v7904_v16, %v7904_v16  ;;  %v13459_v26 = vrot.slane %v8124_v8, %v11493_v62 }
0x1142   :  { %v7927_v55 = vcombine.high %v7911_v35, %v7911_v35  ;;  %v10681_v4 = vpop.f32.mrb[65].mxu1  ;;  %v13463_v20 = vsel %vm82_vm4, -1e+09, %v7904_v16  ;;  %v13482_v30 = vsel %vm82_vm4, -1e+09, %v7911_v35  ;;  %v7944_v5 = vrot.slane %v7930_v0, %v11493_v62 }
0x1143   :  { %v7928_v18 = vcombine.high %v7918_v51, %v7918_v51  ;;  %v13467_v1 = vsel %vm82_vm4, -1e+09, %v7918_v51  ;;  %v13472_v58 = vsel %vm82_vm4, -1e+09, %v13451_v22  ;;  %v7929_v41 = vcombine.high %v13451_v22, %v13451_v22 }
0x1144   :  { %v13478_v25 = vsel %vm82_vm4, -1e+09, %v7926_v3  ;;  %v13486_v54 = vsel %vm82_vm4, -1e+09, %v7927_v55  ;;  %v7945_v52 = vcombine.high %v7937_v33, %v7937_v33  ;;  %v7953_v37 = vrot.slane %v7937_v33, %v11493_v62 }
0x1145   :  { %v13490_v19 = vsel %vm82_vm4, -1e+09, %v7928_v18  ;;  %v8173_v6 = vcombine.low %v13463_v20, %v13467_v1  ;;  %v8175_v61 = vcombine.low %v13482_v30, %v13472_v58  ;;  %v7979_v57 = vcombine.high %v7824_v21, %v7824_v21 }
0x1146   :  { %v7986_v59 = vrot.slane %v7824_v21, %v11493_v62  ;;  %v7946_v17 = vcombine.high %v7944_v5, %v7944_v5  ;;  %v7960_v36 = vrot.slane %v7944_v5, %v11493_v62  ;;  %v7967_v23 = vrot.slane %v7945_v52, %v11493_v62 }
0x1147   :  { %v7975_v8 = vcombine.high %v7953_v37, %v7953_v37  ;;  %v8174_v27 = vcombine.low %v13478_v25, %v13490_v19  ;;  %v7993_v43 = vrot.slane %v7979_v57, %v11493_v62  ;;  %v13512_v33 = vsel %vm82_vm4, -1e+09, %v7953_v37 }
0x1148   :  { %v7994_v9 = vcombine.high %v7986_v59, %v7986_v59  ;;  %v8002_v16 = vrot.slane %v7986_v59, %v11493_v62  ;;  %v7974_v35 = vrot.slane %v7946_v17, %v11493_v62  ;;  %v7976_v51 = vcombine.high %v7960_v36, %v7960_v36 }
0x1149   :  { %v7977_v22 = vcombine.high %v7967_v23, %v7967_v23  ;;  %v13508_v0 = vsel %vm82_vm4, -1e+09, %v7967_v23  ;;  %v13516_v21 = vsel %vm82_vm4, -1e+09, %v7975_v8  ;;  %v7995_v3 = vcombine.high %v7993_v43, %v7993_v43 }
0x114a   :  { %v8127_v55 = vcombine.low %v13441_v28, %v13456_v50  ;;  %v13526_v18 = vsel %vm82_vm4, -1e+09, %v7960_v36  ;;  %v13530_v5 = vsel %vm82_vm4, -1e+09, %v7974_v35  ;;  %v8222_v52 = vcombine.low %v13512_v33, %v13508_v0 }
0x114b   :  { %v13522_v4 = vsel %vm82_vm4, -1e+09, %v7977_v22  ;;  %v7978_v37 = vcombine.high %v7974_v35, %v7974_v35  ;;  %v13536_v57 = vsel %vm82_vm4, -1e+09, %v7976_v51  ;;  %v8009_v59 = vrot.slane %v7993_v43, %v11493_v62 }
0x114c   :  { %v8016_v17 = vrot.slane %v7994_v9, %v11493_v62  ;;  %v8223_v36 = vcombine.low %v13516_v21, %v13522_v4  ;;  %v8023_v23 = vrot.slane %v7995_v3, %v11493_v62  ;;  %v8024_v8 = vcombine.high %v8002_v16, %v8002_v16 }
0x114d   :  { %v8141_v22 = vrot.slane %v8125_v14, %v11493_v62  ;;  %v8224_v53 = vcombine.low %v13526_v18, %v13530_v5  ;;  %v8025_v35 = vcombine.high %v8009_v59, %v8009_v59  ;;  %v13552_v9 = vsel %vm82_vm4, -1e+09, %v8002_v16 }
0x114e   :  { %v8026_v56 = vcombine.high %v8016_v17, %v8016_v17  ;;  %v13548_v51 = vsel %vm82_vm4, -1e+09, %v8016_v17  ;;  %v8027_v43 = vcombine.high %v8023_v23, %v8023_v23  ;;  %v13556_v3 = vsel %vm82_vm4, -1e+09, %v8024_v8 }
0x114f   :  { %v13560_v14 = vsel %vm82_vm4, -1e+09, %v8009_v59  ;;  %v13568_v17 = vsel %vm82_vm4, -1e+09, %v8023_v23  ;;  %v13572_v16 = vsel %vm82_vm4, -1e+09, %v8025_v35  ;;  %v8271_v8 = vcombine.low %v13552_v9, %v13548_v51 }
0x1150   :  { %v13564_v48 = vsel %vm82_vm4, -1e+09, %v8026_v56  ;;  %v14273_v59 = vcombine.low %v13437_v12, %v13431_v13  ;;  %v8155_v7 = vrot.slane %v8127_v55, %v11493_v62  ;;  %v8156_v56 = vcombine.low %v13459_v26, %v8141_v22 }
0x1151   :  { %14272 = vst [vmem:[#allocation35_spill] sm:$0xff] %v13564_v48  ;;  %v13584_v23 = vsel %vm82_vm4, -1e+09, %v7929_v41  ;;  %v8272_v35 = vcombine.low %v13556_v3, %v13564_v48  ;;  %v8183_v38 = vrot.slane %v8173_v6, %v11493_v62  ;;  %v8190_v2 = vrot.slane %v8174_v27, %v11493_v62 }
0x1152   :  { %v8148_v29 = vrot.slane %v14273_v59, %v11493_v62  ;;  %v8176_v10 = vcombine.low %v13486_v54, %v13584_v23  ;;  %v8197_v59 = vrot.slane %v8175_v61, %v11493_v62  ;;  %v13595_v26 = vsel %vm82_vm4, -1e+09, %v7978_v37 }
0x1153   :  { %v8232_v41 = vrot.slane %v8222_v52, %v11493_v62  ;;  %v8205_v22 = vcombine.low %v8183_v38, %v8190_v2  ;;  %v8225_v15 = vcombine.low %v13536_v57, %v13595_v26  ;;  %v8239_v48 = vrot.slane %v8223_v36, %v11493_v62 }
0x1154   :  { %v8157_v34 = vcombine.low %v8148_v29, %v8155_v7  ;;  %v8204_v55 = vrot.slane %v8176_v10, %v11493_v62  ;;  %v8273_v6 = vcombine.low %v13560_v14, %v13568_v17  ;;  %v8164_v7 = vrot.slane %v8156_v56, %v11493_v62 }
0x1155   :  { %v13608_v61 = vsel %vm82_vm4, -1e+09, %v8027_v43  ;;  %v8246_v10 = vrot.slane %v8224_v53, %v11493_v62  ;;  %v8253_v38 = vrot.slane %v8225_v15, %v11493_v62  ;;  %v8254_v2 = vcombine.low %v8232_v41, %v8239_v48 }
0x1156   :  { %v8171_v29 = vrot.slane %v8157_v34, %v11493_v62  ;;  %v8206_v27 = vcombine.low %v8197_v59, %v8204_v55  ;;  %v8274_v37 = vcombine.low %v13572_v16, %v13608_v61  ;;  %v8281_v36 = vrot.slane %v8271_v8, %v11493_v62 }
0x1157   :  { %v8288_v56 = vrot.slane %v8272_v35, %v11493_v62  ;;  %v8213_v34 = vrot.slane %v8205_v22, %v11493_v62  ;;  %v8255_v43 = vcombine.low %v8246_v10, %v8253_v38  ;;  %v8295_v53 = vrot.slane %v8273_v6, %v11493_v62 }
0x1158   :  { %v8172_v52 = vcombine.low %v8164_v7, %v8171_v29  ;;  %v8220_v40 = vrot.slane %v8206_v27, %v11493_v62  ;;  %v8302_v15 = vrot.slane %v8274_v37, %v11493_v62  ;;  %v8262_v55 = vrot.slane %v8254_v2, %v11493_v62 }
0x1159   :  { %v8303_v48 = vcombine.low %v8281_v36, %v8288_v56  ;;  %v8269_v8 = vrot.slane %v8255_v43, %v11493_v62 }
0x115a   :  { %v8324_v59 = vsel %vm1158_vm3, %v8172_v52, -inf  ;;  %v8221_v41 = vcombine.low %v8213_v34, %v8220_v40  ;;  %v8304_v7 = vcombine.low %v8295_v53, %v8302_v15  ;;  %v13628_v52 = vld [vmem:[#allocation5 + $0x40] sm:$0xff]  }
0x115b   :  { %8325 = vmax.xlane.f32.xlu1 %v8324_v59  ;;  %v8270_v22 = vcombine.low %v8262_v55, %v8269_v8  ;;  %v8311_v29 = vrot.slane %v8303_v48, %v11493_v62  ;;  %10643 = vmatpush3.bf16.msra.mxu0 %v13628_v52 }
0x115c   :  { %v8327_v35 = vsel %vm1158_vm3, %v8221_v41, -inf  ;;  %v8318_v27 = vrot.slane %v8304_v7, %v11493_v62  ;;  %10644 = vmatprep.subr.bf16.mxu0 %v14262_v49 }
0x115d   :  { %8328 = vmax.xlane.f32.xlu0 %v8327_v35  ;;  %v8330_v6 = vsel %vm1158_vm3, %v8270_v22, -inf }
0x115e   :  { %v8319_v10 = vcombine.low %v8311_v29, %v8318_v27 }
0x1160   :  { %v8333_v38 = vsel %vm1158_vm3, %v8319_v10, -inf }
0x1161   :  { %8331 = vmax.xlane.f32.xlu0 %v8330_v6  ;;  %8334 = vmax.xlane.f32.xlu1 %v8333_v38 }
0x11e8   :  { %v8326_v2 = vpop.xlane.xlu1 %8325 }
0x11e9   :  { %v8343_v37 = vrot.slane %v8326_v2, %v11442_v31  ;;  %v8347_v36 = vrot.slane %v8326_v2, %v11445_v32  ;;  %v8351_v56 = vrot.slane %v8326_v2, %v11461_v45  ;;  %v8355_v34 = vrot.slane %v8326_v2, %v11663_v39 }
0x11ea   :  { %v8329_v40 = vpop.xlane.xlu0 %8328  ;;  %v8359_v43 = vrot.slane %v8326_v2, %v11666_v42  ;;  %v8363_v59 = vrot.slane %v8326_v2, %v11669_v44  ;;  %v8367_v53 = vrot.slane %v8326_v2, %v11672_v46  ;;  %v8371_v15 = vrot.slane %v8326_v2, %v11675_v47 }
0x11eb   :  { %v8500_v48 = vsub.f32 %v13418_v24, %v8343_v37  ;;  %v8501_v41 = vsub.f32 %v13414_v63, %v8347_v36  ;;  %v8502_v55 = vsub.f32 %v13422_v60, %v8351_v56  ;;  %v8375_v8 = vrot.slane %v8329_v40, %v11442_v31 }
0x11ec   :  { %v8503_v7 = vsub.f32 %v13427_v11, %v8355_v34  ;;  %v8379_v35 = vrot.slane %v8329_v40, %v11445_v32  ;;  %v8383_v22 = vrot.slane %v8329_v40, %v11461_v45  ;;  %v8387_v29 = vrot.slane %v8329_v40, %v11663_v39 }
0x11ed   :  { %v8504_v27 = vsub.f32 %v13437_v12, %v8359_v43  ;;  %v8505_v6 = vsub.f32 %v13431_v13, %v8363_v59  ;;  %v8391_v24 = vrot.slane %v8329_v40, %v11666_v42  ;;  %v8395_v63 = vrot.slane %v8329_v40, %v11669_v44 }
0x11ee   :  { %v8506_v60 = vsub.f32 %v13441_v28, %v8367_v53  ;;  %v8507_v10 = vsub.f32 %v13456_v50, %v8371_v15  ;;  %v8399_v11 = vrot.slane %v8329_v40, %v11672_v46  ;;  %v8403_v38 = vrot.slane %v8329_v40, %v11675_v47  ;;  %v8332_v43 = vpop.xlane.xlu0 %8331 }
0x11ef   :  { %v8508_v2 = vsub.f32 %v13463_v20, %v8375_v8  ;;  %v8532_v37 = vmul.f32 1.442695, %v8500_v48  ;;  %v8534_v36 = vmul.f32 1.442695, %v8501_v41  ;;  %v8536_v56 = vmul.f32 1.442695, %v8502_v55 }
0x11f0   :  { %v8509_v12 = vsub.f32 %v13467_v1, %v8379_v35  ;;  %v8510_v13 = vsub.f32 %v13478_v25, %v8383_v22  ;;  %v8511_v34 = vsub.f32 %v13490_v19, %v8387_v29  ;;  %v8538_v59 = vmul.f32 1.442695, %v8503_v7 }
0x11f1   :  { %v8512_v28 = vsub.f32 %v13482_v30, %v8391_v24  ;;  %v8513_v50 = vsub.f32 %v13472_v58, %v8395_v63  ;;  %11124 = vpow2.f32 %v8532_v37  ;;  %v8540_v53 = vmul.f32 1.442695, %v8504_v27  ;;  %v13676_v24 = vpop.xlane.xlu1 %8334 }
0x11f2   :  { %v8514_v40 = vsub.f32 %v13486_v54, %v8399_v11  ;;  %v8515_v20 = vsub.f32 %v13584_v23, %v8403_v38  ;;  %11126 = vpow2.f32 %v8534_v36  ;;  %v8542_v15 = vmul.f32 1.442695, %v8505_v6 }
0x11f3   :  { %v8407_v1 = vrot.slane %v8332_v43, %v11442_v31  ;;  %v8411_v25 = vrot.slane %v8332_v43, %v11445_v32  ;;  %11128 = vpow2.f32 %v8536_v56  ;;  %v8544_v19 = vmul.f32 1.442695, %v8506_v60 }
0x11f4   :  { %v8415_v48 = vrot.slane %v8332_v43, %v11461_v45  ;;  %v8419_v30 = vrot.slane %v8332_v43, %v11663_v39  ;;  %11130 = vpow2.f32 %v8538_v59  ;;  %v8546_v58 = vmul.f32 1.442695, %v8507_v10 }
0x11f5   :  { %v8423_v41 = vrot.slane %v8332_v43, %v11666_v42  ;;  %v8427_v54 = vrot.slane %v8332_v43, %v11669_v44  ;;  %11132 = vpow2.f32 %v8540_v53  ;;  %v8548_v23 = vmul.f32 1.442695, %v8508_v2 }
0x11f6   :  { %v8431_v55 = vrot.slane %v8332_v43, %v11672_v46  ;;  %v8435_v8 = vrot.slane %v8332_v43, %v11675_v47  ;;  %11134 = vpow2.f32 %v8542_v15  ;;  %v8550_v7 = vmul.f32 1.442695, %v8509_v12 }
0x11f7   :  { %v8516_v35 = vsub.f32 %v13512_v33, %v8407_v1  ;;  %v8517_v22 = vsub.f32 %v13508_v0, %v8411_v25  ;;  %11136 = vpow2.f32 %v8544_v19  ;;  %v8552_v29 = vmul.f32 1.442695, %v8510_v13 }
0x11f8   :  { %v8518_v27 = vsub.f32 %v13516_v21, %v8415_v48  ;;  %v8519_v6 = vsub.f32 %v13522_v4, %v8419_v30  ;;  %11138 = vpow2.f32 %v8546_v58  ;;  %v8554_v63 = vmul.f32 1.442695, %v8511_v34 }
0x11f9   :  { %v8520_v60 = vsub.f32 %v13526_v18, %v8423_v41  ;;  %v8521_v10 = vsub.f32 %v13530_v5, %v8427_v54  ;;  %11140 = vpow2.f32 %v8548_v23  ;;  %v8556_v11 = vmul.f32 1.442695, %v8512_v28 }
0x11fa   :  { %v8522_v33 = vsub.f32 %v13536_v57, %v8431_v55  ;;  %v8523_v0 = vsub.f32 %v13595_v26, %v8435_v8  ;;  %11142 = vpow2.f32 %v8550_v7  ;;  %v8558_v38 = vmul.f32 1.442695, %v8513_v50 }
0x11fb   :  { %v13682_v2 = vpop.eup %11124  ;;  %v8439_v21 = vrot.slane %v13676_v24, %v11442_v31  ;;  %v8443_v4 = vrot.slane %v13676_v24, %v11445_v32  ;;  %11144 = vpow2.f32 %v8552_v29  ;;  %v8560_v18 = vmul.f32 1.442695, %v8514_v40 }
0x11fc   :  { %v13688_v37 = vpop.eup %11126  ;;  %v8447_v5 = vrot.slane %v13676_v24, %v11461_v45  ;;  %v8451_v57 = vrot.slane %v13676_v24, %v11663_v39  ;;  %11146 = vpow2.f32 %v8554_v63  ;;  %v8562_v26 = vmul.f32 1.442695, %v8515_v20 }
0x11fd   :  { %v13694_v36 = vpop.eup %11128  ;;  %v8455_v56 = vrot.slane %v13676_v24, %v11666_v42  ;;  %v8628_v12 = vcombine.low %v13682_v2, %v13688_v37  ;;  %11148 = vpow2.f32 %v8556_v11  ;;  %v8564_v13 = vmul.f32 1.442695, %v8516_v35 }
0x11fe   :  { %v13700_v34 = vpop.eup %11130  ;;  %v8459_v43 = vrot.slane %v13676_v24, %v11669_v44  ;;  %v8463_v59 = vrot.slane %v13676_v24, %v11672_v46  ;;  %11150 = vpow2.f32 %v8558_v38  ;;  %v8566_v28 = vmul.f32 1.442695, %v8517_v22 }
0x11ff   :  { %v13706_v50 = vpop.eup %11132  ;;  %v8629_v53 = vcombine.low %v13694_v36, %v13700_v34  ;;  %v8638_v40 = vrot.slane %v8628_v12, %v11493_v62  ;;  %11152 = vpow2.f32 %v8560_v18  ;;  %v8568_v20 = vmul.f32 1.442695, %v8518_v27 }
0x1200   :  { %v13711_v15 = vpop.eup %11134  ;;  %v8467_v1 = vrot.slane %v13676_v24, %v11675_v47  ;;  %v8524_v25 = vsub.f32 %v13552_v9, %v8439_v21  ;;  %11154 = vpow2.f32 %v8562_v26  ;;  %v8570_v19 = vmul.f32 1.442695, %v8519_v6  ;;  %v14274_v6 = vld [vmem:[#allocation35_spill] sm:$0xff] }
0x1201   :  { %v13716_v48 = vpop.eup %11136  ;;  %v8630_v30 = vcombine.low %v13706_v50, %v13711_v15  ;;  %v8645_v58 = vrot.slane %v8629_v53, %v11493_v62  ;;  %11156 = vpow2.f32 %v8564_v13  ;;  %v8572_v41 = vmul.f32 1.442695, %v8520_v60 }
0x1202   :  { %v13721_v54 = vpop.eup %11138  ;;  %v8525_v23 = vsub.f32 %v13548_v51, %v8443_v4  ;;  %11158 = vpow2.f32 %v8566_v28  ;;  %v8574_v55 = vmul.f32 1.442695, %v8521_v10  ;;  %v8576_v8 = vmul.f32 1.442695, %v8522_v33 }
0x1203   :  { %v13724_v7 = vpop.eup %11140  ;;  %v8631_v9 = vcombine.low %v13716_v48, %v13721_v54  ;;  %v8652_v35 = vrot.slane %v8630_v30, %v11493_v62  ;;  %v8660_v22 = vcombine.low %v8638_v40, %v8645_v58  ;;  %11160 = vpow2.f32 %v8568_v20 }
0x1204   :  { %v13729_v29 = vpop.eup %11142  ;;  %v8526_v27 = vsub.f32 %v13556_v3, %v8447_v5  ;;  %v8527_v24 = vsub.f32 %v14274_v6, %v8451_v57  ;;  %11162 = vpow2.f32 %v8570_v19  ;;  %v8578_v51 = vmul.f32 1.442695, %v8523_v0 }
0x1205   :  { %v13733_v63 = vpop.eup %11144  ;;  %v8659_v60 = vrot.slane %v8631_v9, %v11493_v62  ;;  %v8677_v10 = vcombine.low %v13724_v7, %v13729_v29  ;;  %11164 = vpow2.f32 %v8572_v41  ;;  %v8580_v11 = vmul.f32 1.442695, %v8524_v25 }
0x1206   :  { %v13738_v33 = vpop.eup %11146  ;;  %v8528_v38 = vsub.f32 %v13560_v14, %v8455_v56  ;;  %v8668_v21 = vrot.slane %v8660_v22, %v11493_v62  ;;  %11166 = vpow2.f32 %v8574_v55  ;;  %v8582_v3 = vmul.f32 1.442695, %v8525_v23 }
0x1207   :  { %v13742_v4 = vpop.eup %11148  ;;  %v8661_v0 = vcombine.low %v8652_v35, %v8659_v60  ;;  %v8678_v18 = vcombine.low %v13733_v63, %v13738_v33  ;;  %v8687_v5 = vrot.slane %v8677_v10, %v11493_v62  ;;  %11168 = vpow2.f32 %v8576_v8 }
0x1208   :  { %v13747_v57 = vpop.eup %11150  ;;  %v8529_v26 = vsub.f32 %v13568_v17, %v8459_v43  ;;  %v8530_v12 = vsub.f32 %v13572_v16, %v8463_v59  ;;  %11170 = vpow2.f32 %v8578_v51  ;;  %v8584_v14 = vmul.f32 1.442695, %v8526_v27 }
0x1209   :  { %v13751_v56 = vpop.eup %11152  ;;  %v8675_v13 = vrot.slane %v8661_v0, %v11493_v62  ;;  %v8679_v28 = vcombine.low %v13742_v4, %v13747_v57  ;;  %v8694_v53 = vrot.slane %v8678_v18, %v11493_v62  ;;  %11172 = vpow2.f32 %v8580_v11 }
0x120a   :  { %v13757_v40 = vpop.eup %11154  ;;  %v8531_v20 = vsub.f32 %v13608_v61, %v8467_v1  ;;  %11174 = vpow2.f32 %v8582_v3  ;;  %v8586_v17 = vmul.f32 1.442695, %v8527_v24  ;;  %v8588_v43 = vmul.f32 1.442695, %v8528_v38 }
0x120b   :  { %v13760_v16 = vpop.eup %11156  ;;  %v8676_v59 = vcombine.low %v8668_v21, %v8675_v13  ;;  %v8680_v25 = vcombine.low %v13751_v56, %v13757_v40  ;;  %v8701_v19 = vrot.slane %v8679_v28, %v11493_v62  ;;  %v8709_v30 = vcombine.low %v8687_v5, %v8694_v53 }
0x120c   :  { %v13765_v58 = vpop.eup %11158  ;;  %11176 = vpow2.f32 %v8584_v14  ;;  %v8590_v41 = vmul.f32 1.442695, %v8529_v26  ;;  %v8592_v8 = vmul.f32 1.442695, %v8530_v12  ;;  %v8594_v22 = vmul.f32 1.442695, %v8531_v20 }
0x120d   :  { %v13767_v23 = vpop.eup %11160  ;;  %v8828_v61 = vsel %vm1158_vm3, %v8676_v59, 0.0  ;;  %v8708_v1 = vrot.slane %v8680_v25, %v11493_v62  ;;  %v8726_v55 = vcombine.low %v13760_v16, %v13765_v58  ;;  %v8717_v35 = vrot.slane %v8709_v30, %v11493_v62 }
0x120e   :  { %v13773_v9 = vpop.eup %11162  ;;  %8829 = vadd.xlane.f32.xlu0 %v8828_v61  ;;  %11178 = vpow2.f32 %v8586_v17 }
0x120f   :  { %v13776_v27 = vpop.eup %11164  ;;  %v8710_v6 = vcombine.low %v8701_v19, %v8708_v1  ;;  %v8727_v24 = vcombine.low %v13767_v23, %v13773_v9  ;;  %v8736_v51 = vrot.slane %v8726_v55, %v11493_v62  ;;  %11180 = vpow2.f32 %v8588_v43 }
0x1210   :  { %v13781_v60 = vpop.eup %11166  ;;  %11182 = vpow2.f32 %v8590_v41 }
0x1211   :  { %v13783_v10 = vpop.eup %11168  ;;  %v8724_v11 = vrot.slane %v8710_v6, %v11493_v62  ;;  %v8728_v38 = vcombine.low %v13776_v27, %v13781_v60  ;;  %v8743_v21 = vrot.slane %v8727_v24, %v11493_v62  ;;  %11184 = vpow2.f32 %v8592_v8  ;;  %v13822_v6 = vld [vmem:[#allocation5 + $0x48] sm:$0xff]  }
0x1212   :  { %v13789_v3 = vpop.eup %11170  ;;  %11186 = vpow2.f32 %v8594_v22  ;;  %10645 = vmatpush3.bf16.msra.mxu0 %v13822_v6 }
0x1213   :  { %v13791_v0 = vpop.eup %11172  ;;  %v8725_v18 = vcombine.low %v8717_v35, %v8724_v11  ;;  %v8729_v5 = vcombine.low %v13783_v10, %v13789_v3  ;;  %v8750_v26 = vrot.slane %v8728_v38, %v11493_v62  ;;  %v8758_v12 = vcombine.low %v8736_v51, %v8743_v21  ;;  %10646 = vmatprep.subr.bf16.mxu0 %v14262_v49 }
0x1214   :  { %v13796_v14 = vpop.eup %11174 }
0x1215   :  { %v8831_v13 = vsel %vm1158_vm3, %v8725_v18, 0.0  ;;  %v8757_v28 = vrot.slane %v8729_v5, %v11493_v62  ;;  %v8775_v53 = vcombine.low %v13791_v0, %v13796_v14  ;;  %v8766_v43 = vrot.slane %v8758_v12, %v11493_v62  ;;  %v13833_v12 = vld [vmem:[#allocation5 + $0x50] sm:$0xff]  }
0x1216   :  { %v13802_v20 = vpop.eup %11176  ;;  %8832 = vadd.xlane.f32.xlu1 %v8831_v13  ;;  %14275 = vst [vmem:[#allocation18_spill] sm:$0xff] %v13833_v12  ;;  %10647 = vmatpush3.bf16.msra.mxu0 %v13833_v12 }
0x1217   :  { %v8759_v17 = vcombine.low %v8750_v26, %v8757_v28  ;;  %v8785_v41 = vrot.slane %v8775_v53, %v11493_v62  ;;  %10648 = vmatprep.subr.bf16.mxu0 %v14262_v49  ;;  %v13838_v53 = vld [vmem:[#allocation5 + $0x58] sm:$0xff]  }
0x1218   :  { %v13805_v59 = vpop.eup %11178  ;;  %14276 = vst [vmem:[#allocation14_spill] sm:$0xff] %v13838_v53 }
0x1219   :  { %v13807_v25 = vpop.eup %11180  ;;  %v8773_v19 = vrot.slane %v8759_v17, %v11493_v62  ;;  %v8776_v30 = vcombine.low %v13802_v20, %v13805_v59  ;;  %v14277_v17 = vld [vmem:[#allocation25_spill] sm:$0xff] }
0x121a   :  { %v13813_v61 = vpop.eup %11182  ;;  %10649 = vmatpush3.bf16.msra.mxu0 %v13838_v53 }
0x121b   :  { %v13815_v1 = vpop.eup %11184  ;;  %v8774_v55 = vcombine.low %v8766_v43, %v8773_v19  ;;  %v8777_v8 = vcombine.low %v13807_v25, %v13813_v61  ;;  %v8792_v35 = vrot.slane %v8776_v30, %v11493_v62  ;;  %10650 = vmatprep.subr.bf16.mxu0 %v14262_v49  ;;  %v13844_v43 = vld [vmem:[#allocation5 + $0x60] sm:$0xff]   ;;  %v14279_v19 = vld [vmem:[#allocation32_spill] sm:$0xff]  ;;  %v13852_v30 = vld [vmem:[#allocation5 + $0x68] sm:$0xff]  }
0x121c   :  { %v13820_v22 = vpop.eup %11186  ;;  %14278 = vst [vmem:[#allocation29_spill] sm:$0xff] %v13844_v43  ;;  %14280 = vst [vmem:[#allocation35_spill] sm:$0xff] %v13852_v30 }
0x121d   :  { %v8834_v24 = vsel %vm1158_vm3, %v8774_v55, 0.0  ;;  %v8778_v51 = vcombine.low %v13815_v1, %v13820_v22  ;;  %v8799_v11 = vrot.slane %v8777_v8, %v11493_v62  ;;  %v8807_v38 = vcombine.low %v8785_v41, %v8792_v35  ;;  %v14281_v41 = vld [vmem:[#allocation34_spill] sm:$0xff]  ;;  %v13860_v55 = vld [vmem:[#allocation5 + $0x70] sm:$0xff]   ;;  %v14283_v8 = vld [vmem:[#allocation33_spill] sm:$0xff] }
0x121e   :  { %8835 = vadd.xlane.f32.xlu0 %v8834_v24  ;;  %10651 = vmatpush3.bf16.msra.mxu0 %v13844_v43  ;;  %14282 = vst [vmem:[#allocation25_spill] sm:$0xff] %v13860_v55  ;;  %v13866_v35 = vld [vmem:[#allocation5 + $0x78] sm:$0xff]  }
0x121f   :  { %v8806_v21 = vrot.slane %v8778_v51, %v11493_v62  ;;  %v8815_v5 = vrot.slane %v8807_v38, %v11493_v62  ;;  %10652 = vmatprep.subr.bf16.mxu0 %v14262_v49  ;;  %14284 = vst [vmem:[#allocation32_spill] sm:$0xff] %v13866_v35 }
0x1221   :  { %v8808_v18 = vcombine.low %v8799_v11, %v8806_v21 }
0x1222   :  { %10653 = vmatpush3.bf16.msra.mxu0 %v13852_v30 }
0x1223   :  { %v8822_v26 = vrot.slane %v8808_v18, %v11493_v62  ;;  %10654 = vmatprep.subr.bf16.mxu0 %v14262_v49 }
0x1225   :  { %v8823_v13 = vcombine.low %v8815_v5, %v8822_v26 }
0x1226   :  { %10655 = vmatpush3.bf16.msra.mxu0 %v13860_v55 }
0x1227   :  { %v8837_v28 = vsel %vm1158_vm3, %v8823_v13, 0.0  ;;  %10656 = vmatprep.subr.bf16.mxu0 %v14262_v49 }
0x1228   :  { %8838 = vadd.xlane.f32.xlu1 %v8837_v28 }
0x122a   :  { %10657 = vmatpush3.bf16.msra.mxu0 %v13866_v35 }
0x122b   :  { %10702 = vmatprep.subr.bf16.mxu0 %v14262_v49 }
0x1234   :  { %9227 = vrot.lane.b32.xlu0 %v14277_v17, %s11311_s3 }
0x1238   :  { %7385 = vrot.lane.b32.xlu0 %v14279_v19, %s11312_s14 }
0x1239   :  { %9359 = vrot.lane.b32.xlu1 %v14277_v17, %s11302_s23 }
0x123c   :  { %7393 = vrot.lane.b32.xlu0 %v14281_v41, %s11311_s3 }
0x123d   :  { %9491 = vrot.lane.b32.xlu1 %v14277_v17, %s11312_s14 }
0x1241   :  { %7389 = vrot.lane.b32.xlu1 %v14283_v8, %s11302_s23 }
0x129b   :  { %v8830_v24 = vpop.xlane.xlu0 %8829 }
0x129c   :  { %11188 = vrcp.f32 %v8830_v24 }
0x12a3   :  { %v8833_v51 = vpop.xlane.xlu1 %8832 }
0x12a4   :  { %11190 = vrcp.f32 %v8833_v51 }
0x12a6   :  { %v11189_v11 = vpop.eup %11188 }
0x12a7   :  { %v8851_v38 = vrot.slane %v11189_v11, %v11442_v31  ;;  %v8855_v21 = vrot.slane %v11189_v11, %v11445_v32  ;;  %v8859_v18 = vrot.slane %v11189_v11, %v11461_v45  ;;  %v8863_v5 = vrot.slane %v11189_v11, %v11663_v39 }
0x12a8   :  { %v8867_v26 = vrot.slane %v11189_v11, %v11666_v42  ;;  %v8871_v13 = vrot.slane %v11189_v11, %v11669_v44  ;;  %v8875_v28 = vrot.slane %v11189_v11, %v11672_v46  ;;  %v8879_v17 = vrot.slane %v11189_v11, %v11675_v47 }
0x12a9   :  { %v9008_v19 = vmul.f32 %v13682_v2, %v8851_v38  ;;  %v9009_v41 = vmul.f32 %v13688_v37, %v8855_v21  ;;  %v9010_v8 = vmul.f32 %v13694_v36, %v8859_v18  ;;  %v9011_v24 = vmul.f32 %v13700_v34, %v8863_v5 }
0x12aa   :  { %v9012_v51 = vmul.f32 %v13706_v50, %v8867_v26  ;;  %v9013_v35 = vmul.f32 %v13711_v15, %v8871_v13  ;;  %v9014_v55 = vmul.f32 %v13716_v48, %v8875_v28  ;;  %v9015_v30 = vmul.f32 %v13721_v54, %v8879_v17 }
0x12ab   :  { %v8836_v43 = vpop.xlane.xlu0 %8835  ;;  %v9048_v53 = vcombine.low %v9008_v19, %v9009_v41  ;;  %v9049_v12 = vcombine.low %v9010_v8, %v9011_v24 }
0x12ac   :  { %11192 = vrcp.f32 %v8836_v43  ;;  %v9050_v11 = vcombine.low %v9012_v51, %v9013_v35  ;;  %v9051_v2 = vcombine.low %v9014_v55, %v9015_v30 }
0x12ad   :  { %v9058_v37 = vrot.slane %v9048_v53, %v11493_v62  ;;  %v9065_v36 = vrot.slane %v9049_v12, %v11493_v62 }
0x12ae   :  { %v11191_v38 = vpop.eup %11190  ;;  %v9072_v34 = vrot.slane %v9050_v11, %v11493_v62  ;;  %v9079_v50 = vrot.slane %v9051_v2, %v11493_v62 }
0x12af   :  { %v9080_v15 = vcombine.low %v9058_v37, %v9065_v36  ;;  %v8883_v48 = vrot.slane %v11191_v38, %v11442_v31  ;;  %v8887_v54 = vrot.slane %v11191_v38, %v11445_v32  ;;  %v8891_v21 = vrot.slane %v11191_v38, %v11461_v45 }
0x12b0   :  { %v9081_v18 = vcombine.low %v9072_v34, %v9079_v50  ;;  %v8895_v43 = vrot.slane %v11191_v38, %v11663_v39  ;;  %v8899_v30 = vrot.slane %v11191_v38, %v11666_v42  ;;  %v8903_v53 = vrot.slane %v11191_v38, %v11669_v44 }
0x12b1   :  { %v9088_v12 = vrot.slane %v9080_v15, %v11493_v62  ;;  %v8907_v55 = vrot.slane %v11191_v38, %v11672_v46  ;;  %v8911_v35 = vrot.slane %v11191_v38, %v11675_v47  ;;  %v9016_v5 = vmul.f32 %v13724_v7, %v8883_v48  ;;  %v9228_v38 = vpop.permute.xlu0 %9227 }
0x12b2   :  { %v9095_v26 = vrot.slane %v9081_v18, %v11493_v62  ;;  %v9017_v13 = vmul.f32 %v13729_v29, %v8887_v54  ;;  %v9018_v28 = vmul.f32 %v13733_v63, %v8891_v21  ;;  %v9019_v17 = vmul.f32 %v13738_v33, %v8895_v43 }
0x12b3   :  { %v9020_v19 = vmul.f32 %v13742_v4, %v8899_v30  ;;  %v9021_v41 = vmul.f32 %v13747_v57, %v8903_v53  ;;  %v9022_v8 = vmul.f32 %v13751_v56, %v8907_v55  ;;  %v9023_v24 = vmul.f32 %v13757_v40, %v8911_v35 }
0x12b4   :  { %v13908_v51 = vcombine.low %v9088_v12, %v9095_v26  ;;  %v9177_v11 = vcombine.low %v9016_v5, %v9017_v13  ;;  %v9178_v7 = vcombine.low %v9018_v28, %v9019_v17 }
0x12b5   :  { %v8839_v2 = vpop.xlane.xlu1 %8838  ;;  %v9179_v37 = vcombine.low %v9020_v19, %v9021_v41  ;;  %v9180_v36 = vcombine.low %v9022_v8, %v9023_v24  ;;  %v7386_v28 = vpop.permute.xlu0 %7385 }
0x12b6   :  { %v11193_v29 = vpop.eup %11192  ;;  %11194 = vrcp.f32 %v8839_v2  ;;  %10685 = vmatmul.mubr.msk.f32.vlgmr.msra.gmra.mrb[66].mxu1 %vm1158_vm3, %v13908_v51  ;;  %v9187_v63 = vrot.slane %v9177_v11, %v11493_v62  ;;  %v9194_v33 = vrot.slane %v9178_v7, %v11493_v62 }
0x12b7   :  { %10688 = vmatpush3.msra.mxu1 %v9228_v38  ;;  %10689 = vmatprep.mubr.msk.f32.mxu1 %vm11310_vm0, %v14262_v49  ;;  %v9201_v4 = vrot.slane %v9179_v37, %v11493_v62  ;;  %v9208_v57 = vrot.slane %v9180_v36, %v11493_v62  ;;  %v8915_v56 = vrot.slane %v11193_v29, %v11442_v31 }
0x12b8   :  { %10692 = vmatprep.subr.mxu1 %v14262_v49  ;;  %v9209_v40 = vcombine.low %v9187_v63, %v9194_v33  ;;  %v8919_v34 = vrot.slane %v11193_v29, %v11445_v32  ;;  %v8923_v50 = vrot.slane %v11193_v29, %v11461_v45  ;;  %v8927_v15 = vrot.slane %v11193_v29, %v11663_v39 }
0x12b9   :  { %v9360_v48 = vpop.permute.xlu1 %9359  ;;  %v9210_v54 = vcombine.low %v9201_v4, %v9208_v57  ;;  %v8931_v21 = vrot.slane %v11193_v29, %v11666_v42  ;;  %v8935_v18 = vrot.slane %v11193_v29, %v11669_v44  ;;  %v8939_v43 = vrot.slane %v11193_v29, %v11672_v46  ;;  %v7394_v33 = vpop.permute.xlu0 %7393 }
0x12ba   :  { %v9217_v30 = vrot.slane %v9209_v40, %v11493_v62  ;;  %v8943_v53 = vrot.slane %v11193_v29, %v11675_v47  ;;  %v9024_v12 = vmul.f32 %v13760_v16, %v8915_v56  ;;  %v9025_v55 = vmul.f32 %v13765_v58, %v8919_v34 }
0x12bb   :  { %v9224_v35 = vrot.slane %v9210_v54, %v11493_v62  ;;  %v9026_v5 = vmul.f32 %v13767_v23, %v8923_v50  ;;  %v9027_v26 = vmul.f32 %v13773_v9, %v8927_v15  ;;  %v9028_v13 = vmul.f32 %v13776_v27, %v8931_v21 }
0x12bc   :  { %v9029_v17 = vmul.f32 %v13781_v60, %v8935_v18  ;;  %v9030_v19 = vmul.f32 %v13783_v10, %v8939_v43  ;;  %v9031_v41 = vmul.f32 %v13789_v3, %v8943_v53  ;;  %v9310_v8 = vcombine.low %v9024_v12, %v9025_v55  ;;  %v14285_v60 = vld [vmem:[#allocation30_spill] sm:$0xff] }
0x12bd   :  { %v9492_v24 = vpop.permute.xlu1 %9491  ;;  %v13937_v16 = vcombine.low %v9217_v30, %v9224_v35  ;;  %v9311_v58 = vcombine.low %v9026_v5, %v9027_v26  ;;  %v7396_v10 = vsel %vm349_vm1, %v14285_v60, %v7386_v28  ;;  %v14294_v60 = vld [vmem:[#allocation22_spill] sm:$0xff] }
0x12be   :  { %v9312_v11 = vcombine.low %v9028_v13, %v9029_v17  ;;  %v9313_v7 = vcombine.low %v9030_v19, %v9031_v41  ;;  %v9320_v23 = vrot.slane %v9310_v8, %v11493_v62  ;;  %v14286_v17 = vld [vmem:[#allocation18_spill] sm:$0xff]  ;;  %v14288_v8 = vmov 0  }
0x12bf   :  { %10690 = vmatmul.mubr.msk.f32.vlgmr.msra.gmra.mrb[68].mxu1 %vm1158_vm3, %v13937_v16  ;;  %v9327_v9 = vrot.slane %v9311_v58, %v11493_v62  ;;  %v14287_v41 = vld [vmem:[#allocation14_spill] sm:$0xff]  ;;  %v14292_v58 = vld [vmem:[#allocation32_spill] sm:$0xff] }
0x12c0   :  { %v11195_v27 = vpop.eup %11194  ;;  %10693 = vmatpush3.msra.mxu1 %v9360_v48  ;;  %10694 = vmatprep.mubr.msk.f32.mxu1 %vm11310_vm0, %v14262_v49  ;;  %v9334_v3 = vrot.slane %v9312_v11, %v11493_v62  ;;  %v9341_v2 = vrot.slane %v9313_v7, %v11493_v62 }
0x12c1   :  { %v7390_v37 = vpop.permute.xlu1 %7389  ;;  %10697 = vmatprep.subr.mxu1 %v14262_v49  ;;  %v9342_v36 = vcombine.low %v9320_v23, %v9327_v9  ;;  %v8947_v29 = vrot.slane %v11195_v27, %v11442_v31  ;;  %v8951_v38 = vrot.slane %v11195_v27, %v11445_v32  ;;  %v8955_v63 = vrot.slane %v11195_v27, %v11461_v45 }
0x12c2   :  { %v7397_v4 = vsel %vm2414_vm5, %v7396_v10, %v7390_v37  ;;  %v9343_v57 = vcombine.low %v9334_v3, %v9341_v2  ;;  %v8959_v56 = vrot.slane %v11195_v27, %v11663_v39  ;;  %v8963_v40 = vrot.slane %v11195_v27, %v11666_v42 }
0x12c3   :  { %v7398_v34 = vsel %vm2416_vm6, %v7397_v4, %v7394_v33  ;;  %v9350_v50 = vrot.slane %v9342_v36, %v11493_v62  ;;  %v8967_v15 = vrot.slane %v11195_v27, %v11669_v44  ;;  %v8971_v48 = vrot.slane %v11195_v27, %v11672_v46 }
0x12c4   :  { %v7399_v54 = vpack.c.bf16 %v7398_v34, %v7398_v34  ;;  %v9357_v21 = vrot.slane %v9343_v57, %v11493_v62  ;;  %v8975_v18 = vrot.slane %v11195_v27, %v11675_v47  ;;  %v9032_v43 = vmul.f32 %v13791_v0, %v8947_v29  ;;  %v14293_v27 = vld [vmem:[#allocation21_spill] sm:$0xff] }
0x12c5   :  { %v9033_v30 = vmul.f32 %v13796_v14, %v8951_v38  ;;  %v9034_v53 = vmul.f32 %v13802_v20, %v8955_v63  ;;  %v9035_v12 = vmul.f32 %v13805_v59, %v8959_v56  ;;  %v9036_v55 = vmul.f32 %v13807_v25, %v8963_v40 }
0x12c6   :  { %10659 = vmatmul.mubr.bf16.vlgmr.msra.gmra.mrb[24].mxu0 %v7399_v54  ;;  %v13967_v35 = vcombine.low %v9350_v50, %v9357_v21  ;;  %v9037_v46 = vmul.f32 %v13813_v61, %v8967_v15  ;;  %v9038_v5 = vmul.f32 %v13815_v1, %v8971_v48  ;;  %v9039_v26 = vmul.f32 %v13820_v22, %v8975_v18 }
0x12c7   :  { %v9442_v47 = vcombine.low %v9032_v43, %v9033_v30  ;;  %v9443_v13 = vcombine.low %v9034_v53, %v9035_v12  ;;  %10703 = vmatpush3.bf16.msra.mxu0 %v13628_v52  ;;  %10718 = vmatprep.mubr.msk.bf16.mxu0 %vm11310_vm0, %v14262_v49  ;;  %v9639_v10 = vadd.f32 %v14294_v60, %v14293_v27  ;;  %v14295_v30 = vld [vmem:[#allocation23_spill] sm:$0xff]  ;;  %v10889_v27 = vld [vmem:[#allocation7 + $0x90] sm:$0xff]   ;;  %v10890_v60 = vld [vmem:[#allocation7 + $0xd8] sm:$0xff]  }
0x12c8   :  { %10695 = vmatmul.mubr.msk.f32.vlgmr.msra.gmra.mrb[70].mxu1 %vm1158_vm3, %v13967_v35  ;;  %v9444_v0 = vcombine.low %v9036_v55, %v9037_v46  ;;  %v9445_v14 = vcombine.low %v9038_v5, %v9039_v26  ;;  %10704 = vmatprep.subr.bf16.mxu0 %v14262_v49  ;;  %v10860_v5 = vld [vmem:[%s14136_s4 + $0x80] ss:$8 sps:$4 sm:$0xff]   ;;  %v10862_v26 = vld [vmem:[%s14136_s4 + $0x84] ss:$8 sps:$4 sm:$0xff]  }
0x12c9   :  { %10698 = vmatpush3.msra.mxu1 %v9492_v24  ;;  %10699 = vmatprep.mubr.msk.f32.mxu1 %vm11310_vm0, %v14262_v49  ;;  %v9452_v20 = vrot.slane %v9442_v47, %v11493_v62  ;;  %v9459_v59 = vrot.slane %v9443_v13, %v11493_v62  ;;  %v14291_v24 = vld [vmem:[#allocation25_spill] sm:$0xff] }
0x12ca   :  { %v9466_v52 = vrot.slane %v9444_v0, %v11493_v62  ;;  %v9473_v25 = vrot.slane %v9445_v14, %v11493_v62  ;;  %v10865_v47 = vld [vmem:[%s14136_s4 + $0x94] ss:$8 sps:$4 sm:$0xff]   ;;  %9786 = vmatprep.subr.bf16.mxu1 %v10862_v26  ;;  %v10863_v13 = vld [vmem:[%s14136_s4 + $0x90] ss:$8 sps:$4 sm:$0xff]   ;;  %v10868_v0 = vld [vmem:[%s14136_s4 + $0xa4] ss:$8 sps:$4 sm:$0xff]  }
0x12cb   :  { %v9474_v61 = vcombine.low %v9452_v20, %v9459_v59  ;;  %10705 = vmatpush3.bf16.msra.mxu0 %v13822_v6  ;;  %v14289_v6 = vld [vmem:[#allocation29_spill] sm:$0xff]  ;;  %v10866_v14 = vld [vmem:[%s14136_s4 + $0xa0] ss:$8 sps:$4 sm:$0xff]  }
0x12cc   :  { %v9475_v1 = vcombine.low %v9466_v52, %v9473_v25  ;;  %10706 = vmatprep.subr.bf16.mxu0 %v14262_v49 }
0x12cd   :  { %v9482_v22 = vrot.slane %v9474_v61, %v11493_v62  ;;  %v10871_v61 = vld [vmem:[%s14136_s4 + $0xb4] ss:$8 sps:$4 sm:$0xff]  }
0x12ce   :  { %v9489_v28 = vrot.slane %v9475_v1, %v11493_v62  ;;  %v14290_v62 = vld [vmem:[#allocation35_spill] sm:$0xff]  ;;  %v10869_v1 = vld [vmem:[%s14136_s4 + $0xb0] ss:$8 sps:$4 sm:$0xff]  }
0x12cf   :  { %10707 = vmatpush3.bf16.msra.mxu0 %v14286_v17  ;;  %v10877_v17 = vld [vmem:[%s14136_s4 + $0xd4] ss:$8 sps:$4 sm:$0xff]  }
0x12d0   :  { %v13989_v19 = vcombine.low %v9482_v22, %v9489_v28  ;;  %10708 = vmatprep.subr.bf16.mxu0 %v14262_v49  ;;  %v10874_v22 = vld [vmem:[%s14136_s4 + $0xc4] ss:$8 sps:$4 sm:$0xff]   ;;  %v10872_v28 = vld [vmem:[%s14136_s4 + $0xc0] ss:$8 sps:$4 sm:$0xff]  }
0x12d2   :  { %10700 = vmatmul.mubr.msk.f32.vlgmr.msra.gmra.mrb[72].mxu1 %vm1158_vm3, %v13989_v19 }
0x12d3   :  { %10709 = vmatpush3.bf16.msra.mxu0 %v14287_v41  ;;  %9818 = vmatprep.mubr.bf16.mxu1 %v14288_v8  ;;  %v10875_v41 = vld [vmem:[%s14136_s4 + $0xd0] ss:$8 sps:$4 sm:$0xff]   ;;  %v10880_v8 = vld [vmem:[%s14136_s4 + $0xe4] ss:$8 sps:$4 sm:$0xff]  }
0x12d4   :  { %10710 = vmatprep.subr.bf16.mxu0 %v14262_v49  ;;  %9787 = vmatpush1.bf16.msra.mxu1 %v10860_v5  ;;  %v10175_v5 = vld [vmem:[%s14140_s8 + $0x2] sm:$0x3]  ;;  %s11314_s8 = smov 8  }
0x12d5   :  { %9788 = vmatprep.subr.bf16.mxu1 %v10865_v47  ;;  %v9703_v26 = vrot.slane %v10175_v5, %v11445_v32 }
0x12d7   :  { %10711 = vmatpush3.bf16.msra.mxu0 %v14289_v6  ;;  %v10878_v6 = vld [vmem:[%s14136_s4 + $0xe0] ss:$8 sps:$4 sm:$0xff]  }
0x12d8   :  { %10712 = vmatprep.subr.bf16.mxu0 %v14262_v49  ;;  %9789 = vmatpush1.bf16.msra.mxu1 %v10863_v13 }
0x12d9   :  { %9790 = vmatprep.subr.bf16.mxu1 %v10868_v0 }
0x12db   :  { %10713 = vmatpush3.bf16.msra.mxu0 %v14290_v62  ;;  %v10883_v62 = vld [vmem:[%s14136_s4 + $0xf4] ss:$8 sps:$4 sm:$0xff]  }
0x12dc   :  { %10714 = vmatprep.subr.bf16.mxu0 %v14262_v49  ;;  %9791 = vmatpush1.bf16.msra.mxu1 %v10866_v14 }
0x12dd   :  { %9792 = vmatprep.subr.bf16.mxu1 %v10871_v61 }
0x12df   :  { %10715 = vmatpush3.bf16.msra.mxu0 %v14291_v24  ;;  %v10881_v24 = vld [vmem:[%s14136_s4 + $0xf0] ss:$8 sps:$4 sm:$0xff]  }
0x12e0   :  { %10716 = vmatprep.subr.bf16.mxu0 %v14262_v49  ;;  %9793 = vmatpush1.bf16.msra.mxu1 %v10869_v1 }
0x12e1   :  { %9794 = vmatprep.subr.bf16.mxu1 %v10874_v22 }
0x12e3   :  { %10717 = vmatpush3.bf16.msra.mxu0 %v14292_v58  ;;  %v10884_v58 = vld [vmem:[#allocation7 + $0xc0] sm:$0xff]  }
0x12e4   :  { %9795 = vmatpush1.bf16.msra.mxu1 %v10872_v28  ;;  %10420 = vmatprep.subr.bf16.mxu0 %v10884_v58 }
0x12e5   :  { %9796 = vmatprep.subr.bf16.mxu1 %v10877_v17 }
0x12e8   :  { %9797 = vmatpush1.bf16.msra.mxu1 %v10875_v41 }
0x12e9   :  { %9798 = vmatprep.subr.bf16.mxu1 %v10880_v8 }
0x12ec   :  { %9799 = vmatpush1.bf16.msra.mxu1 %v10878_v6 }
0x12ed   :  { %9800 = vmatprep.subr.bf16.mxu1 %v10883_v62 }
0x12f0   :  { %9801 = vmatpush1.bf16.msra.mxu1 %v10881_v24 }
0x1389   :  { %v9165_v11 = vpop.f32.mrb[66].mxu1 }
0x138a   :  { %v10686_v7 = vpop.f32.mrb[67].mxu1 }
0x138b   :  { %v10886_v7 = vld [vmem:[#allocation7 + $0xc8] sm:$0xff]  }
0x1392   :  { %v9298_v23 = vpop.f32.mrb[68].mxu1 }
0x1393   :  { %9567 = vrot.lane.b32.xlu1 %v9298_v23, %s11312_s14  ;;  %v10691_v9 = vpop.f32.mrb[69].mxu1  ;;  %v10887_v23 = vld [vmem:[#allocation7 + $0x88] sm:$0xff]  }
0x1394   :  { %v10888_v9 = vld [vmem:[#allocation7 + $0xd0] sm:$0xff]  }
0x1399   :  { %v7499_v3 = vpop.f32.mrb[24].mxu0 }
0x139a   :  { %v9641_v2 = vadd.f32 %v9639_v10, %v7499_v3  ;;  %v10660_v37 = vpop.f32.mrb[25].mxu0  ;;  %v10891_v10 = vld [vmem:[#allocation7 + $0x98] sm:$0xff]   ;;  %v10892_v3 = vld [vmem:[#allocation7 + $0xe0] sm:$0xff]  }
0x139b   :  { %v7502_v36 = vpop.f32.mrb[26].mxu0  ;;  %v9430_v29 = vpop.f32.mrb[70].mxu1  ;;  %v10894_v37 = vld [vmem:[#allocation7 + $0xe8] sm:$0xff]  }
0x139c   :  { %v10661_v38 = vpop.f32.mrb[27].mxu0  ;;  %9571 = vrot.lane.b32.xlu0 %v9430_v29, %s11302_s23  ;;  %v10696_v49 = vpop.f32.mrb[71].mxu1 }
0x13a5   :  { %v9562_v63 = vpop.f32.mrb[72].mxu1 }
0x13a6   :  { %9575 = vrot.lane.b32.xlu1 %v9562_v63, %s11311_s3  ;;  %v10701_v33 = vpop.f32.mrb[73].mxu1 }
0x13bb   :  { %9643 = vadd.xlane.f32.xlu0 %v9641_v2 }
0x1405   :  { %v9568_v4 = vpop.permute.xlu1 %9567 }
0x1406   :  { %v9578_v56 = vsel %vm349_vm1, %v9165_v11, %v9568_v4  ;;  %v10885_v11 = vld [vmem:[#allocation7 + $0x80] sm:$0xff]  }
0x140e   :  { %v9572_v57 = vpop.permute.xlu0 %9571 }
0x140f   :  { %v9579_v40 = vsel %vm2414_vm5, %v9578_v56, %v9572_v57  ;;  %v14069_v56 = vld [vmem:[%s14138_s6 + $0x8] sm:$0x3f] }
0x1418   :  { %v9576_v34 = vpop.permute.xlu1 %9575 }
0x1419   :  { %v9580_v50 = vsel %vm2416_vm6, %v9579_v40, %v9576_v34  ;;  %v9668_v40 = vrot.slane %v14069_v56, %v11445_v32 }
0x141a   :  { %v9581_v15 = vpack.c.bf16 %v9580_v50, %v9580_v50 }
0x141c   :  { %10719 = vmatmul.mubr.bf16.vlgmr.msra.gmra.mrb[28].mxu0 %v9581_v15 }
0x141d   :  { %10421 = vmatpush3.bf16.msra.mxu0 %v10885_v11 }
0x141e   :  { %10422 = vmatprep.subr.bf16.mxu0 %v10886_v7 }
0x1421   :  { %10423 = vmatpush3.bf16.msra.mxu0 %v10887_v23 }
0x1422   :  { %10424 = vmatprep.subr.bf16.mxu0 %v10888_v9 }
0x1425   :  { %10425 = vmatpush3.bf16.msra.mxu0 %v10889_v27  ;;  %v14296_v27 = vld [vmem:[#allocation19_spill] sm:$0xff] }
0x1426   :  { %10426 = vmatprep.subr.bf16.mxu0 %v10890_v60  ;;  %v14297_v60 = vld [vmem:[#allocation27_spill] sm:$0xff] }
0x1429   :  { %10427 = vmatpush3.bf16.msra.mxu0 %v10891_v10  ;;  %v14299_v10 = vld [vmem:[#allocation20_spill] sm:$0xff] }
0x142a   :  { %10428 = vmatprep.subr.bf16.mxu0 %v10892_v3  ;;  %v14300_v3 = vld [vmem:[#allocation28_spill] sm:$0xff] }
0x1448   :  { %v9644_v48 = vpop.xlane.xlu0 %9643 }
0x1449   :  { %v9647_v54 = vmul.f32 0.0078125, %v9644_v48  ;;  %v9674_v48 = vrot.slane %v14069_v56, %v11461_v45  ;;  %v9699_v45 = vrot.slane %v10175_v5, %v11442_v31  ;;  %v9871_v31 = vrot.slane %v14069_v56, %v11663_v39  ;;  %v14298_v39 = vld [vmem:[#allocation24_spill] sm:$0xff]  ;;  %v14306_v5 = vld [vmem:[#allocation15_spill] sm:$0xff] }
0x144b   :  { %v14012_v21 = vsub.f32 %v9641_v2, %v9647_v54  ;;  %v10893_v2 = vld [vmem:[#allocation7 + $0xa0] sm:$0xff]  }
0x144c   :  { %10429 = vmatpush3.bf16.msra.mxu0 %v10893_v2  ;;  %v14301_v2 = vld [vmem:[#allocation31_spill] sm:$0xff] }
0x144d   :  { %v9651_v18 = vmul.f32 %v14012_v21, %v14012_v21  ;;  %10430 = vmatprep.subr.bf16.mxu0 %v10894_v37  ;;  %v14302_v37 = vld [vmem:[#allocation13_spill] sm:$0xff] }
0x144f   :  { %9653 = vadd.xlane.f32.xlu0 %v9651_v18 }
0x14dc   :  { %v9654_v36 = vpop.xlane.xlu0 %9653 }
0x14dd   :  { %v9657_v29 = vmul.f32 0.0078125, %v9654_v36  ;;  %v14303_v36 = vld [vmem:[#allocation16_spill] sm:$0xff] }
0x14df   :  { %v9659_v38 = vadd.f32 1e-05, %v9657_v29  ;;  %v14304_v29 = vld [vmem:[#allocation17_spill] sm:$0xff] }
0x14e1   :  { %11196 = vrsqrt.f32 %v9659_v38 }
0x14eb   :  { %v11197_v4 = vpop.eup %11196 }
0x14ec   :  { %v9663_v57 = vmul.f32 %v11197_v4, %v14012_v21  ;;  %v10895_v21 = vld [vmem:[#allocation7 + $0xa8] sm:$0xff]  }
0x14ed   :  { %10431 = vmatpush3.bf16.msra.mxu0 %v10895_v21 }
0x14ee   :  { %v9669_v15 = vmul.f32 %v9668_v40, %v9663_v57 }
0x14ef   :  { %v9616_v43 = vpop.f32.mrb[28].mxu0 }
0x14f0   :  { %v9642_v53 = vadd.f32 %v14295_v30, %v9616_v43  ;;  %v10720_v12 = vpop.f32.mrb[29].mxu0  ;;  %v9675_v18 = vadd.f32 %v9674_v48, %v9669_v15 }
0x14f1   :  { %v9619_v55 = vpop.f32.mrb[30].mxu0  ;;  %v10897_v12 = vld [vmem:[#allocation7 + $0xb0] sm:$0xff]  }
0x14f2   :  { %9645 = vadd.xlane.f32.xlu1 %v9642_v53  ;;  %v10721_v46 = vpop.f32.mrb[31].mxu0  ;;  %v10898_v55 = vld [vmem:[#allocation7 + $0xf8] sm:$0xff]  }
0x14f3   :  { %v10899_v46 = vld [vmem:[#allocation7 + $0xb8] sm:$0xff]  }
0x157f   :  { %v9646_v20 = vpop.xlane.xlu1 %9645 }
0x1580   :  { %v9648_v59 = vmul.f32 0.0078125, %v9646_v20 }
0x1582   :  { %v9650_v52 = vsub.f32 %v9642_v53, %v9648_v59  ;;  %v10896_v53 = vld [vmem:[#allocation7 + $0xf0] sm:$0xff]  }
0x1583   :  { %10432 = vmatprep.subr.bf16.mxu0 %v10896_v53 }
0x1584   :  { %v9652_v25 = vmul.f32 %v9650_v52, %v9650_v52  ;;  %10433 = vmatpush3.bf16.msra.mxu0 %v10897_v12 }
0x1585   :  { %10434 = vmatprep.subr.bf16.mxu0 %v10898_v55 }
0x1586   :  { %9655 = vadd.xlane.f32.xlu0 %v9652_v25 }
0x1588   :  { %10435 = vmatpush3.bf16.msra.mxu0 %v10899_v46 }
0x1613   :  { %v9656_v49 = vpop.xlane.xlu0 %9655 }
0x1614   :  { %v9658_v63 = vmul.f32 0.0078125, %v9656_v49 }
0x1616   :  { %v9660_v33 = vadd.f32 1e-05, %v9658_v63 }
0x1618   :  { %11198 = vrsqrt.f32 %v9660_v33 }
0x1622   :  { %v11199_v34 = vpop.eup %11198 }
0x1623   :  { %v9664_v50 = vmul.f32 %v11199_v34, %v9650_v52 }
0x1625   :  { %v9670_v54 = vmul.f32 %v9668_v40, %v9664_v50 }
0x1627   :  { %v9676_v43 = vadd.f32 %v9674_v48, %v9670_v54 }
0x1629   :  { %v9677_v30 = vpack.c.bf16 %v9676_v43, %v9675_v18 }
0x162b   :  { %9819 = vmatmul.mubr.bf16.vlgmr.msra.gmra.mrb[76].mxu1 %v9677_v30 }
0x16fe   :  { %v9820_v47 = vpop.f32.mrb[76].mxu1 }
0x16ff   :  { %v9821_v13 = vadd.f32 %v9820_v47, %v9699_v45  ;;  %v9822_v0 = vpop.f32.mrb[77].mxu1 }
0x1700   :  { %v9823_v14 = vadd.f32 %v9822_v0, %v9703_v26  ;;  %v9824_v20 = vpop.f32.mrb[78].mxu1 }
0x1701   :  { %v9825_v59 = vadd.f32 %v9824_v20, %v9699_v45  ;;  %v9826_v52 = vpop.f32.mrb[79].mxu1  ;;  %v9829_v61 = vmax.f32 %v9821_v13, 0.0 }
0x1702   :  { %v9827_v25 = vadd.f32 %v9826_v52, %v9703_v26  ;;  %v9830_v22 = vmax.f32 %v9823_v14, 0.0  ;;  %v14307_v26 = vld [vmem:[#allocation12_spill] sm:$0xff] }
0x1703   :  { %v9831_v1 = vmax.f32 %v9825_v59, 0.0 }
0x1704   :  { %v9832_v28 = vmax.f32 %v9827_v25, 0.0 }
0x1705   :  { %v9833_v17 = vpack.c.bf16 %v9831_v1, %v9829_v61 }
0x1706   :  { %v9834_v41 = vpack.c.bf16 %v9832_v28, %v9830_v22 }
0x1708   :  { %10000 = vmatprep.mubr.bf16.mxu0 %v9834_v41 }
0x1709   :  { %10001 = vmatmul.mubr.bf16.vlgmr.msra.gmra.mrb[32].mxu0 %v9833_v17 }
0x17dc   :  { %v10436_v8 = vpop.f32.mrb[32].mxu0 }
0x17dd   :  { %v10437_v32 = vpop.f32.mrb[33].mxu0 }
0x17de   :  { %v10438_v6 = vadd.f32 %v10437_v32, %v10436_v8  ;;  %v10439_v62 = vpop.f32.mrb[34].mxu0 }
0x17df   :  { %v10440_v24 = vpop.f32.mrb[35].mxu0 }
0x17e0   :  { %v10003_v58 = vadd.f32 %v10438_v6, %v9871_v31  ;;  %v10441_v11 = vadd.f32 %v10440_v24, %v10439_v62 }
0x17e2   :  { %v10006_v7 = vadd.f32 %v10441_v11, %v9871_v31  ;;  %v10009_v23 = vadd.f32 %v10003_v58, %v9675_v18  ;;  %v10036_v58 = vrot.slane %v14069_v56, %v11666_v42 }
0x17e4   :  { %10011 = vadd.xlane.f32.xlu1 %v10009_v23  ;;  %v10010_v9 = vadd.f32 %v10006_v7, %v9676_v43  ;;  %v14305_v43 = vld [vmem:[#allocation26_spill] sm:$0xff] }
0x17e6   :  { %10013 = vadd.xlane.f32.xlu0 %v10010_v9 }
0x17f5   :  { %4645 = vrot.lane.b32.xlu1 %v14296_v27, %s11314_s8 }
0x17f9   :  { %7506 = vrot.lane.b32.xlu1 %v14297_v60, %s11314_s8 }
0x17fc   :  { %4648 = vrot.lane.b32.xlu0 %v14298_v39, %s11315_s2 }
0x17fd   :  { %4651 = vrot.lane.b32.xlu1 %v14299_v10, %s11316_s28 }
0x1800   :  { %7509 = vrot.lane.b32.xlu0 %v14300_v3, %s11315_s2 }
0x1801   :  { %9623 = vrot.lane.b32.xlu1 %v13937_v16, %s11314_s8 }
0x1804   :  { %7512 = vrot.lane.b32.xlu0 %v14301_v2, %s11316_s28 }
0x1805   :  { %9626 = vrot.lane.b32.xlu1 %v13967_v35, %s11315_s2 }
0x1808   :  { %9629 = vrot.lane.b32.xlu0 %v13989_v19, %s11316_s28 }
0x1809   :  { %2527 = vrot.lane.b32.xlu1 %v14302_v37, %s11315_s2 }
0x180c   :  { %2524 = vrot.lane.b32.xlu0 %v14303_v36, %s11314_s8 }
0x180d   :  { %2530 = vrot.lane.b32.xlu1 %v14304_v29, %s11316_s28 }
0x1871   :  { %v10012_v38 = vpop.xlane.xlu1 %10011 }
0x1872   :  { %v10015_v49 = vmul.f32 0.0078125, %v10012_v38 }
0x1873   :  { %v10014_v63 = vpop.xlane.xlu0 %10013 }
0x1874   :  { %v10017_v33 = vsub.f32 %v10009_v23, %v10015_v49  ;;  %v10016_v4 = vmul.f32 0.0078125, %v10014_v63  ;;  %v10042_v23 = vrot.slane %v14069_v56, %v11669_v44 }
0x1875   :  { %v4646_v57 = vpop.permute.xlu1 %4645 }
0x1876   :  { %v10018_v16 = vsub.f32 %v10010_v9, %v10016_v4  ;;  %v10019_v40 = vmul.f32 %v10017_v33, %v10017_v33  ;;  %v4654_v47 = vsel %vm1158_vm3, %v14307_v26, %v4646_v57 }
0x1877   :  { %v4649_v34 = vpop.permute.xlu0 %4648 }
0x1878   :  { %10021 = vadd.xlane.f32.xlu1 %v10019_v40  ;;  %v10020_v35 = vmul.f32 %v10018_v16, %v10018_v16  ;;  %v4655_v14 = vsel %vm2534_vm7, %v4654_v47, %v4649_v34 }
0x1879   :  { %v7507_v50 = vpop.permute.xlu1 %7506 }
0x187a   :  { %10023 = vadd.xlane.f32.xlu0 %v10020_v35  ;;  %v7515_v30 = vsel %vm1158_vm3, %v14305_v43, %v7507_v50 }
0x187b   :  { %v7510_v19 = vpop.permute.xlu0 %7509 }
0x187c   :  { %v7516_v53 = vsel %vm2534_vm7, %v7515_v30, %v7510_v19 }
0x187d   :  { %v4652_v15 = vpop.permute.xlu1 %4651 }
0x187e   :  { %v4656_v59 = vsel %vm2536_vm8, %v4655_v14, %v4652_v15 }
0x187f   :  { %v7513_v48 = vpop.permute.xlu0 %7512 }
0x1880   :  { %v7517_v55 = vsel %vm2536_vm8, %v7516_v53, %v7513_v48 }
0x1881   :  { %v9624_v54 = vpop.permute.xlu1 %9623 }
0x1882   :  { %v9632_v52 = vsel %vm1158_vm3, %v13908_v51, %v9624_v54 }
0x1883   :  { %v9630_v18 = vpop.permute.xlu0 %9629 }
0x1885   :  { %v9627_v21 = vpop.permute.xlu1 %9626 }
0x1886   :  { %v9633_v25 = vsel %vm2534_vm7, %v9632_v52, %v9627_v21 }
0x1887   :  { %v2525_v12 = vpop.permute.xlu0 %2524  ;;  %v9634_v61 = vsel %vm2536_vm8, %v9633_v25, %v9630_v18 }
0x1888   :  { %v2533_v45 = vsel %vm1158_vm3, %v14306_v5, %v2525_v12 }
0x1889   :  { %10052 = vrot.lane.b32.xlu1 %v7517_v55, %s11302_s23  ;;  %v2528_v46 = vpop.permute.xlu1 %2527 }
0x188a   :  { %v2535_v13 = vsel %vm2534_vm7, %v2533_v45, %v2528_v46 }
0x188d   :  { %v2531_v0 = vpop.permute.xlu1 %2530 }
0x188e   :  { %v2537_v20 = vsel %vm2536_vm8, %v2535_v13, %v2531_v0 }
0x1890   :  { %10048 = vrot.lane.b32.xlu0 %v4656_v59, %s11312_s14 }
0x1894   :  { %10056 = vrot.lane.b32.xlu0 %v9634_v61, %s11311_s3  ;;  %s11317_s3 = smov [#allocation8]  }
0x1895   :  { %s10068_s5 = sshll.u32 %s11317_s3, 4  ;;  %s10069_s5 = int_to_ptr.vmem [resolvable:$true] %s10068_s5 }
0x1896   :  { %p11278_p11 = scmp.lt.s32.totalorder %s10069_s5, %s10069_s5 }
0x1905   :  { %v10022_v1 = vpop.xlane.xlu1 %10021 }
0x1906   :  { %v10025_v22 = vmul.f32 0.0078125, %v10022_v1 }
0x1907   :  { %v10024_v28 = vpop.xlane.xlu0 %10023 }
0x1908   :  { %v10027_v17 = vadd.f32 1e-05, %v10025_v22  ;;  %v10026_v41 = vmul.f32 0.0078125, %v10024_v28 }
0x1909   :  { %v10053_v6 = vpop.permute.xlu1 %10052 }
0x190a   :  { %11200 = vrsqrt.f32 %v10027_v17  ;;  %v10028_v8 = vadd.f32 1e-05, %v10026_v41 }
0x190b   :  { %v10049_v31 = vpop.permute.xlu0 %10048 }
0x190c   :  { %11202 = vrsqrt.f32 %v10028_v8  ;;  %v10059_v32 = vsel %vm349_vm1, %v2537_v20, %v10049_v31 }
0x190d   :  { %v10060_v51 = vsel %vm2414_vm5, %v10059_v32, %v10053_v6 }
0x190f   :  { %v10057_v62 = vpop.permute.xlu0 %10056 }
0x1910   :  { %v10061_v24 = vsel %vm2416_vm6, %v10060_v51, %v10057_v62 }
0x1911   :  { %10062 = vst [vmem:[%s14142_s10] sm:$0xff] %v10061_v24  ;;  %s11273_s10 = scalar_lea.vmem %s10069_s5, 256 }
0x1912   :  { %p11274_p10 = scmp.ne.s32.totalorder %s10069_s5, %s11273_s10  ;;  %p11279_p12 = scmp.lt.s32.totalorder %s11273_s10, %s11273_s10 }
0x1914   :  { %v11201_v11 = vpop.eup %11200  ;;  %p11280_p13 = por %p11279_p12, %p11278_p11 }
0x1915   :  { %v10031_v7 = vmul.f32 %v11201_v11, %v10017_v33 }
0x1916   :  { %v11203_v9 = vpop.eup %11202  ;;  %p11281_p0 = pnand %p11280_p13, %p11274_p10 }
0x1917   :  { %v10032_v27 = vmul.f32 %v11203_v9, %v10018_v16  ;;  %v10037_v60 = vmul.f32 %v10036_v58, %v10031_v7 }
0x1919   :  { %v10038_v39 = vmul.f32 %v10036_v58, %v10032_v27  ;;  %v10043_v10 = vadd.f32 %v10042_v23, %v10037_v60 }
0x191b   :  { %v10044_v3 = vadd.f32 %v10042_v23, %v10038_v39  ;;  %10045 = vst [vmem:[#allocation8] sm:$0xff] %v10043_v10 }
0x191d   :  { %10046 = vst [vmem:[#allocation8 + $0x8] sm:$0xff] %v10044_v3 }
0x191e   :  { %11284 = shalt.err (!%p11281_p0)
}
0x191f   :  { %s11285_s15 = scalar_lea.hbm %s14141_s9, 256 }
0x1920   :  { %p11286_p1 = scmp.ne.s32.totalorder %s14141_s9, %s11285_s15  ;;  %p11289_p2 = scmp.lt.u32.totalorder %s11285_s15, %s14141_s9 }
0x1922   :  { %p11291_p3 = pnand %p11289_p2, %p11286_p1 }
0x1924   :  { %11294 = shalt.err (!%p11291_p3)
}
0x1925   :  { %s11318_s20 = smov 128  }
0x1926   :  { %10074 = dma.vmem_to_hbm [thread:$0]  %s10069_s5, 256, %s14141_s9, [#allocation4], %s11318_s20, %s11318_s20, %s11314_s8  }
0x1927   :  { %11299 = dma.done.wait [#allocation4], 256  }
0x1928   :  { %11300 = vsyncadd [#allocation4], 4294967040 }
0x1929   :  { %10082 = vsyncpa [#allocation3], 1 }
0x192a   :  { %10083 = vsyncpa [#allocation6], 1 }
0x192b   :  { %10084 = vsyncpa [#allocation4], 1 }

</bundles_post_ra>
